<compile_context>
chip_gen: v5e
topology: v5e:2x2
jax: 0.10.0
libtpu: 0.0.40
codegen_flags: <defaults>
</compile_context>

<pallas_src>
import jax
import jax.numpy as jnp
from jax import lax
from jax.experimental import pallas as pl
from jax.experimental.pallas import tpu as pltpu

B, T, E, H, L, NT = 2, 8, 16, 32, 2, 2   # batch, seq, emb, hidden, layers, tags
N_LSTM = 3 * 2 * L                        # raw params: (Wih^T, Whh^T, bias) per (layer, dir)
N_FUSED = 4 * L                           # fused per layer: Wih^T(2 dirs), Whh_f^T, Whh_b^T, bias(2 dirs)


def lstm_crf_kernel(x_ref, tags_ref, mask_ref, *rest):
    lstm_p = rest[:N_FUSED]
    wlin_ref, blin_ref, start_ref, end_ref, trans_ref = rest[N_FUSED:N_FUSED + 5]
    out_ref = rest[N_FUSED + 5]
    h_bufs = rest[N_FUSED + 6:]            # hf0, hb0, hf1, hb1 : (T, B, H) each

    G = 4 * H                              # per-direction gate width (128 lanes)

    # ---------------- bidirectional multi-layer LSTM ----------------
    for layer in range(L):
        wih = lstm_p[4 * layer][...]       # (in_dim, 8H)  columns: [fwd gates | bwd gates]
        whh_f = lstm_p[4 * layer + 1][...] # (H, 4H)
        whh_b = lstm_p[4 * layer + 2][...] # (H, 4H)
        bias = lstm_p[4 * layer + 3][...]  # (1, 8H)
        hf_buf = h_bufs[2 * layer]
        hb_buf = h_bufs[2 * layer + 1]

        # Input projection for ALL time steps & BOTH directions in one shot.
        if layer == 0:
            xin = x_ref[...].reshape(T * B, E)
            xg = jnp.dot(xin, wih, preferred_element_type=jnp.float32) + bias
        else:
            hf_prev = h_bufs[2 * layer - 2][...].reshape(T * B, H)
            hb_prev = h_bufs[2 * layer - 1][...].reshape(T * B, H)
            xg = (jnp.dot(hf_prev, wih[:H, :], preferred_element_type=jnp.float32)
                  + jnp.dot(hb_prev, wih[H:, :], preferred_element_type=jnp.float32)
                  + bias)                                   # (T*B, 8H)

        h_f = c_f = jnp.zeros((B, H), jnp.float32)
        h_b = c_b = jnp.zeros((B, H), jnp.float32)
        for s in range(T):                 # fully unrolled; fwd + bwd interleaved
            t_f, t_b = s, T - 1 - s
            g_f = xg[t_f * B:(t_f + 1) * B, :G] + jnp.dot(
                h_f, whh_f, preferred_element_type=jnp.float32)      # (B, 4H)
            g_b = xg[t_b * B:(t_b + 1) * B, G:] + jnp.dot(
                h_b, whh_b, preferred_element_type=jnp.float32)      # (B, 4H)
            # Full-vreg transcendentals, then static lane slices.
            # PyTorch gate order: i, f, g, o.
            sig_f, tan_f = jax.nn.sigmoid(g_f), jnp.tanh(g_f)
            sig_b, tan_b = jax.nn.sigmoid(g_b), jnp.tanh(g_b)
            c_f = sig_f[:, H:2 * H] * c_f + sig_f[:, :H] * tan_f[:, 2 * H:3 * H]
            h_f = sig_f[:, 3 * H:] * jnp.tanh(c_f)
            c_b = sig_b[:, H:2 * H] * c_b + sig_b[:, :H] * tan_b[:, 2 * H:3 * H]
            h_b = sig_b[:, 3 * H:] * jnp.tanh(c_b)
            hf_buf[t_f, :, :] = h_f
            hb_buf[t_b, :, :] = h_b

    # ---------------- hidden2ta Linear + softmax(dim=2) ----------------
    hf_last = h_bufs[2 * L - 2][...].reshape(T * B, H)
    hb_last = h_bufs[2 * L - 1][...].reshape(T * B, H)
    wlin = wlin_ref[...]                                    # (2H, NT)
    logits = (jnp.dot(hf_last, wlin[:H, :], preferred_element_type=jnp.float32)
              + jnp.dot(hb_last, wlin[H:, :], preferred_element_type=jnp.float32)
              + blin_ref[...])                              # (T*B, NT)
    lmax = jnp.max(logits, axis=-1, keepdims=True)
    ex = jnp.exp(logits - lmax)
    em = (ex / jnp.sum(ex, axis=-1, keepdims=True)).reshape(T, B, NT)   # emissions

    # ---------------- CRF negative log-likelihood ----------------
    tags_oh = (lax.broadcasted_iota(jnp.int32, (T, B, NT), 2)
               == tags_ref[...]).astype(jnp.float32)        # (T, B, NT) one-hot
    mask = mask_ref[...]                                    # (T, B, 1)
    start_t = start_ref[...]                                # (1, NT)
    end_t = end_ref[...]                                    # (1, NT)
    trans = trans_ref[...]                                  # (NT, NT)

    # numerator: score of the gold tag path
    s0 = jnp.sum((start_t + em[0]) * tags_oh[0], axis=-1, keepdims=True)        # (B,1)
    prev_oh, cur_oh = tags_oh[:-1], tags_oh[1:]
    trans_rows = sum(prev_oh[..., a:a + 1] * trans[a:a + 1, :] for a in range(NT))
    step_score = jnp.sum((trans_rows + em[1:]) * cur_oh, axis=-1, keepdims=True)
    s0 = s0 + jnp.sum(step_score * mask[1:], axis=0)                            # (B,1)
    last_idx = jnp.sum(mask, axis=0).astype(jnp.int32) - 1                      # (B,1)
    is_last = (lax.broadcasted_iota(jnp.int32, (T, B, 1), 0)
               == last_idx).astype(jnp.float32)                                 # (T,B,1)
    last_oh = jnp.sum(is_last * tags_oh, axis=0)                                # (B,NT)
    numerator = s0 + jnp.sum(last_oh * end_t, axis=-1, keepdims=True)           # (B,1)

    # denominator: forward algorithm in log-space (fully unrolled), with the
    # transition max folded into the shift for robustness to large trans values.
    tmax = jnp.max(jnp.max(trans, axis=-1, keepdims=True), axis=0, keepdims=True)  # (1,1)
    exp_trans = jnp.exp(trans - tmax)
    alpha = start_t + em[0]                                                     # (B,NT)
    for i in range(1, T):
        amax = jnp.max(alpha, axis=-1, keepdims=True)
        ea = jnp.exp(alpha - amax)
        acc = sum(ea[:, a:a + 1] * exp_trans[a:a + 1, :] for a in range(NT))
        nxt = amax + tmax + jnp.log(acc) + em[i]
        alpha = jnp.where(mask[i] > 0.5, nxt, alpha)
    alpha = alpha + end_t
    amax = jnp.max(alpha, axis=-1, keepdims=True)
    denominator = amax + jnp.log(jnp.sum(jnp.exp(alpha - amax),
                                         axis=-1, keepdims=True))               # (B,1)

    out_ref[...] = -jnp.sum(numerator - denominator, axis=0, keepdims=True)     # (1,1)


def lstm_crf_forward(seq_emb, tags, masks, params):
    """seq_emb (B,T,E) float; tags (B,T,1) int; masks (T,B,1) uint8. Returns scalar -loglik."""
    x = jnp.transpose(seq_emb, (1, 0, 2)).astype(jnp.float32)    # (T, B, E)
    tg = jnp.transpose(tags, (1, 0, 2)).astype(jnp.int32)        # (T, B, 1)
    mk = masks.astype(jnp.float32)                               # (T, B, 1)

    # Fuse the two directions of every layer (wrapper-level, negligible cost):
    #   W_ih^T of both dirs -> (in_dim, 8H); biases -> (1, 8H); W_hh^T kept per dir.
    fused = []
    for layer in range(L):
        i_f, i_b = 3 * (2 * layer), 3 * (2 * layer + 1)
        wih_f, whh_f, b_f = params[i_f], params[i_f + 1], params[i_f + 2]
        wih_b, whh_b, b_b = params[i_b], params[i_b + 1], params[i_b + 2]
        fused += [jnp.concatenate([wih_f, wih_b], axis=1),
                  whh_f, whh_b,
                  jnp.concatenate([b_f, b_b], axis=1)]
    flat = [x, tg, mk] + fused + list(params[N_LSTM:])

    out = pl.pallas_call(
        lstm_crf_kernel,
        out_shape=jax.ShapeDtypeStruct((1, 1), jnp.float32),
        in_specs=[pl.BlockSpec(memory_space=pltpu.MemorySpace.VMEM)] * len(flat),
        out_specs=pl.BlockSpec(memory_space=pltpu.MemorySpace.VMEM),
        scratch_shapes=[pltpu.VMEM((T, B, H), jnp.float32)] * (2 * L),
    )(*flat)
    return out[0, 0]


def init_params(key):
    keys = iter(jax.random.split(key, 2 * L * 4 + 5))
    s = 1.0 / (H ** 0.5)
    u = lambda shape, lo, hi: jax.random.uniform(next(keys), shape, jnp.float32, lo, hi)
    params = []
    for layer in range(L):
        in_dim = E if layer == 0 else 2 * H
        for _ in range(2):                      # forward / backward direction
            wih_t = u((in_dim, 4 * H), -s, s)   # W_ih^T
            whh_t = u((H, 4 * H), -s, s)        # W_hh^T
            bias = u((1, 4 * H), -s, s) + u((1, 4 * H), -s, s)   # b_ih + b_hh
            params += [wih_t, whh_t, bias]
    params.append(u((2 * H, NT), -s, s))        # hidden2ta weight^T
    params.append(u((1, NT), -s, s))            # hidden2ta bias
    params.append(u((1, NT), -0.1, 0.1))        # CRF start_transitions
    params.append(u((1, NT), -0.1, 0.1))        # CRF end_transitions
    params.append(u((NT, NT), -0.1, 0.1))       # CRF transitions
    return params


def reference_forward(x, tags, mask, params):
    """Pure-JAX reference (time-major inputs), same math as the PyTorch module."""
    lstm_p = params[:N_LSTM]
    wlin, blin, start_t, end_t, trans = params[N_LSTM:]
    h_in = x
    for layer in range(L):
        outs = []
        for d, reverse in enumerate((False, True)):
            i0 = 3 * (2 * layer + d)
            wih, whh, b = lstm_p[i0], lstm_p[i0 + 1], lstm_p[i0 + 2]
            xs = h_in[::-1] if reverse else h_in

            def step(carry, x_t, wih=wih, whh=whh, b=b):
                h, c = carry
                g = x_t @ wih + h @ whh + b
                i_g = jax.nn.sigmoid(g[:, :H])
                f_g = jax.nn.sigmoid(g[:, H:2 * H])
                g_g = jnp.tanh(g[:, 2 * H:3 * H])
                o_g = jax.nn.sigmoid(g[:, 3 * H:])
                c = f_g * c + i_g * g_g
                h = o_g * jnp.tanh(c)
                return (h, c), h

            z = jnp.zeros((B, H), jnp.float32)
            _, hs = lax.scan(step, (z, z), xs)
            outs.append(hs[::-1] if reverse else hs)
        h_in = jnp.concatenate(outs, axis=-1)

    em = jax.nn.softmax(h_in @ wlin + blin, axis=-1)       # (T, B, NT)
    oh = jax.nn.one_hot(tags[..., 0], NT, dtype=jnp.float32)
    mk = mask[..., 0]                                      # (T, B)
    s = jnp.sum((start_t + em[0]) * oh[0], axis=-1)
    trans_rows = jnp.einsum('tba,ac->tbc', oh[:-1], trans)
    step_sc = jnp.sum((trans_rows + em[1:]) * oh[1:], axis=-1)
    s = s + jnp.sum(step_sc * mk[1:], axis=0)
    last_idx = jnp.sum(mk, axis=0).astype(jnp.int32) - 1
    last_oh = oh[last_idx, jnp.arange(B)]
    num = s + jnp.sum(last_oh * end_t, axis=-1)

    alpha = start_t + em[0]

    def fstep(alpha, inp):
        em_i, m_i = inp
        nxt = jax.scipy.special.logsumexp(
            alpha[:, :, None] + trans[None, :, :] + em_i[:, None, :], axis=1)
        return jnp.where(m_i > 0.5, nxt, alpha), None

    alpha, _ = lax.scan(fstep, alpha, (em[1:], mk[1:, :, None]))
    denom = jax.scipy.special.logsumexp(alpha + end_t, axis=-1)
    return -jnp.sum(num - denom)


if __name__ == "__main__":
    key = jax.random.PRNGKey(0)
    kx, kt, kp = jax.random.split(key, 3)
    seq_emb = jax.random.normal(kx, (B, T, E), jnp.float32)              # (B, T, E)
    tags = jax.random.randint(kt, (B, T, 1), 0, NT, dtype=jnp.int32)     # (B, T, 1)
    lengths = jnp.array([T, T - 2], dtype=jnp.int32)
    masks = (jnp.arange(T)[:, None] < lengths[None, :]).astype(jnp.uint8)[:, :, None]  # (T,B,1)
    params = init_params(kp)

    nll = lstm_crf_forward(seq_emb, tags, masks, params)
    nll = jax.block_until_ready(nll)

    ref = reference_forward(jnp.transpose(seq_emb, (1, 0, 2)),
                            jnp.transpose(tags, (1, 0, 2)),
                            masks.astype(jnp.float32), params)
    assert jnp.isfinite(nll), "non-finite kernel output"
    assert jnp.allclose(nll, ref, rtol=1e-3, atol=1e-2), (nll, ref)
    print("KERNEL_OK")
</pallas_src>

<mosaic_0001>
module attributes {stable_mosaic.version = 11 : i64} {
  func.func @lstm_crf_kernel(%arg0: memref<8x2x16xf32, #tpu.memory_space<vmem>>, %arg1: memref<8x2x1xi32, #tpu.memory_space<vmem>>, %arg2: memref<8x2x1xf32, #tpu.memory_space<vmem>>, %arg3: memref<16x256xf32, #tpu.memory_space<vmem>>, %arg4: memref<32x128xf32, #tpu.memory_space<vmem>>, %arg5: memref<32x128xf32, #tpu.memory_space<vmem>>, %arg6: memref<1x256xf32, #tpu.memory_space<vmem>>, %arg7: memref<64x256xf32, #tpu.memory_space<vmem>>, %arg8: memref<32x128xf32, #tpu.memory_space<vmem>>, %arg9: memref<32x128xf32, #tpu.memory_space<vmem>>, %arg10: memref<1x256xf32, #tpu.memory_space<vmem>>, %arg11: memref<64x2xf32, #tpu.memory_space<vmem>>, %arg12: memref<1x2xf32, #tpu.memory_space<vmem>>, %arg13: memref<1x2xf32, #tpu.memory_space<vmem>>, %arg14: memref<1x2xf32, #tpu.memory_space<vmem>>, %arg15: memref<2x2xf32, #tpu.memory_space<vmem>>, %arg16: memref<1x1xf32, #tpu.memory_space<vmem>>, %arg17: memref<8x2x32xf32, #tpu.memory_space<vmem>>, %arg18: memref<8x2x32xf32, #tpu.memory_space<vmem>>, %arg19: memref<8x2x32xf32, #tpu.memory_space<vmem>>, %arg20: memref<8x2x32xf32, #tpu.memory_space<vmem>>) attributes {dimension_semantics = [], scalar_prefetch = 0 : i64, scratch_operands = 4 : i64, tpu.core_type = #tpu.core_type<tc>} {
    %c0 = arith.constant 0 : index
    %c0_0 = arith.constant 0 : index
    %0 = vector.load %arg3[%c0, %c0_0] : memref<16x256xf32, #tpu.memory_space<vmem>>, vector<16x256xf32>
    %c0_1 = arith.constant 0 : index
    %c0_2 = arith.constant 0 : index
    %1 = vector.load %arg4[%c0_1, %c0_2] : memref<32x128xf32, #tpu.memory_space<vmem>>, vector<32x128xf32>
    %c0_3 = arith.constant 0 : index
    %c0_4 = arith.constant 0 : index
    %2 = vector.load %arg5[%c0_3, %c0_4] : memref<32x128xf32, #tpu.memory_space<vmem>>, vector<32x128xf32>
    %c0_5 = arith.constant 0 : index
    %c0_6 = arith.constant 0 : index
    %3 = vector.load %arg6[%c0_5, %c0_6] : memref<1x256xf32, #tpu.memory_space<vmem>>, vector<1x256xf32>
    %c0_7 = arith.constant 0 : index
    %c0_8 = arith.constant 0 : index
    %c0_9 = arith.constant 0 : index
    %4 = vector.load %arg0[%c0_7, %c0_8, %c0_9] : memref<8x2x16xf32, #tpu.memory_space<vmem>>, vector<8x2x16xf32>
    %5 = vector.shape_cast %4 : vector<8x2x16xf32> to vector<16x16xf32>
    %cst = arith.constant dense<0.000000e+00> : vector<16x256xf32>
    %6 = tpu.matmul %5, %0, %cst {dimension_numbers = #tpu.dot_dimension_numbers<[1], [0], [0], [1], [0, 0, 1, 1], [], []>} : vector<16x16xf32>, vector<16x256xf32>, vector<16x256xf32> -> vector<16x256xf32>
    %7 = vector.broadcast %3 : vector<1x256xf32> to vector<16x256xf32>
    %8 = arith.addf %6, %7 : vector<16x256xf32>
    %cst_10 = arith.constant 0.000000e+00 : f32
    %9 = vector.broadcast %cst_10 : f32 to vector<2x32xf32>
    %cst_11 = arith.constant 0.000000e+00 : f32
    %10 = vector.broadcast %cst_11 : f32 to vector<2x32xf32>
    %11 = vector.extract_strided_slice %8 {offsets = [0, 0], sizes = [2, 128], strides = [1, 1]} : vector<16x256xf32> to vector<2x128xf32>
    %cst_12 = arith.constant dense<0.000000e+00> : vector<2x128xf32>
    %12 = tpu.matmul %9, %1, %cst_12 {dimension_numbers = #tpu.dot_dimension_numbers<[1], [0], [0], [1], [0, 0, 1, 1], [], []>} : vector<2x32xf32>, vector<32x128xf32>, vector<2x128xf32> -> vector<2x128xf32>
    %13 = arith.addf %11, %12 : vector<2x128xf32>
    %14 = vector.extract_strided_slice %8 {offsets = [14, 128], sizes = [2, 128], strides = [1, 1]} : vector<16x256xf32> to vector<2x128xf32>
    %cst_13 = arith.constant dense<0.000000e+00> : vector<2x128xf32>
    %15 = tpu.matmul %10, %2, %cst_13 {dimension_numbers = #tpu.dot_dimension_numbers<[1], [0], [0], [1], [0, 0, 1, 1], [], []>} : vector<2x32xf32>, vector<32x128xf32>, vector<2x128xf32> -> vector<2x128xf32>
    %16 = arith.addf %14, %15 : vector<2x128xf32>
    %17 = arith.negf %13 : vector<2x128xf32>
    %18 = math.exp %17 : vector<2x128xf32>
    %cst_14 = arith.constant 1.000000e+00 : f32
    %19 = vector.broadcast %cst_14 : f32 to vector<2x128xf32>
    %20 = arith.addf %19, %18 : vector<2x128xf32>
    %21 = arith.divf %19, %20 : vector<2x128xf32>
    %22 = math.tanh %13 : vector<2x128xf32>
    %23 = arith.negf %16 : vector<2x128xf32>
    %24 = math.exp %23 : vector<2x128xf32>
    %cst_15 = arith.constant 1.000000e+00 : f32
    %25 = vector.broadcast %cst_15 : f32 to vector<2x128xf32>
    %26 = arith.addf %25, %24 : vector<2x128xf32>
    %27 = arith.divf %25, %26 : vector<2x128xf32>
    %28 = math.tanh %16 : vector<2x128xf32>
    %29 = vector.extract_strided_slice %21 {offsets = [0, 32], sizes = [2, 32], strides = [1, 1]} : vector<2x128xf32> to vector<2x32xf32>
    %30 = arith.mulf %29, %9 : vector<2x32xf32>
    %31 = vector.extract_strided_slice %21 {offsets = [0, 0], sizes = [2, 32], strides = [1, 1]} : vector<2x128xf32> to vector<2x32xf32>
    %32 = vector.extract_strided_slice %22 {offsets = [0, 64], sizes = [2, 32], strides = [1, 1]} : vector<2x128xf32> to vector<2x32xf32>
    %33 = arith.mulf %31, %32 : vector<2x32xf32>
    %34 = arith.addf %30, %33 : vector<2x32xf32>
    %35 = vector.extract_strided_slice %21 {offsets = [0, 96], sizes = [2, 32], strides = [1, 1]} : vector<2x128xf32> to vector<2x32xf32>
    %36 = math.tanh %34 : vector<2x32xf32>
    %37 = arith.mulf %35, %36 : vector<2x32xf32>
    %38 = vector.extract_strided_slice %27 {offsets = [0, 32], sizes = [2, 32], strides = [1, 1]} : vector<2x128xf32> to vector<2x32xf32>
    %39 = arith.mulf %38, %10 : vector<2x32xf32>
    %40 = vector.extract_strided_slice %27 {offsets = [0, 0], sizes = [2, 32], strides = [1, 1]} : vector<2x128xf32> to vector<2x32xf32>
    %41 = vector.extract_strided_slice %28 {offsets = [0, 64], sizes = [2, 32], strides = [1, 1]} : vector<2x128xf32> to vector<2x32xf32>
    %42 = arith.mulf %40, %41 : vector<2x32xf32>
    %43 = arith.addf %39, %42 : vector<2x32xf32>
    %44 = vector.extract_strided_slice %27 {offsets = [0, 96], sizes = [2, 32], strides = [1, 1]} : vector<2x128xf32> to vector<2x32xf32>
    %45 = math.tanh %43 : vector<2x32xf32>
    %46 = arith.mulf %44, %45 : vector<2x32xf32>
    %c0_16 = arith.constant 0 : index
    %c0_17 = arith.constant 0 : index
    %c0_18 = arith.constant 0 : index
    %47 = vector.load %arg17[%c0_16, %c0_17, %c0_18] : memref<8x2x32xf32, #tpu.memory_space<vmem>>, vector<1x2x32xf32>
    %48 = vector.shape_cast %47 : vector<1x2x32xf32> to vector<2x32xf32>
    %49 = vector.shape_cast %37 : vector<2x32xf32> to vector<1x2x32xf32>
    tpu.vector_store %arg17[%c0_16, %c0_17, %c0_18], %49 {strides = array<i32>} : memref<8x2x32xf32, #tpu.memory_space<vmem>>, vector<1x2x32xf32>,
    %c7 = arith.constant 7 : index
    %c0_19 = arith.constant 0 : index
    %c0_20 = arith.constant 0 : index
    %50 = vector.load %arg18[%c7, %c0_19, %c0_20] : memref<8x2x32xf32, #tpu.memory_space<vmem>>, vector<1x2x32xf32>
    %51 = vector.shape_cast %50 : vector<1x2x32xf32> to vector<2x32xf32>
    %52 = vector.shape_cast %46 : vector<2x32xf32> to vector<1x2x32xf32>
    tpu.vector_store %arg18[%c7, %c0_19, %c0_20], %52 {strides = array<i32>} : memref<8x2x32xf32, #tpu.memory_space<vmem>>, vector<1x2x32xf32>,
    %53 = vector.extract_strided_slice %8 {offsets = [2, 0], sizes = [2, 128], strides = [1, 1]} : vector<16x256xf32> to vector<2x128xf32>
    %cst_21 = arith.constant dense<0.000000e+00> : vector<2x128xf32>
    %54 = tpu.matmul %37, %1, %cst_21 {dimension_numbers = #tpu.dot_dimension_numbers<[1], [0], [0], [1], [0, 0, 1, 1], [], []>} : vector<2x32xf32>, vector<32x128xf32>, vector<2x128xf32> -> vector<2x128xf32>
    %55 = arith.addf %53, %54 : vector<2x128xf32>
    %56 = vector.extract_strided_slice %8 {offsets = [12, 128], sizes = [2, 128], strides = [1, 1]} : vector<16x256xf32> to vector<2x128xf32>
    %cst_22 = arith.constant dense<0.000000e+00> : vector<2x128xf32>
    %57 = tpu.matmul %46, %2, %cst_22 {dimension_numbers = #tpu.dot_dimension_numbers<[1], [0], [0], [1], [0, 0, 1, 1], [], []>} : vector<2x32xf32>, vector<32x128xf32>, vector<2x128xf32> -> vector<2x128xf32>
    %58 = arith.addf %56, %57 : vector<2x128xf32>
    %59 = arith.negf %55 : vector<2x128xf32>
    %60 = math.exp %59 : vector<2x128xf32>
    %cst_23 = arith.constant 1.000000e+00 : f32
    %61 = vector.broadcast %cst_23 : f32 to vector<2x128xf32>
    %62 = arith.addf %61, %60 : vector<2x128xf32>
    %63 = arith.divf %61, %62 : vector<2x128xf32>
    %64 = math.tanh %55 : vector<2x128xf32>
    %65 = arith.negf %58 : vector<2x128xf32>
    %66 = math.exp %65 : vector<2x128xf32>
    %cst_24 = arith.constant 1.000000e+00 : f32
    %67 = vector.broadcast %cst_24 : f32 to vector<2x128xf32>
    %68 = arith.addf %67, %66 : vector<2x128xf32>
    %69 = arith.divf %67, %68 : vector<2x128xf32>
    %70 = math.tanh %58 : vector<2x128xf32>
    %71 = vector.extract_strided_slice %63 {offsets = [0, 32], sizes = [2, 32], strides = [1, 1]} : vector<2x128xf32> to vector<2x32xf32>
    %72 = arith.mulf %71, %34 : vector<2x32xf32>
    %73 = vector.extract_strided_slice %63 {offsets = [0, 0], sizes = [2, 32], strides = [1, 1]} : vector<2x128xf32> to vector<2x32xf32>
    %74 = vector.extract_strided_slice %64 {offsets = [0, 64], sizes = [2, 32], strides = [1, 1]} : vector<2x128xf32> to vector<2x32xf32>
    %75 = arith.mulf %73, %74 : vector<2x32xf32>
    %76 = arith.addf %72, %75 : vector<2x32xf32>
    %77 = vector.extract_strided_slice %63 {offsets = [0, 96], sizes = [2, 32], strides = [1, 1]} : vector<2x128xf32> to vector<2x32xf32>
    %78 = math.tanh %76 : vector<2x32xf32>
    %79 = arith.mulf %77, %78 : vector<2x32xf32>
    %80 = vector.extract_strided_slice %69 {offsets = [0, 32], sizes = [2, 32], strides = [1, 1]} : vector<2x128xf32> to vector<2x32xf32>
    %81 = arith.mulf %80, %43 : vector<2x32xf32>
    %82 = vector.extract_strided_slice %69 {offsets = [0, 0], sizes = [2, 32], strides = [1, 1]} : vector<2x128xf32> to vector<2x32xf32>
    %83 = vector.extract_strided_slice %70 {offsets = [0, 64], sizes = [2, 32], strides = [1, 1]} : vector<2x128xf32> to vector<2x32xf32>
    %84 = arith.mulf %82, %83 : vector<2x32xf32>
    %85 = arith.addf %81, %84 : vector<2x32xf32>
    %86 = vector.extract_strided_slice %69 {offsets = [0, 96], sizes = [2, 32], strides = [1, 1]} : vector<2x128xf32> to vector<2x32xf32>
    %87 = math.tanh %85 : vector<2x32xf32>
    %88 = arith.mulf %86, %87 : vector<2x32xf32>
    %c1 = arith.constant 1 : index
    %c0_25 = arith.constant 0 : index
    %c0_26 = arith.constant 0 : index
    %89 = vector.load %arg17[%c1, %c0_25, %c0_26] : memref<8x2x32xf32, #tpu.memory_space<vmem>>, vector<1x2x32xf32>
    %90 = vector.shape_cast %89 : vector<1x2x32xf32> to vector<2x32xf32>
    %91 = vector.shape_cast %79 : vector<2x32xf32> to vector<1x2x32xf32>
    tpu.vector_store %arg17[%c1, %c0_25, %c0_26], %91 {strides = array<i32>} : memref<8x2x32xf32, #tpu.memory_space<vmem>>, vector<1x2x32xf32>,
    %c6 = arith.constant 6 : index
    %c0_27 = arith.constant 0 : index
    %c0_28 = arith.constant 0 : index
    %92 = vector.load %arg18[%c6, %c0_27, %c0_28] : memref<8x2x32xf32, #tpu.memory_space<vmem>>, vector<1x2x32xf32>
    %93 = vector.shape_cast %92 : vector<1x2x32xf32> to vector<2x32xf32>
    %94 = vector.shape_cast %88 : vector<2x32xf32> to vector<1x2x32xf32>
    tpu.vector_store %arg18[%c6, %c0_27, %c0_28], %94 {strides = array<i32>} : memref<8x2x32xf32, #tpu.memory_space<vmem>>, vector<1x2x32xf32>,
    %95 = vector.extract_strided_slice %8 {offsets = [4, 0], sizes = [2, 128], strides = [1, 1]} : vector<16x256xf32> to vector<2x128xf32>
    %cst_29 = arith.constant dense<0.000000e+00> : vector<2x128xf32>
    %96 = tpu.matmul %79, %1, %cst_29 {dimension_numbers = #tpu.dot_dimension_numbers<[1], [0], [0], [1], [0, 0, 1, 1], [], []>} : vector<2x32xf32>, vector<32x128xf32>, vector<2x128xf32> -> vector<2x128xf32>
    %97 = arith.addf %95, %96 : vector<2x128xf32>
    %98 = vector.extract_strided_slice %8 {offsets = [10, 128], sizes = [2, 128], strides = [1, 1]} : vector<16x256xf32> to vector<2x128xf32>
    %cst_30 = arith.constant dense<0.000000e+00> : vector<2x128xf32>
    %99 = tpu.matmul %88, %2, %cst_30 {dimension_numbers = #tpu.dot_dimension_numbers<[1], [0], [0], [1], [0, 0, 1, 1], [], []>} : vector<2x32xf32>, vector<32x128xf32>, vector<2x128xf32> -> vector<2x128xf32>
    %100 = arith.addf %98, %99 : vector<2x128xf32>
    %101 = arith.negf %97 : vector<2x128xf32>
    %102 = math.exp %101 : vector<2x128xf32>
    %cst_31 = arith.constant 1.000000e+00 : f32
    %103 = vector.broadcast %cst_31 : f32 to vector<2x128xf32>
    %104 = arith.addf %103, %102 : vector<2x128xf32>
    %105 = arith.divf %103, %104 : vector<2x128xf32>
    %106 = math.tanh %97 : vector<2x128xf32>
    %107 = arith.negf %100 : vector<2x128xf32>
    %108 = math.exp %107 : vector<2x128xf32>
    %cst_32 = arith.constant 1.000000e+00 : f32
    %109 = vector.broadcast %cst_32 : f32 to vector<2x128xf32>
    %110 = arith.addf %109, %108 : vector<2x128xf32>
    %111 = arith.divf %109, %110 : vector<2x128xf32>
    %112 = math.tanh %100 : vector<2x128xf32>
    %113 = vector.extract_strided_slice %105 {offsets = [0, 32], sizes = [2, 32], strides = [1, 1]} : vector<2x128xf32> to vector<2x32xf32>
    %114 = arith.mulf %113, %76 : vector<2x32xf32>
    %115 = vector.extract_strided_slice %105 {offsets = [0, 0], sizes = [2, 32], strides = [1, 1]} : vector<2x128xf32> to vector<2x32xf32>
    %116 = vector.extract_strided_slice %106 {offsets = [0, 64], sizes = [2, 32], strides = [1, 1]} : vector<2x128xf32> to vector<2x32xf32>
    %117 = arith.mulf %115, %116 : vector<2x32xf32>
    %118 = arith.addf %114, %117 : vector<2x32xf32>
    %119 = vector.extract_strided_slice %105 {offsets = [0, 96], sizes = [2, 32], strides = [1, 1]} : vector<2x128xf32> to vector<2x32xf32>
    %120 = math.tanh %118 : vector<2x32xf32>
    %121 = arith.mulf %119, %120 : vector<2x32xf32>
    %122 = vector.extract_strided_slice %111 {offsets = [0, 32], sizes = [2, 32], strides = [1, 1]} : vector<2x128xf32> to vector<2x32xf32>
    %123 = arith.mulf %122, %85 : vector<2x32xf32>
    %124 = vector.extract_strided_slice %111 {offsets = [0, 0], sizes = [2, 32], strides = [1, 1]} : vector<2x128xf32> to vector<2x32xf32>
    %125 = vector.extract_strided_slice %112 {offsets = [0, 64], sizes = [2, 32], strides = [1, 1]} : vector<2x128xf32> to vector<2x32xf32>
    %126 = arith.mulf %124, %125 : vector<2x32xf32>
    %127 = arith.addf %123, %126 : vector<2x32xf32>
    %128 = vector.extract_strided_slice %111 {offsets = [0, 96], sizes = [2, 32], strides = [1, 1]} : vector<2x128xf32> to vector<2x32xf32>
    %129 = math.tanh %127 : vector<2x32xf32>
    %130 = arith.mulf %128, %129 : vector<2x32xf32>
    %c2 = arith.constant 2 : index
    %c0_33 = arith.constant 0 : index
    %c0_34 = arith.constant 0 : index
    %131 = vector.load %arg17[%c2, %c0_33, %c0_34] : memref<8x2x32xf32, #tpu.memory_space<vmem>>, vector<1x2x32xf32>
    %132 = vector.shape_cast %131 : vector<1x2x32xf32> to vector<2x32xf32>
    %133 = vector.shape_cast %121 : vector<2x32xf32> to vector<1x2x32xf32>
    tpu.vector_store %arg17[%c2, %c0_33, %c0_34], %133 {strides = array<i32>} : memref<8x2x32xf32, #tpu.memory_space<vmem>>, vector<1x2x32xf32>,
    %c5 = arith.constant 5 : index
    %c0_35 = arith.constant 0 : index
    %c0_36 = arith.constant 0 : index
    %134 = vector.load %arg18[%c5, %c0_35, %c0_36] : memref<8x2x32xf32, #tpu.memory_space<vmem>>, vector<1x2x32xf32>
    %135 = vector.shape_cast %134 : vector<1x2x32xf32> to vector<2x32xf32>
    %136 = vector.shape_cast %130 : vector<2x32xf32> to vector<1x2x32xf32>
    tpu.vector_store %arg18[%c5, %c0_35, %c0_36], %136 {strides = array<i32>} : memref<8x2x32xf32, #tpu.memory_space<vmem>>, vector<1x2x32xf32>,
    %137 = vector.extract_strided_slice %8 {offsets = [6, 0], sizes = [2, 128], strides = [1, 1]} : vector<16x256xf32> to vector<2x128xf32>
    %cst_37 = arith.constant dense<0.000000e+00> : vector<2x128xf32>
    %138 = tpu.matmul %121, %1, %cst_37 {dimension_numbers = #tpu.dot_dimension_numbers<[1], [0], [0], [1], [0, 0, 1, 1], [], []>} : vector<2x32xf32>, vector<32x128xf32>, vector<2x128xf32> -> vector<2x128xf32>
    %139 = arith.addf %137, %138 : vector<2x128xf32>
    %140 = vector.extract_strided_slice %8 {offsets = [8, 128], sizes = [2, 128], strides = [1, 1]} : vector<16x256xf32> to vector<2x128xf32>
    %cst_38 = arith.constant dense<0.000000e+00> : vector<2x128xf32>
    %141 = tpu.matmul %130, %2, %cst_38 {dimension_numbers = #tpu.dot_dimension_numbers<[1], [0], [0], [1], [0, 0, 1, 1], [], []>} : vector<2x32xf32>, vector<32x128xf32>, vector<2x128xf32> -> vector<2x128xf32>
    %142 = arith.addf %140, %141 : vector<2x128xf32>
    %143 = arith.negf %139 : vector<2x128xf32>
    %144 = math.exp %143 : vector<2x128xf32>
    %cst_39 = arith.constant 1.000000e+00 : f32
    %145 = vector.broadcast %cst_39 : f32 to vector<2x128xf32>
    %146 = arith.addf %145, %144 : vector<2x128xf32>
    %147 = arith.divf %145, %146 : vector<2x128xf32>
    %148 = math.tanh %139 : vector<2x128xf32>
    %149 = arith.negf %142 : vector<2x128xf32>
    %150 = math.exp %149 : vector<2x128xf32>
    %cst_40 = arith.constant 1.000000e+00 : f32
    %151 = vector.broadcast %cst_40 : f32 to vector<2x128xf32>
    %152 = arith.addf %151, %150 : vector<2x128xf32>
    %153 = arith.divf %151, %152 : vector<2x128xf32>
    %154 = math.tanh %142 : vector<2x128xf32>
    %155 = vector.extract_strided_slice %147 {offsets = [0, 32], sizes = [2, 32], strides = [1, 1]} : vector<2x128xf32> to vector<2x32xf32>
    %156 = arith.mulf %155, %118 : vector<2x32xf32>
    %157 = vector.extract_strided_slice %147 {offsets = [0, 0], sizes = [2, 32], strides = [1, 1]} : vector<2x128xf32> to vector<2x32xf32>
    %158 = vector.extract_strided_slice %148 {offsets = [0, 64], sizes = [2, 32], strides = [1, 1]} : vector<2x128xf32> to vector<2x32xf32>
    %159 = arith.mulf %157, %158 : vector<2x32xf32>
    %160 = arith.addf %156, %159 : vector<2x32xf32>
    %161 = vector.extract_strided_slice %147 {offsets = [0, 96], sizes = [2, 32], strides = [1, 1]} : vector<2x128xf32> to vector<2x32xf32>
    %162 = math.tanh %160 : vector<2x32xf32>
    %163 = arith.mulf %161, %162 : vector<2x32xf32>
    %164 = vector.extract_strided_slice %153 {offsets = [0, 32], sizes = [2, 32], strides = [1, 1]} : vector<2x128xf32> to vector<2x32xf32>
    %165 = arith.mulf %164, %127 : vector<2x32xf32>
    %166 = vector.extract_strided_slice %153 {offsets = [0, 0], sizes = [2, 32], strides = [1, 1]} : vector<2x128xf32> to vector<2x32xf32>
    %167 = vector.extract_strided_slice %154 {offsets = [0, 64], sizes = [2, 32], strides = [1, 1]} : vector<2x128xf32> to vector<2x32xf32>
    %168 = arith.mulf %166, %167 : vector<2x32xf32>
    %169 = arith.addf %165, %168 : vector<2x32xf32>
    %170 = vector.extract_strided_slice %153 {offsets = [0, 96], sizes = [2, 32], strides = [1, 1]} : vector<2x128xf32> to vector<2x32xf32>
    %171 = math.tanh %169 : vector<2x32xf32>
    %172 = arith.mulf %170, %171 : vector<2x32xf32>
    %c3 = arith.constant 3 : index
    %c0_41 = arith.constant 0 : index
    %c0_42 = arith.constant 0 : index
    %173 = vector.load %arg17[%c3, %c0_41, %c0_42] : memref<8x2x32xf32, #tpu.memory_space<vmem>>, vector<1x2x32xf32>
    %174 = vector.shape_cast %173 : vector<1x2x32xf32> to vector<2x32xf32>
    %175 = vector.shape_cast %163 : vector<2x32xf32> to vector<1x2x32xf32>
    tpu.vector_store %arg17[%c3, %c0_41, %c0_42], %175 {strides = array<i32>} : memref<8x2x32xf32, #tpu.memory_space<vmem>>, vector<1x2x32xf32>,
    %c4 = arith.constant 4 : index
    %c0_43 = arith.constant 0 : index
    %c0_44 = arith.constant 0 : index
    %176 = vector.load %arg18[%c4, %c0_43, %c0_44] : memref<8x2x32xf32, #tpu.memory_space<vmem>>, vector<1x2x32xf32>
    %177 = vector.shape_cast %176 : vector<1x2x32xf32> to vector<2x32xf32>
    %178 = vector.shape_cast %172 : vector<2x32xf32> to vector<1x2x32xf32>
    tpu.vector_store %arg18[%c4, %c0_43, %c0_44], %178 {strides = array<i32>} : memref<8x2x32xf32, #tpu.memory_space<vmem>>, vector<1x2x32xf32>,
    %179 = vector.extract_strided_slice %8 {offsets = [8, 0], sizes = [2, 128], strides = [1, 1]} : vector<16x256xf32> to vector<2x128xf32>
    %cst_45 = arith.constant dense<0.000000e+00> : vector<2x128xf32>
    %180 = tpu.matmul %163, %1, %cst_45 {dimension_numbers = #tpu.dot_dimension_numbers<[1], [0], [0], [1], [0, 0, 1, 1], [], []>} : vector<2x32xf32>, vector<32x128xf32>, vector<2x128xf32> -> vector<2x128xf32>
    %181 = arith.addf %179, %180 : vector<2x128xf32>
    %182 = vector.extract_strided_slice %8 {offsets = [6, 128], sizes = [2, 128], strides = [1, 1]} : vector<16x256xf32> to vector<2x128xf32>
    %cst_46 = arith.constant dense<0.000000e+00> : vector<2x128xf32>
    %183 = tpu.matmul %172, %2, %cst_46 {dimension_numbers = #tpu.dot_dimension_numbers<[1], [0], [0], [1], [0, 0, 1, 1], [], []>} : vector<2x32xf32>, vector<32x128xf32>, vector<2x128xf32> -> vector<2x128xf32>
    %184 = arith.addf %182, %183 : vector<2x128xf32>
    %185 = arith.negf %181 : vector<2x128xf32>
    %186 = math.exp %185 : vector<2x128xf32>
    %cst_47 = arith.constant 1.000000e+00 : f32
    %187 = vector.broadcast %cst_47 : f32 to vector<2x128xf32>
    %188 = arith.addf %187, %186 : vector<2x128xf32>
    %189 = arith.divf %187, %188 : vector<2x128xf32>
    %190 = math.tanh %181 : vector<2x128xf32>
    %191 = arith.negf %184 : vector<2x128xf32>
    %192 = math.exp %191 : vector<2x128xf32>
    %cst_48 = arith.constant 1.000000e+00 : f32
    %193 = vector.broadcast %cst_48 : f32 to vector<2x128xf32>
    %194 = arith.addf %193, %192 : vector<2x128xf32>
    %195 = arith.divf %193, %194 : vector<2x128xf32>
    %196 = math.tanh %184 : vector<2x128xf32>
    %197 = vector.extract_strided_slice %189 {offsets = [0, 32], sizes = [2, 32], strides = [1, 1]} : vector<2x128xf32> to vector<2x32xf32>
    %198 = arith.mulf %197, %160 : vector<2x32xf32>
    %199 = vector.extract_strided_slice %189 {offsets = [0, 0], sizes = [2, 32], strides = [1, 1]} : vector<2x128xf32> to vector<2x32xf32>
    %200 = vector.extract_strided_slice %190 {offsets = [0, 64], sizes = [2, 32], strides = [1, 1]} : vector<2x128xf32> to vector<2x32xf32>
    %201 = arith.mulf %199, %200 : vector<2x32xf32>
    %202 = arith.addf %198, %201 : vector<2x32xf32>
    %203 = vector.extract_strided_slice %189 {offsets = [0, 96], sizes = [2, 32], strides = [1, 1]} : vector<2x128xf32> to vector<2x32xf32>
    %204 = math.tanh %202 : vector<2x32xf32>
    %205 = arith.mulf %203, %204 : vector<2x32xf32>
    %206 = vector.extract_strided_slice %195 {offsets = [0, 32], sizes = [2, 32], strides = [1, 1]} : vector<2x128xf32> to vector<2x32xf32>
    %207 = arith.mulf %206, %169 : vector<2x32xf32>
    %208 = vector.extract_strided_slice %195 {offsets = [0, 0], sizes = [2, 32], strides = [1, 1]} : vector<2x128xf32> to vector<2x32xf32>
    %209 = vector.extract_strided_slice %196 {offsets = [0, 64], sizes = [2, 32], strides = [1, 1]} : vector<2x128xf32> to vector<2x32xf32>
    %210 = arith.mulf %208, %209 : vector<2x32xf32>
    %211 = arith.addf %207, %210 : vector<2x32xf32>
    %212 = vector.extract_strided_slice %195 {offsets = [0, 96], sizes = [2, 32], strides = [1, 1]} : vector<2x128xf32> to vector<2x32xf32>
    %213 = math.tanh %211 : vector<2x32xf32>
    %214 = arith.mulf %212, %213 : vector<2x32xf32>
    %c4_49 = arith.constant 4 : index
    %c0_50 = arith.constant 0 : index
    %c0_51 = arith.constant 0 : index
    %215 = vector.load %arg17[%c4_49, %c0_50, %c0_51] : memref<8x2x32xf32, #tpu.memory_space<vmem>>, vector<1x2x32xf32>
    %216 = vector.shape_cast %215 : vector<1x2x32xf32> to vector<2x32xf32>
    %217 = vector.shape_cast %205 : vector<2x32xf32> to vector<1x2x32xf32>
    tpu.vector_store %arg17[%c4_49, %c0_50, %c0_51], %217 {strides = array<i32>} : memref<8x2x32xf32, #tpu.memory_space<vmem>>, vector<1x2x32xf32>,
    %c3_52 = arith.constant 3 : index
    %c0_53 = arith.constant 0 : index
    %c0_54 = arith.constant 0 : index
    %218 = vector.load %arg18[%c3_52, %c0_53, %c0_54] : memref<8x2x32xf32, #tpu.memory_space<vmem>>, vector<1x2x32xf32>
    %219 = vector.shape_cast %218 : vector<1x2x32xf32> to vector<2x32xf32>
    %220 = vector.shape_cast %214 : vector<2x32xf32> to vector<1x2x32xf32>
    tpu.vector_store %arg18[%c3_52, %c0_53, %c0_54], %220 {strides = array<i32>} : memref<8x2x32xf32, #tpu.memory_space<vmem>>, vector<1x2x32xf32>,
    %221 = vector.extract_strided_slice %8 {offsets = [10, 0], sizes = [2, 128], strides = [1, 1]} : vector<16x256xf32> to vector<2x128xf32>
    %cst_55 = arith.constant dense<0.000000e+00> : vector<2x128xf32>
    %222 = tpu.matmul %205, %1, %cst_55 {dimension_numbers = #tpu.dot_dimension_numbers<[1], [0], [0], [1], [0, 0, 1, 1], [], []>} : vector<2x32xf32>, vector<32x128xf32>, vector<2x128xf32> -> vector<2x128xf32>
    %223 = arith.addf %221, %222 : vector<2x128xf32>
    %224 = vector.extract_strided_slice %8 {offsets = [4, 128], sizes = [2, 128], strides = [1, 1]} : vector<16x256xf32> to vector<2x128xf32>
    %cst_56 = arith.constant dense<0.000000e+00> : vector<2x128xf32>
    %225 = tpu.matmul %214, %2, %cst_56 {dimension_numbers = #tpu.dot_dimension_numbers<[1], [0], [0], [1], [0, 0, 1, 1], [], []>} : vector<2x32xf32>, vector<32x128xf32>, vector<2x128xf32> -> vector<2x128xf32>
    %226 = arith.addf %224, %225 : vector<2x128xf32>
    %227 = arith.negf %223 : vector<2x128xf32>
    %228 = math.exp %227 : vector<2x128xf32>
    %cst_57 = arith.constant 1.000000e+00 : f32
    %229 = vector.broadcast %cst_57 : f32 to vector<2x128xf32>
    %230 = arith.addf %229, %228 : vector<2x128xf32>
    %231 = arith.divf %229, %230 : vector<2x128xf32>
    %232 = math.tanh %223 : vector<2x128xf32>
    %233 = arith.negf %226 : vector<2x128xf32>
    %234 = math.exp %233 : vector<2x128xf32>
    %cst_58 = arith.constant 1.000000e+00 : f32
    %235 = vector.broadcast %cst_58 : f32 to vector<2x128xf32>
    %236 = arith.addf %235, %234 : vector<2x128xf32>
    %237 = arith.divf %235, %236 : vector<2x128xf32>
    %238 = math.tanh %226 : vector<2x128xf32>
    %239 = vector.extract_strided_slice %231 {offsets = [0, 32], sizes = [2, 32], strides = [1, 1]} : vector<2x128xf32> to vector<2x32xf32>
    %240 = arith.mulf %239, %202 : vector<2x32xf32>
    %241 = vector.extract_strided_slice %231 {offsets = [0, 0], sizes = [2, 32], strides = [1, 1]} : vector<2x128xf32> to vector<2x32xf32>
    %242 = vector.extract_strided_slice %232 {offsets = [0, 64], sizes = [2, 32], strides = [1, 1]} : vector<2x128xf32> to vector<2x32xf32>
    %243 = arith.mulf %241, %242 : vector<2x32xf32>
    %244 = arith.addf %240, %243 : vector<2x32xf32>
    %245 = vector.extract_strided_slice %231 {offsets = [0, 96], sizes = [2, 32], strides = [1, 1]} : vector<2x128xf32> to vector<2x32xf32>
    %246 = math.tanh %244 : vector<2x32xf32>
    %247 = arith.mulf %245, %246 : vector<2x32xf32>
    %248 = vector.extract_strided_slice %237 {offsets = [0, 32], sizes = [2, 32], strides = [1, 1]} : vector<2x128xf32> to vector<2x32xf32>
    %249 = arith.mulf %248, %211 : vector<2x32xf32>
    %250 = vector.extract_strided_slice %237 {offsets = [0, 0], sizes = [2, 32], strides = [1, 1]} : vector<2x128xf32> to vector<2x32xf32>
    %251 = vector.extract_strided_slice %238 {offsets = [0, 64], sizes = [2, 32], strides = [1, 1]} : vector<2x128xf32> to vector<2x32xf32>
    %252 = arith.mulf %250, %251 : vector<2x32xf32>
    %253 = arith.addf %249, %252 : vector<2x32xf32>
    %254 = vector.extract_strided_slice %237 {offsets = [0, 96], sizes = [2, 32], strides = [1, 1]} : vector<2x128xf32> to vector<2x32xf32>
    %255 = math.tanh %253 : vector<2x32xf32>
    %256 = arith.mulf %254, %255 : vector<2x32xf32>
    %c5_59 = arith.constant 5 : index
    %c0_60 = arith.constant 0 : index
    %c0_61 = arith.constant 0 : index
    %257 = vector.load %arg17[%c5_59, %c0_60, %c0_61] : memref<8x2x32xf32, #tpu.memory_space<vmem>>, vector<1x2x32xf32>
    %258 = vector.shape_cast %257 : vector<1x2x32xf32> to vector<2x32xf32>
    %259 = vector.shape_cast %247 : vector<2x32xf32> to vector<1x2x32xf32>
    tpu.vector_store %arg17[%c5_59, %c0_60, %c0_61], %259 {strides = array<i32>} : memref<8x2x32xf32, #tpu.memory_space<vmem>>, vector<1x2x32xf32>,
    %c2_62 = arith.constant 2 : index
    %c0_63 = arith.constant 0 : index
    %c0_64 = arith.constant 0 : index
    %260 = vector.load %arg18[%c2_62, %c0_63, %c0_64] : memref<8x2x32xf32, #tpu.memory_space<vmem>>, vector<1x2x32xf32>
    %261 = vector.shape_cast %260 : vector<1x2x32xf32> to vector<2x32xf32>
    %262 = vector.shape_cast %256 : vector<2x32xf32> to vector<1x2x32xf32>
    tpu.vector_store %arg18[%c2_62, %c0_63, %c0_64], %262 {strides = array<i32>} : memref<8x2x32xf32, #tpu.memory_space<vmem>>, vector<1x2x32xf32>,
    %263 = vector.extract_strided_slice %8 {offsets = [12, 0], sizes = [2, 128], strides = [1, 1]} : vector<16x256xf32> to vector<2x128xf32>
    %cst_65 = arith.constant dense<0.000000e+00> : vector<2x128xf32>
    %264 = tpu.matmul %247, %1, %cst_65 {dimension_numbers = #tpu.dot_dimension_numbers<[1], [0], [0], [1], [0, 0, 1, 1], [], []>} : vector<2x32xf32>, vector<32x128xf32>, vector<2x128xf32> -> vector<2x128xf32>
    %265 = arith.addf %263, %264 : vector<2x128xf32>
    %266 = vector.extract_strided_slice %8 {offsets = [2, 128], sizes = [2, 128], strides = [1, 1]} : vector<16x256xf32> to vector<2x128xf32>
    %cst_66 = arith.constant dense<0.000000e+00> : vector<2x128xf32>
    %267 = tpu.matmul %256, %2, %cst_66 {dimension_numbers = #tpu.dot_dimension_numbers<[1], [0], [0], [1], [0, 0, 1, 1], [], []>} : vector<2x32xf32>, vector<32x128xf32>, vector<2x128xf32> -> vector<2x128xf32>
    %268 = arith.addf %266, %267 : vector<2x128xf32>
    %269 = arith.negf %265 : vector<2x128xf32>
    %270 = math.exp %269 : vector<2x128xf32>
    %cst_67 = arith.constant 1.000000e+00 : f32
    %271 = vector.broadcast %cst_67 : f32 to vector<2x128xf32>
    %272 = arith.addf %271, %270 : vector<2x128xf32>
    %273 = arith.divf %271, %272 : vector<2x128xf32>
    %274 = math.tanh %265 : vector<2x128xf32>
    %275 = arith.negf %268 : vector<2x128xf32>
    %276 = math.exp %275 : vector<2x128xf32>
    %cst_68 = arith.constant 1.000000e+00 : f32
    %277 = vector.broadcast %cst_68 : f32 to vector<2x128xf32>
    %278 = arith.addf %277, %276 : vector<2x128xf32>
    %279 = arith.divf %277, %278 : vector<2x128xf32>
    %280 = math.tanh %268 : vector<2x128xf32>
    %281 = vector.extract_strided_slice %273 {offsets = [0, 32], sizes = [2, 32], strides = [1, 1]} : vector<2x128xf32> to vector<2x32xf32>
    %282 = arith.mulf %281, %244 : vector<2x32xf32>
    %283 = vector.extract_strided_slice %273 {offsets = [0, 0], sizes = [2, 32], strides = [1, 1]} : vector<2x128xf32> to vector<2x32xf32>
    %284 = vector.extract_strided_slice %274 {offsets = [0, 64], sizes = [2, 32], strides = [1, 1]} : vector<2x128xf32> to vector<2x32xf32>
    %285 = arith.mulf %283, %284 : vector<2x32xf32>
    %286 = arith.addf %282, %285 : vector<2x32xf32>
    %287 = vector.extract_strided_slice %273 {offsets = [0, 96], sizes = [2, 32], strides = [1, 1]} : vector<2x128xf32> to vector<2x32xf32>
    %288 = math.tanh %286 : vector<2x32xf32>
    %289 = arith.mulf %287, %288 : vector<2x32xf32>
    %290 = vector.extract_strided_slice %279 {offsets = [0, 32], sizes = [2, 32], strides = [1, 1]} : vector<2x128xf32> to vector<2x32xf32>
    %291 = arith.mulf %290, %253 : vector<2x32xf32>
    %292 = vector.extract_strided_slice %279 {offsets = [0, 0], sizes = [2, 32], strides = [1, 1]} : vector<2x128xf32> to vector<2x32xf32>
    %293 = vector.extract_strided_slice %280 {offsets = [0, 64], sizes = [2, 32], strides = [1, 1]} : vector<2x128xf32> to vector<2x32xf32>
    %294 = arith.mulf %292, %293 : vector<2x32xf32>
    %295 = arith.addf %291, %294 : vector<2x32xf32>
    %296 = vector.extract_strided_slice %279 {offsets = [0, 96], sizes = [2, 32], strides = [1, 1]} : vector<2x128xf32> to vector<2x32xf32>
    %297 = math.tanh %295 : vector<2x32xf32>
    %298 = arith.mulf %296, %297 : vector<2x32xf32>
    %c6_69 = arith.constant 6 : index
    %c0_70 = arith.constant 0 : index
    %c0_71 = arith.constant 0 : index
    %299 = vector.load %arg17[%c6_69, %c0_70, %c0_71] : memref<8x2x32xf32, #tpu.memory_space<vmem>>, vector<1x2x32xf32>
    %300 = vector.shape_cast %299 : vector<1x2x32xf32> to vector<2x32xf32>
    %301 = vector.shape_cast %289 : vector<2x32xf32> to vector<1x2x32xf32>
    tpu.vector_store %arg17[%c6_69, %c0_70, %c0_71], %301 {strides = array<i32>} : memref<8x2x32xf32, #tpu.memory_space<vmem>>, vector<1x2x32xf32>,
    %c1_72 = arith.constant 1 : index
    %c0_73 = arith.constant 0 : index
    %c0_74 = arith.constant 0 : index
    %302 = vector.load %arg18[%c1_72, %c0_73, %c0_74] : memref<8x2x32xf32, #tpu.memory_space<vmem>>, vector<1x2x32xf32>
    %303 = vector.shape_cast %302 : vector<1x2x32xf32> to vector<2x32xf32>
    %304 = vector.shape_cast %298 : vector<2x32xf32> to vector<1x2x32xf32>
    tpu.vector_store %arg18[%c1_72, %c0_73, %c0_74], %304 {strides = array<i32>} : memref<8x2x32xf32, #tpu.memory_space<vmem>>, vector<1x2x32xf32>,
    %305 = vector.extract_strided_slice %8 {offsets = [14, 0], sizes = [2, 128], strides = [1, 1]} : vector<16x256xf32> to vector<2x128xf32>
    %cst_75 = arith.constant dense<0.000000e+00> : vector<2x128xf32>
    %306 = tpu.matmul %289, %1, %cst_75 {dimension_numbers = #tpu.dot_dimension_numbers<[1], [0], [0], [1], [0, 0, 1, 1], [], []>} : vector<2x32xf32>, vector<32x128xf32>, vector<2x128xf32> -> vector<2x128xf32>
    %307 = arith.addf %305, %306 : vector<2x128xf32>
    %308 = vector.extract_strided_slice %8 {offsets = [0, 128], sizes = [2, 128], strides = [1, 1]} : vector<16x256xf32> to vector<2x128xf32>
    %cst_76 = arith.constant dense<0.000000e+00> : vector<2x128xf32>
    %309 = tpu.matmul %298, %2, %cst_76 {dimension_numbers = #tpu.dot_dimension_numbers<[1], [0], [0], [1], [0, 0, 1, 1], [], []>} : vector<2x32xf32>, vector<32x128xf32>, vector<2x128xf32> -> vector<2x128xf32>
    %310 = arith.addf %308, %309 : vector<2x128xf32>
    %311 = arith.negf %307 : vector<2x128xf32>
    %312 = math.exp %311 : vector<2x128xf32>
    %cst_77 = arith.constant 1.000000e+00 : f32
    %313 = vector.broadcast %cst_77 : f32 to vector<2x128xf32>
    %314 = arith.addf %313, %312 : vector<2x128xf32>
    %315 = arith.divf %313, %314 : vector<2x128xf32>
    %316 = math.tanh %307 : vector<2x128xf32>
    %317 = arith.negf %310 : vector<2x128xf32>
    %318 = math.exp %317 : vector<2x128xf32>
    %cst_78 = arith.constant 1.000000e+00 : f32
    %319 = vector.broadcast %cst_78 : f32 to vector<2x128xf32>
    %320 = arith.addf %319, %318 : vector<2x128xf32>
    %321 = arith.divf %319, %320 : vector<2x128xf32>
    %322 = math.tanh %310 : vector<2x128xf32>
    %323 = vector.extract_strided_slice %315 {offsets = [0, 32], sizes = [2, 32], strides = [1, 1]} : vector<2x128xf32> to vector<2x32xf32>
    %324 = arith.mulf %323, %286 : vector<2x32xf32>
    %325 = vector.extract_strided_slice %315 {offsets = [0, 0], sizes = [2, 32], strides = [1, 1]} : vector<2x128xf32> to vector<2x32xf32>
    %326 = vector.extract_strided_slice %316 {offsets = [0, 64], sizes = [2, 32], strides = [1, 1]} : vector<2x128xf32> to vector<2x32xf32>
    %327 = arith.mulf %325, %326 : vector<2x32xf32>
    %328 = arith.addf %324, %327 : vector<2x32xf32>
    %329 = vector.extract_strided_slice %315 {offsets = [0, 96], sizes = [2, 32], strides = [1, 1]} : vector<2x128xf32> to vector<2x32xf32>
    %330 = math.tanh %328 : vector<2x32xf32>
    %331 = arith.mulf %329, %330 : vector<2x32xf32>
    %332 = vector.extract_strided_slice %321 {offsets = [0, 32], sizes = [2, 32], strides = [1, 1]} : vector<2x128xf32> to vector<2x32xf32>
    %333 = arith.mulf %332, %295 : vector<2x32xf32>
    %334 = vector.extract_strided_slice %321 {offsets = [0, 0], sizes = [2, 32], strides = [1, 1]} : vector<2x128xf32> to vector<2x32xf32>
    %335 = vector.extract_strided_slice %322 {offsets = [0, 64], sizes = [2, 32], strides = [1, 1]} : vector<2x128xf32> to vector<2x32xf32>
    %336 = arith.mulf %334, %335 : vector<2x32xf32>
    %337 = arith.addf %333, %336 : vector<2x32xf32>
    %338 = vector.extract_strided_slice %321 {offsets = [0, 96], sizes = [2, 32], strides = [1, 1]} : vector<2x128xf32> to vector<2x32xf32>
    %339 = math.tanh %337 : vector<2x32xf32>
    %340 = arith.mulf %338, %339 : vector<2x32xf32>
    %c7_79 = arith.constant 7 : index
    %c0_80 = arith.constant 0 : index
    %c0_81 = arith.constant 0 : index
    %341 = vector.load %arg17[%c7_79, %c0_80, %c0_81] : memref<8x2x32xf32, #tpu.memory_space<vmem>>, vector<1x2x32xf32>
    %342 = vector.shape_cast %341 : vector<1x2x32xf32> to vector<2x32xf32>
    %343 = vector.shape_cast %331 : vector<2x32xf32> to vector<1x2x32xf32>
    tpu.vector_store %arg17[%c7_79, %c0_80, %c0_81], %343 {strides = array<i32>} : memref<8x2x32xf32, #tpu.memory_space<vmem>>, vector<1x2x32xf32>,
    %c0_82 = arith.constant 0 : index
    %c0_83 = arith.constant 0 : index
    %c0_84 = arith.constant 0 : index
    %344 = vector.load %arg18[%c0_82, %c0_83, %c0_84] : memref<8x2x32xf32, #tpu.memory_space<vmem>>, vector<1x2x32xf32>
    %345 = vector.shape_cast %344 : vector<1x2x32xf32> to vector<2x32xf32>
    %346 = vector.shape_cast %340 : vector<2x32xf32> to vector<1x2x32xf32>
    tpu.vector_store %arg18[%c0_82, %c0_83, %c0_84], %346 {strides = array<i32>} : memref<8x2x32xf32, #tpu.memory_space<vmem>>, vector<1x2x32xf32>,
    %c0_85 = arith.constant 0 : index
    %c0_86 = arith.constant 0 : index
    %347 = vector.load %arg7[%c0_85, %c0_86] : memref<64x256xf32, #tpu.memory_space<vmem>>, vector<64x256xf32>
    %c0_87 = arith.constant 0 : index
    %c0_88 = arith.constant 0 : index
    %348 = vector.load %arg8[%c0_87, %c0_88] : memref<32x128xf32, #tpu.memory_space<vmem>>, vector<32x128xf32>
    %c0_89 = arith.constant 0 : index
    %c0_90 = arith.constant 0 : index
    %349 = vector.load %arg9[%c0_89, %c0_90] : memref<32x128xf32, #tpu.memory_space<vmem>>, vector<32x128xf32>
    %c0_91 = arith.constant 0 : index
    %c0_92 = arith.constant 0 : index
    %350 = vector.load %arg10[%c0_91, %c0_92] : memref<1x256xf32, #tpu.memory_space<vmem>>, vector<1x256xf32>
    %c0_93 = arith.constant 0 : index
    %c0_94 = arith.constant 0 : index
    %c0_95 = arith.constant 0 : index
    %351 = vector.load %arg17[%c0_93, %c0_94, %c0_95] : memref<8x2x32xf32, #tpu.memory_space<vmem>>, vector<8x2x32xf32>
    %352 = vector.shape_cast %351 : vector<8x2x32xf32> to vector<16x32xf32>
    %c0_96 = arith.constant 0 : index
    %c0_97 = arith.constant 0 : index
    %c0_98 = arith.constant 0 : index
    %353 = vector.load %arg18[%c0_96, %c0_97, %c0_98] : memref<8x2x32xf32, #tpu.memory_space<vmem>>, vector<8x2x32xf32>
    %354 = vector.shape_cast %353 : vector<8x2x32xf32> to vector<16x32xf32>
    %355 = vector.extract_strided_slice %347 {offsets = [0, 0], sizes = [32, 256], strides = [1, 1]} : vector<64x256xf32> to vector<32x256xf32>
    %cst_99 = arith.constant dense<0.000000e+00> : vector<16x256xf32>
    %356 = tpu.matmul %352, %355, %cst_99 {dimension_numbers = #tpu.dot_dimension_numbers<[1], [0], [0], [1], [0, 0, 1, 1], [], []>} : vector<16x32xf32>, vector<32x256xf32>, vector<16x256xf32> -> vector<16x256xf32>
    %357 = vector.extract_strided_slice %347 {offsets = [32, 0], sizes = [32, 256], strides = [1, 1]} : vector<64x256xf32> to vector<32x256xf32>
    %cst_100 = arith.constant dense<0.000000e+00> : vector<16x256xf32>
    %358 = tpu.matmul %354, %357, %cst_100 {dimension_numbers = #tpu.dot_dimension_numbers<[1], [0], [0], [1], [0, 0, 1, 1], [], []>} : vector<16x32xf32>, vector<32x256xf32>, vector<16x256xf32> -> vector<16x256xf32>
    %359 = arith.addf %356, %358 : vector<16x256xf32>
    %360 = vector.broadcast %350 : vector<1x256xf32> to vector<16x256xf32>
    %361 = arith.addf %359, %360 : vector<16x256xf32>
    %cst_101 = arith.constant 0.000000e+00 : f32
    %362 = vector.broadcast %cst_101 : f32 to vector<2x32xf32>
    %cst_102 = arith.constant 0.000000e+00 : f32
    %363 = vector.broadcast %cst_102 : f32 to vector<2x32xf32>
    %364 = vector.extract_strided_slice %361 {offsets = [0, 0], sizes = [2, 128], strides = [1, 1]} : vector<16x256xf32> to vector<2x128xf32>
    %cst_103 = arith.constant dense<0.000000e+00> : vector<2x128xf32>
    %365 = tpu.matmul %362, %348, %cst_103 {dimension_numbers = #tpu.dot_dimension_numbers<[1], [0], [0], [1], [0, 0, 1, 1], [], []>} : vector<2x32xf32>, vector<32x128xf32>, vector<2x128xf32> -> vector<2x128xf32>
    %366 = arith.addf %364, %365 : vector<2x128xf32>
    %367 = vector.extract_strided_slice %361 {offsets = [14, 128], sizes = [2, 128], strides = [1, 1]} : vector<16x256xf32> to vector<2x128xf32>
    %cst_104 = arith.constant dense<0.000000e+00> : vector<2x128xf32>
    %368 = tpu.matmul %363, %349, %cst_104 {dimension_numbers = #tpu.dot_dimension_numbers<[1], [0], [0], [1], [0, 0, 1, 1], [], []>} : vector<2x32xf32>, vector<32x128xf32>, vector<2x128xf32> -> vector<2x128xf32>
    %369 = arith.addf %367, %368 : vector<2x128xf32>
    %370 = arith.negf %366 : vector<2x128xf32>
    %371 = math.exp %370 : vector<2x128xf32>
    %cst_105 = arith.constant 1.000000e+00 : f32
    %372 = vector.broadcast %cst_105 : f32 to vector<2x128xf32>
    %373 = arith.addf %372, %371 : vector<2x128xf32>
    %374 = arith.divf %372, %373 : vector<2x128xf32>
    %375 = math.tanh %366 : vector<2x128xf32>
    %376 = arith.negf %369 : vector<2x128xf32>
    %377 = math.exp %376 : vector<2x128xf32>
    %cst_106 = arith.constant 1.000000e+00 : f32
    %378 = vector.broadcast %cst_106 : f32 to vector<2x128xf32>
    %379 = arith.addf %378, %377 : vector<2x128xf32>
    %380 = arith.divf %378, %379 : vector<2x128xf32>
    %381 = math.tanh %369 : vector<2x128xf32>
    %382 = vector.extract_strided_slice %374 {offsets = [0, 32], sizes = [2, 32], strides = [1, 1]} : vector<2x128xf32> to vector<2x32xf32>
    %383 = arith.mulf %382, %362 : vector<2x32xf32>
    %384 = vector.extract_strided_slice %374 {offsets = [0, 0], sizes = [2, 32], strides = [1, 1]} : vector<2x128xf32> to vector<2x32xf32>
    %385 = vector.extract_strided_slice %375 {offsets = [0, 64], sizes = [2, 32], strides = [1, 1]} : vector<2x128xf32> to vector<2x32xf32>
    %386 = arith.mulf %384, %385 : vector<2x32xf32>
    %387 = arith.addf %383, %386 : vector<2x32xf32>
    %388 = vector.extract_strided_slice %374 {offsets = [0, 96], sizes = [2, 32], strides = [1, 1]} : vector<2x128xf32> to vector<2x32xf32>
    %389 = math.tanh %387 : vector<2x32xf32>
    %390 = arith.mulf %388, %389 : vector<2x32xf32>
    %391 = vector.extract_strided_slice %380 {offsets = [0, 32], sizes = [2, 32], strides = [1, 1]} : vector<2x128xf32> to vector<2x32xf32>
    %392 = arith.mulf %391, %363 : vector<2x32xf32>
    %393 = vector.extract_strided_slice %380 {offsets = [0, 0], sizes = [2, 32], strides = [1, 1]} : vector<2x128xf32> to vector<2x32xf32>
    %394 = vector.extract_strided_slice %381 {offsets = [0, 64], sizes = [2, 32], strides = [1, 1]} : vector<2x128xf32> to vector<2x32xf32>
    %395 = arith.mulf %393, %394 : vector<2x32xf32>
    %396 = arith.addf %392, %395 : vector<2x32xf32>
    %397 = vector.extract_strided_slice %380 {offsets = [0, 96], sizes = [2, 32], strides = [1, 1]} : vector<2x128xf32> to vector<2x32xf32>
    %398 = math.tanh %396 : vector<2x32xf32>
    %399 = arith.mulf %397, %398 : vector<2x32xf32>
    %c0_107 = arith.constant 0 : index
    %c0_108 = arith.constant 0 : index
    %c0_109 = arith.constant 0 : index
    %400 = vector.load %arg19[%c0_107, %c0_108, %c0_109] : memref<8x2x32xf32, #tpu.memory_space<vmem>>, vector<1x2x32xf32>
    %401 = vector.shape_cast %400 : vector<1x2x32xf32> to vector<2x32xf32>
    %402 = vector.shape_cast %390 : vector<2x32xf32> to vector<1x2x32xf32>
    tpu.vector_store %arg19[%c0_107, %c0_108, %c0_109], %402 {strides = array<i32>} : memref<8x2x32xf32, #tpu.memory_space<vmem>>, vector<1x2x32xf32>,
    %c7_110 = arith.constant 7 : index
    %c0_111 = arith.constant 0 : index
    %c0_112 = arith.constant 0 : index
    %403 = vector.load %arg20[%c7_110, %c0_111, %c0_112] : memref<8x2x32xf32, #tpu.memory_space<vmem>>, vector<1x2x32xf32>
    %404 = vector.shape_cast %403 : vector<1x2x32xf32> to vector<2x32xf32>
    %405 = vector.shape_cast %399 : vector<2x32xf32> to vector<1x2x32xf32>
    tpu.vector_store %arg20[%c7_110, %c0_111, %c0_112], %405 {strides = array<i32>} : memref<8x2x32xf32, #tpu.memory_space<vmem>>, vector<1x2x32xf32>,
    %406 = vector.extract_strided_slice %361 {offsets = [2, 0], sizes = [2, 128], strides = [1, 1]} : vector<16x256xf32> to vector<2x128xf32>
    %cst_113 = arith.constant dense<0.000000e+00> : vector<2x128xf32>
    %407 = tpu.matmul %390, %348, %cst_113 {dimension_numbers = #tpu.dot_dimension_numbers<[1], [0], [0], [1], [0, 0, 1, 1], [], []>} : vector<2x32xf32>, vector<32x128xf32>, vector<2x128xf32> -> vector<2x128xf32>
    %408 = arith.addf %406, %407 : vector<2x128xf32>
    %409 = vector.extract_strided_slice %361 {offsets = [12, 128], sizes = [2, 128], strides = [1, 1]} : vector<16x256xf32> to vector<2x128xf32>
    %cst_114 = arith.constant dense<0.000000e+00> : vector<2x128xf32>
    %410 = tpu.matmul %399, %349, %cst_114 {dimension_numbers = #tpu.dot_dimension_numbers<[1], [0], [0], [1], [0, 0, 1, 1], [], []>} : vector<2x32xf32>, vector<32x128xf32>, vector<2x128xf32> -> vector<2x128xf32>
    %411 = arith.addf %409, %410 : vector<2x128xf32>
    %412 = arith.negf %408 : vector<2x128xf32>
    %413 = math.exp %412 : vector<2x128xf32>
    %cst_115 = arith.constant 1.000000e+00 : f32
    %414 = vector.broadcast %cst_115 : f32 to vector<2x128xf32>
    %415 = arith.addf %414, %413 : vector<2x128xf32>
    %416 = arith.divf %414, %415 : vector<2x128xf32>
    %417 = math.tanh %408 : vector<2x128xf32>
    %418 = arith.negf %411 : vector<2x128xf32>
    %419 = math.exp %418 : vector<2x128xf32>
    %cst_116 = arith.constant 1.000000e+00 : f32
    %420 = vector.broadcast %cst_116 : f32 to vector<2x128xf32>
    %421 = arith.addf %420, %419 : vector<2x128xf32>
    %422 = arith.divf %420, %421 : vector<2x128xf32>
    %423 = math.tanh %411 : vector<2x128xf32>
    %424 = vector.extract_strided_slice %416 {offsets = [0, 32], sizes = [2, 32], strides = [1, 1]} : vector<2x128xf32> to vector<2x32xf32>
    %425 = arith.mulf %424, %387 : vector<2x32xf32>
    %426 = vector.extract_strided_slice %416 {offsets = [0, 0], sizes = [2, 32], strides = [1, 1]} : vector<2x128xf32> to vector<2x32xf32>
    %427 = vector.extract_strided_slice %417 {offsets = [0, 64], sizes = [2, 32], strides = [1, 1]} : vector<2x128xf32> to vector<2x32xf32>
    %428 = arith.mulf %426, %427 : vector<2x32xf32>
    %429 = arith.addf %425, %428 : vector<2x32xf32>
    %430 = vector.extract_strided_slice %416 {offsets = [0, 96], sizes = [2, 32], strides = [1, 1]} : vector<2x128xf32> to vector<2x32xf32>
    %431 = math.tanh %429 : vector<2x32xf32>
    %432 = arith.mulf %430, %431 : vector<2x32xf32>
    %433 = vector.extract_strided_slice %422 {offsets = [0, 32], sizes = [2, 32], strides = [1, 1]} : vector<2x128xf32> to vector<2x32xf32>
    %434 = arith.mulf %433, %396 : vector<2x32xf32>
    %435 = vector.extract_strided_slice %422 {offsets = [0, 0], sizes = [2, 32], strides = [1, 1]} : vector<2x128xf32> to vector<2x32xf32>
    %436 = vector.extract_strided_slice %423 {offsets = [0, 64], sizes = [2, 32], strides = [1, 1]} : vector<2x128xf32> to vector<2x32xf32>
    %437 = arith.mulf %435, %436 : vector<2x32xf32>
    %438 = arith.addf %434, %437 : vector<2x32xf32>
    %439 = vector.extract_strided_slice %422 {offsets = [0, 96], sizes = [2, 32], strides = [1, 1]} : vector<2x128xf32> to vector<2x32xf32>
    %440 = math.tanh %438 : vector<2x32xf32>
    %441 = arith.mulf %439, %440 : vector<2x32xf32>
    %c1_117 = arith.constant 1 : index
    %c0_118 = arith.constant 0 : index
    %c0_119 = arith.constant 0 : index
    %442 = vector.load %arg19[%c1_117, %c0_118, %c0_119] : memref<8x2x32xf32, #tpu.memory_space<vmem>>, vector<1x2x32xf32>
    %443 = vector.shape_cast %442 : vector<1x2x32xf32> to vector<2x32xf32>
    %444 = vector.shape_cast %432 : vector<2x32xf32> to vector<1x2x32xf32>
    tpu.vector_store %arg19[%c1_117, %c0_118, %c0_119], %444 {strides = array<i32>} : memref<8x2x32xf32, #tpu.memory_space<vmem>>, vector<1x2x32xf32>,
    %c6_120 = arith.constant 6 : index
    %c0_121 = arith.constant 0 : index
    %c0_122 = arith.constant 0 : index
    %445 = vector.load %arg20[%c6_120, %c0_121, %c0_122] : memref<8x2x32xf32, #tpu.memory_space<vmem>>, vector<1x2x32xf32>
    %446 = vector.shape_cast %445 : vector<1x2x32xf32> to vector<2x32xf32>
    %447 = vector.shape_cast %441 : vector<2x32xf32> to vector<1x2x32xf32>
    tpu.vector_store %arg20[%c6_120, %c0_121, %c0_122], %447 {strides = array<i32>} : memref<8x2x32xf32, #tpu.memory_space<vmem>>, vector<1x2x32xf32>,
    %448 = vector.extract_strided_slice %361 {offsets = [4, 0], sizes = [2, 128], strides = [1, 1]} : vector<16x256xf32> to vector<2x128xf32>
    %cst_123 = arith.constant dense<0.000000e+00> : vector<2x128xf32>
    %449 = tpu.matmul %432, %348, %cst_123 {dimension_numbers = #tpu.dot_dimension_numbers<[1], [0], [0], [1], [0, 0, 1, 1], [], []>} : vector<2x32xf32>, vector<32x128xf32>, vector<2x128xf32> -> vector<2x128xf32>
    %450 = arith.addf %448, %449 : vector<2x128xf32>
    %451 = vector.extract_strided_slice %361 {offsets = [10, 128], sizes = [2, 128], strides = [1, 1]} : vector<16x256xf32> to vector<2x128xf32>
    %cst_124 = arith.constant dense<0.000000e+00> : vector<2x128xf32>
    %452 = tpu.matmul %441, %349, %cst_124 {dimension_numbers = #tpu.dot_dimension_numbers<[1], [0], [0], [1], [0, 0, 1, 1], [], []>} : vector<2x32xf32>, vector<32x128xf32>, vector<2x128xf32> -> vector<2x128xf32>
    %453 = arith.addf %451, %452 : vector<2x128xf32>
    %454 = arith.negf %450 : vector<2x128xf32>
    %455 = math.exp %454 : vector<2x128xf32>
    %cst_125 = arith.constant 1.000000e+00 : f32
    %456 = vector.broadcast %cst_125 : f32 to vector<2x128xf32>
    %457 = arith.addf %456, %455 : vector<2x128xf32>
    %458 = arith.divf %456, %457 : vector<2x128xf32>
    %459 = math.tanh %450 : vector<2x128xf32>
    %460 = arith.negf %453 : vector<2x128xf32>
    %461 = math.exp %460 : vector<2x128xf32>
    %cst_126 = arith.constant 1.000000e+00 : f32
    %462 = vector.broadcast %cst_126 : f32 to vector<2x128xf32>
    %463 = arith.addf %462, %461 : vector<2x128xf32>
    %464 = arith.divf %462, %463 : vector<2x128xf32>
    %465 = math.tanh %453 : vector<2x128xf32>
    %466 = vector.extract_strided_slice %458 {offsets = [0, 32], sizes = [2, 32], strides = [1, 1]} : vector<2x128xf32> to vector<2x32xf32>
    %467 = arith.mulf %466, %429 : vector<2x32xf32>
    %468 = vector.extract_strided_slice %458 {offsets = [0, 0], sizes = [2, 32], strides = [1, 1]} : vector<2x128xf32> to vector<2x32xf32>
    %469 = vector.extract_strided_slice %459 {offsets = [0, 64], sizes = [2, 32], strides = [1, 1]} : vector<2x128xf32> to vector<2x32xf32>
    %470 = arith.mulf %468, %469 : vector<2x32xf32>
    %471 = arith.addf %467, %470 : vector<2x32xf32>
    %472 = vector.extract_strided_slice %458 {offsets = [0, 96], sizes = [2, 32], strides = [1, 1]} : vector<2x128xf32> to vector<2x32xf32>
    %473 = math.tanh %471 : vector<2x32xf32>
    %474 = arith.mulf %472, %473 : vector<2x32xf32>
    %475 = vector.extract_strided_slice %464 {offsets = [0, 32], sizes = [2, 32], strides = [1, 1]} : vector<2x128xf32> to vector<2x32xf32>
    %476 = arith.mulf %475, %438 : vector<2x32xf32>
    %477 = vector.extract_strided_slice %464 {offsets = [0, 0], sizes = [2, 32], strides = [1, 1]} : vector<2x128xf32> to vector<2x32xf32>
    %478 = vector.extract_strided_slice %465 {offsets = [0, 64], sizes = [2, 32], strides = [1, 1]} : vector<2x128xf32> to vector<2x32xf32>
    %479 = arith.mulf %477, %478 : vector<2x32xf32>
    %480 = arith.addf %476, %479 : vector<2x32xf32>
    %481 = vector.extract_strided_slice %464 {offsets = [0, 96], sizes = [2, 32], strides = [1, 1]} : vector<2x128xf32> to vector<2x32xf32>
    %482 = math.tanh %480 : vector<2x32xf32>
    %483 = arith.mulf %481, %482 : vector<2x32xf32>
    %c2_127 = arith.constant 2 : index
    %c0_128 = arith.constant 0 : index
    %c0_129 = arith.constant 0 : index
    %484 = vector.load %arg19[%c2_127, %c0_128, %c0_129] : memref<8x2x32xf32, #tpu.memory_space<vmem>>, vector<1x2x32xf32>
    %485 = vector.shape_cast %484 : vector<1x2x32xf32> to vector<2x32xf32>
    %486 = vector.shape_cast %474 : vector<2x32xf32> to vector<1x2x32xf32>
    tpu.vector_store %arg19[%c2_127, %c0_128, %c0_129], %486 {strides = array<i32>} : memref<8x2x32xf32, #tpu.memory_space<vmem>>, vector<1x2x32xf32>,
    %c5_130 = arith.constant 5 : index
    %c0_131 = arith.constant 0 : index
    %c0_132 = arith.constant 0 : index
    %487 = vector.load %arg20[%c5_130, %c0_131, %c0_132] : memref<8x2x32xf32, #tpu.memory_space<vmem>>, vector<1x2x32xf32>
    %488 = vector.shape_cast %487 : vector<1x2x32xf32> to vector<2x32xf32>
    %489 = vector.shape_cast %483 : vector<2x32xf32> to vector<1x2x32xf32>
    tpu.vector_store %arg20[%c5_130, %c0_131, %c0_132], %489 {strides = array<i32>} : memref<8x2x32xf32, #tpu.memory_space<vmem>>, vector<1x2x32xf32>,
    %490 = vector.extract_strided_slice %361 {offsets = [6, 0], sizes = [2, 128], strides = [1, 1]} : vector<16x256xf32> to vector<2x128xf32>
    %cst_133 = arith.constant dense<0.000000e+00> : vector<2x128xf32>
    %491 = tpu.matmul %474, %348, %cst_133 {dimension_numbers = #tpu.dot_dimension_numbers<[1], [0], [0], [1], [0, 0, 1, 1], [], []>} : vector<2x32xf32>, vector<32x128xf32>, vector<2x128xf32> -> vector<2x128xf32>
    %492 = arith.addf %490, %491 : vector<2x128xf32>
    %493 = vector.extract_strided_slice %361 {offsets = [8, 128], sizes = [2, 128], strides = [1, 1]} : vector<16x256xf32> to vector<2x128xf32>
    %cst_134 = arith.constant dense<0.000000e+00> : vector<2x128xf32>
    %494 = tpu.matmul %483, %349, %cst_134 {dimension_numbers = #tpu.dot_dimension_numbers<[1], [0], [0], [1], [0, 0, 1, 1], [], []>} : vector<2x32xf32>, vector<32x128xf32>, vector<2x128xf32> -> vector<2x128xf32>
    %495 = arith.addf %493, %494 : vector<2x128xf32>
    %496 = arith.negf %492 : vector<2x128xf32>
    %497 = math.exp %496 : vector<2x128xf32>
    %cst_135 = arith.constant 1.000000e+00 : f32
    %498 = vector.broadcast %cst_135 : f32 to vector<2x128xf32>
    %499 = arith.addf %498, %497 : vector<2x128xf32>
    %500 = arith.divf %498, %499 : vector<2x128xf32>
    %501 = math.tanh %492 : vector<2x128xf32>
    %502 = arith.negf %495 : vector<2x128xf32>
    %503 = math.exp %502 : vector<2x128xf32>
    %cst_136 = arith.constant 1.000000e+00 : f32
    %504 = vector.broadcast %cst_136 : f32 to vector<2x128xf32>
    %505 = arith.addf %504, %503 : vector<2x128xf32>
    %506 = arith.divf %504, %505 : vector<2x128xf32>
    %507 = math.tanh %495 : vector<2x128xf32>
    %508 = vector.extract_strided_slice %500 {offsets = [0, 32], sizes = [2, 32], strides = [1, 1]} : vector<2x128xf32> to vector<2x32xf32>
    %509 = arith.mulf %508, %471 : vector<2x32xf32>
    %510 = vector.extract_strided_slice %500 {offsets = [0, 0], sizes = [2, 32], strides = [1, 1]} : vector<2x128xf32> to vector<2x32xf32>
    %511 = vector.extract_strided_slice %501 {offsets = [0, 64], sizes = [2, 32], strides = [1, 1]} : vector<2x128xf32> to vector<2x32xf32>
    %512 = arith.mulf %510, %511 : vector<2x32xf32>
    %513 = arith.addf %509, %512 : vector<2x32xf32>
    %514 = vector.extract_strided_slice %500 {offsets = [0, 96], sizes = [2, 32], strides = [1, 1]} : vector<2x128xf32> to vector<2x32xf32>
    %515 = math.tanh %513 : vector<2x32xf32>
    %516 = arith.mulf %514, %515 : vector<2x32xf32>
    %517 = vector.extract_strided_slice %506 {offsets = [0, 32], sizes = [2, 32], strides = [1, 1]} : vector<2x128xf32> to vector<2x32xf32>
    %518 = arith.mulf %517, %480 : vector<2x32xf32>
    %519 = vector.extract_strided_slice %506 {offsets = [0, 0], sizes = [2, 32], strides = [1, 1]} : vector<2x128xf32> to vector<2x32xf32>
    %520 = vector.extract_strided_slice %507 {offsets = [0, 64], sizes = [2, 32], strides = [1, 1]} : vector<2x128xf32> to vector<2x32xf32>
    %521 = arith.mulf %519, %520 : vector<2x32xf32>
    %522 = arith.addf %518, %521 : vector<2x32xf32>
    %523 = vector.extract_strided_slice %506 {offsets = [0, 96], sizes = [2, 32], strides = [1, 1]} : vector<2x128xf32> to vector<2x32xf32>
    %524 = math.tanh %522 : vector<2x32xf32>
    %525 = arith.mulf %523, %524 : vector<2x32xf32>
    %c3_137 = arith.constant 3 : index
    %c0_138 = arith.constant 0 : index
    %c0_139 = arith.constant 0 : index
    %526 = vector.load %arg19[%c3_137, %c0_138, %c0_139] : memref<8x2x32xf32, #tpu.memory_space<vmem>>, vector<1x2x32xf32>
    %527 = vector.shape_cast %526 : vector<1x2x32xf32> to vector<2x32xf32>
    %528 = vector.shape_cast %516 : vector<2x32xf32> to vector<1x2x32xf32>
    tpu.vector_store %arg19[%c3_137, %c0_138, %c0_139], %528 {strides = array<i32>} : memref<8x2x32xf32, #tpu.memory_space<vmem>>, vector<1x2x32xf32>,
    %c4_140 = arith.constant 4 : index
    %c0_141 = arith.constant 0 : index
    %c0_142 = arith.constant 0 : index
    %529 = vector.load %arg20[%c4_140, %c0_141, %c0_142] : memref<8x2x32xf32, #tpu.memory_space<vmem>>, vector<1x2x32xf32>
    %530 = vector.shape_cast %529 : vector<1x2x32xf32> to vector<2x32xf32>
    %531 = vector.shape_cast %525 : vector<2x32xf32> to vector<1x2x32xf32>
    tpu.vector_store %arg20[%c4_140, %c0_141, %c0_142], %531 {strides = array<i32>} : memref<8x2x32xf32, #tpu.memory_space<vmem>>, vector<1x2x32xf32>,
    %532 = vector.extract_strided_slice %361 {offsets = [8, 0], sizes = [2, 128], strides = [1, 1]} : vector<16x256xf32> to vector<2x128xf32>
    %cst_143 = arith.constant dense<0.000000e+00> : vector<2x128xf32>
    %533 = tpu.matmul %516, %348, %cst_143 {dimension_numbers = #tpu.dot_dimension_numbers<[1], [0], [0], [1], [0, 0, 1, 1], [], []>} : vector<2x32xf32>, vector<32x128xf32>, vector<2x128xf32> -> vector<2x128xf32>
    %534 = arith.addf %532, %533 : vector<2x128xf32>
    %535 = vector.extract_strided_slice %361 {offsets = [6, 128], sizes = [2, 128], strides = [1, 1]} : vector<16x256xf32> to vector<2x128xf32>
    %cst_144 = arith.constant dense<0.000000e+00> : vector<2x128xf32>
    %536 = tpu.matmul %525, %349, %cst_144 {dimension_numbers = #tpu.dot_dimension_numbers<[1], [0], [0], [1], [0, 0, 1, 1], [], []>} : vector<2x32xf32>, vector<32x128xf32>, vector<2x128xf32> -> vector<2x128xf32>
    %537 = arith.addf %535, %536 : vector<2x128xf32>
    %538 = arith.negf %534 : vector<2x128xf32>
    %539 = math.exp %538 : vector<2x128xf32>
    %cst_145 = arith.constant 1.000000e+00 : f32
    %540 = vector.broadcast %cst_145 : f32 to vector<2x128xf32>
    %541 = arith.addf %540, %539 : vector<2x128xf32>
    %542 = arith.divf %540, %541 : vector<2x128xf32>
    %543 = math.tanh %534 : vector<2x128xf32>
    %544 = arith.negf %537 : vector<2x128xf32>
    %545 = math.exp %544 : vector<2x128xf32>
    %cst_146 = arith.constant 1.000000e+00 : f32
    %546 = vector.broadcast %cst_146 : f32 to vector<2x128xf32>
    %547 = arith.addf %546, %545 : vector<2x128xf32>
    %548 = arith.divf %546, %547 : vector<2x128xf32>
    %549 = math.tanh %537 : vector<2x128xf32>
    %550 = vector.extract_strided_slice %542 {offsets = [0, 32], sizes = [2, 32], strides = [1, 1]} : vector<2x128xf32> to vector<2x32xf32>
    %551 = arith.mulf %550, %513 : vector<2x32xf32>
    %552 = vector.extract_strided_slice %542 {offsets = [0, 0], sizes = [2, 32], strides = [1, 1]} : vector<2x128xf32> to vector<2x32xf32>
    %553 = vector.extract_strided_slice %543 {offsets = [0, 64], sizes = [2, 32], strides = [1, 1]} : vector<2x128xf32> to vector<2x32xf32>
    %554 = arith.mulf %552, %553 : vector<2x32xf32>
    %555 = arith.addf %551, %554 : vector<2x32xf32>
    %556 = vector.extract_strided_slice %542 {offsets = [0, 96], sizes = [2, 32], strides = [1, 1]} : vector<2x128xf32> to vector<2x32xf32>
    %557 = math.tanh %555 : vector<2x32xf32>
    %558 = arith.mulf %556, %557 : vector<2x32xf32>
    %559 = vector.extract_strided_slice %548 {offsets = [0, 32], sizes = [2, 32], strides = [1, 1]} : vector<2x128xf32> to vector<2x32xf32>
    %560 = arith.mulf %559, %522 : vector<2x32xf32>
    %561 = vector.extract_strided_slice %548 {offsets = [0, 0], sizes = [2, 32], strides = [1, 1]} : vector<2x128xf32> to vector<2x32xf32>
    %562 = vector.extract_strided_slice %549 {offsets = [0, 64], sizes = [2, 32], strides = [1, 1]} : vector<2x128xf32> to vector<2x32xf32>
    %563 = arith.mulf %561, %562 : vector<2x32xf32>
    %564 = arith.addf %560, %563 : vector<2x32xf32>
    %565 = vector.extract_strided_slice %548 {offsets = [0, 96], sizes = [2, 32], strides = [1, 1]} : vector<2x128xf32> to vector<2x32xf32>
    %566 = math.tanh %564 : vector<2x32xf32>
    %567 = arith.mulf %565, %566 : vector<2x32xf32>
    %c4_147 = arith.constant 4 : index
    %c0_148 = arith.constant 0 : index
    %c0_149 = arith.constant 0 : index
    %568 = vector.load %arg19[%c4_147, %c0_148, %c0_149] : memref<8x2x32xf32, #tpu.memory_space<vmem>>, vector<1x2x32xf32>
    %569 = vector.shape_cast %568 : vector<1x2x32xf32> to vector<2x32xf32>
    %570 = vector.shape_cast %558 : vector<2x32xf32> to vector<1x2x32xf32>
    tpu.vector_store %arg19[%c4_147, %c0_148, %c0_149], %570 {strides = array<i32>} : memref<8x2x32xf32, #tpu.memory_space<vmem>>, vector<1x2x32xf32>,
    %c3_150 = arith.constant 3 : index
    %c0_151 = arith.constant 0 : index
    %c0_152 = arith.constant 0 : index
    %571 = vector.load %arg20[%c3_150, %c0_151, %c0_152] : memref<8x2x32xf32, #tpu.memory_space<vmem>>, vector<1x2x32xf32>
    %572 = vector.shape_cast %571 : vector<1x2x32xf32> to vector<2x32xf32>
    %573 = vector.shape_cast %567 : vector<2x32xf32> to vector<1x2x32xf32>
    tpu.vector_store %arg20[%c3_150, %c0_151, %c0_152], %573 {strides = array<i32>} : memref<8x2x32xf32, #tpu.memory_space<vmem>>, vector<1x2x32xf32>,
    %574 = vector.extract_strided_slice %361 {offsets = [10, 0], sizes = [2, 128], strides = [1, 1]} : vector<16x256xf32> to vector<2x128xf32>
    %cst_153 = arith.constant dense<0.000000e+00> : vector<2x128xf32>
    %575 = tpu.matmul %558, %348, %cst_153 {dimension_numbers = #tpu.dot_dimension_numbers<[1], [0], [0], [1], [0, 0, 1, 1], [], []>} : vector<2x32xf32>, vector<32x128xf32>, vector<2x128xf32> -> vector<2x128xf32>
    %576 = arith.addf %574, %575 : vector<2x128xf32>
    %577 = vector.extract_strided_slice %361 {offsets = [4, 128], sizes = [2, 128], strides = [1, 1]} : vector<16x256xf32> to vector<2x128xf32>
    %cst_154 = arith.constant dense<0.000000e+00> : vector<2x128xf32>
    %578 = tpu.matmul %567, %349, %cst_154 {dimension_numbers = #tpu.dot_dimension_numbers<[1], [0], [0], [1], [0, 0, 1, 1], [], []>} : vector<2x32xf32>, vector<32x128xf32>, vector<2x128xf32> -> vector<2x128xf32>
    %579 = arith.addf %577, %578 : vector<2x128xf32>
    %580 = arith.negf %576 : vector<2x128xf32>
    %581 = math.exp %580 : vector<2x128xf32>
    %cst_155 = arith.constant 1.000000e+00 : f32
    %582 = vector.broadcast %cst_155 : f32 to vector<2x128xf32>
    %583 = arith.addf %582, %581 : vector<2x128xf32>
    %584 = arith.divf %582, %583 : vector<2x128xf32>
    %585 = math.tanh %576 : vector<2x128xf32>
    %586 = arith.negf %579 : vector<2x128xf32>
    %587 = math.exp %586 : vector<2x128xf32>
    %cst_156 = arith.constant 1.000000e+00 : f32
    %588 = vector.broadcast %cst_156 : f32 to vector<2x128xf32>
    %589 = arith.addf %588, %587 : vector<2x128xf32>
    %590 = arith.divf %588, %589 : vector<2x128xf32>
    %591 = math.tanh %579 : vector<2x128xf32>
    %592 = vector.extract_strided_slice %584 {offsets = [0, 32], sizes = [2, 32], strides = [1, 1]} : vector<2x128xf32> to vector<2x32xf32>
    %593 = arith.mulf %592, %555 : vector<2x32xf32>
    %594 = vector.extract_strided_slice %584 {offsets = [0, 0], sizes = [2, 32], strides = [1, 1]} : vector<2x128xf32> to vector<2x32xf32>
    %595 = vector.extract_strided_slice %585 {offsets = [0, 64], sizes = [2, 32], strides = [1, 1]} : vector<2x128xf32> to vector<2x32xf32>
    %596 = arith.mulf %594, %595 : vector<2x32xf32>
    %597 = arith.addf %593, %596 : vector<2x32xf32>
    %598 = vector.extract_strided_slice %584 {offsets = [0, 96], sizes = [2, 32], strides = [1, 1]} : vector<2x128xf32> to vector<2x32xf32>
    %599 = math.tanh %597 : vector<2x32xf32>
    %600 = arith.mulf %598, %599 : vector<2x32xf32>
    %601 = vector.extract_strided_slice %590 {offsets = [0, 32], sizes = [2, 32], strides = [1, 1]} : vector<2x128xf32> to vector<2x32xf32>
    %602 = arith.mulf %601, %564 : vector<2x32xf32>
    %603 = vector.extract_strided_slice %590 {offsets = [0, 0], sizes = [2, 32], strides = [1, 1]} : vector<2x128xf32> to vector<2x32xf32>
    %604 = vector.extract_strided_slice %591 {offsets = [0, 64], sizes = [2, 32], strides = [1, 1]} : vector<2x128xf32> to vector<2x32xf32>
    %605 = arith.mulf %603, %604 : vector<2x32xf32>
    %606 = arith.addf %602, %605 : vector<2x32xf32>
    %607 = vector.extract_strided_slice %590 {offsets = [0, 96], sizes = [2, 32], strides = [1, 1]} : vector<2x128xf32> to vector<2x32xf32>
    %608 = math.tanh %606 : vector<2x32xf32>
    %609 = arith.mulf %607, %608 : vector<2x32xf32>
    %c5_157 = arith.constant 5 : index
    %c0_158 = arith.constant 0 : index
    %c0_159 = arith.constant 0 : index
    %610 = vector.load %arg19[%c5_157, %c0_158, %c0_159] : memref<8x2x32xf32, #tpu.memory_space<vmem>>, vector<1x2x32xf32>
    %611 = vector.shape_cast %610 : vector<1x2x32xf32> to vector<2x32xf32>
    %612 = vector.shape_cast %600 : vector<2x32xf32> to vector<1x2x32xf32>
    tpu.vector_store %arg19[%c5_157, %c0_158, %c0_159], %612 {strides = array<i32>} : memref<8x2x32xf32, #tpu.memory_space<vmem>>, vector<1x2x32xf32>,
    %c2_160 = arith.constant 2 : index
    %c0_161 = arith.constant 0 : index
    %c0_162 = arith.constant 0 : index
    %613 = vector.load %arg20[%c2_160, %c0_161, %c0_162] : memref<8x2x32xf32, #tpu.memory_space<vmem>>, vector<1x2x32xf32>
    %614 = vector.shape_cast %613 : vector<1x2x32xf32> to vector<2x32xf32>
    %615 = vector.shape_cast %609 : vector<2x32xf32> to vector<1x2x32xf32>
    tpu.vector_store %arg20[%c2_160, %c0_161, %c0_162], %615 {strides = array<i32>} : memref<8x2x32xf32, #tpu.memory_space<vmem>>, vector<1x2x32xf32>,
    %616 = vector.extract_strided_slice %361 {offsets = [12, 0], sizes = [2, 128], strides = [1, 1]} : vector<16x256xf32> to vector<2x128xf32>
    %cst_163 = arith.constant dense<0.000000e+00> : vector<2x128xf32>
    %617 = tpu.matmul %600, %348, %cst_163 {dimension_numbers = #tpu.dot_dimension_numbers<[1], [0], [0], [1], [0, 0, 1, 1], [], []>} : vector<2x32xf32>, vector<32x128xf32>, vector<2x128xf32> -> vector<2x128xf32>
    %618 = arith.addf %616, %617 : vector<2x128xf32>
    %619 = vector.extract_strided_slice %361 {offsets = [2, 128], sizes = [2, 128], strides = [1, 1]} : vector<16x256xf32> to vector<2x128xf32>
    %cst_164 = arith.constant dense<0.000000e+00> : vector<2x128xf32>
    %620 = tpu.matmul %609, %349, %cst_164 {dimension_numbers = #tpu.dot_dimension_numbers<[1], [0], [0], [1], [0, 0, 1, 1], [], []>} : vector<2x32xf32>, vector<32x128xf32>, vector<2x128xf32> -> vector<2x128xf32>
    %621 = arith.addf %619, %620 : vector<2x128xf32>
    %622 = arith.negf %618 : vector<2x128xf32>
    %623 = math.exp %622 : vector<2x128xf32>
    %cst_165 = arith.constant 1.000000e+00 : f32
    %624 = vector.broadcast %cst_165 : f32 to vector<2x128xf32>
    %625 = arith.addf %624, %623 : vector<2x128xf32>
    %626 = arith.divf %624, %625 : vector<2x128xf32>
    %627 = math.tanh %618 : vector<2x128xf32>
    %628 = arith.negf %621 : vector<2x128xf32>
    %629 = math.exp %628 : vector<2x128xf32>
    %cst_166 = arith.constant 1.000000e+00 : f32
    %630 = vector.broadcast %cst_166 : f32 to vector<2x128xf32>
    %631 = arith.addf %630, %629 : vector<2x128xf32>
    %632 = arith.divf %630, %631 : vector<2x128xf32>
    %633 = math.tanh %621 : vector<2x128xf32>
    %634 = vector.extract_strided_slice %626 {offsets = [0, 32], sizes = [2, 32], strides = [1, 1]} : vector<2x128xf32> to vector<2x32xf32>
    %635 = arith.mulf %634, %597 : vector<2x32xf32>
    %636 = vector.extract_strided_slice %626 {offsets = [0, 0], sizes = [2, 32], strides = [1, 1]} : vector<2x128xf32> to vector<2x32xf32>
    %637 = vector.extract_strided_slice %627 {offsets = [0, 64], sizes = [2, 32], strides = [1, 1]} : vector<2x128xf32> to vector<2x32xf32>
    %638 = arith.mulf %636, %637 : vector<2x32xf32>
    %639 = arith.addf %635, %638 : vector<2x32xf32>
    %640 = vector.extract_strided_slice %626 {offsets = [0, 96], sizes = [2, 32], strides = [1, 1]} : vector<2x128xf32> to vector<2x32xf32>
    %641 = math.tanh %639 : vector<2x32xf32>
    %642 = arith.mulf %640, %641 : vector<2x32xf32>
    %643 = vector.extract_strided_slice %632 {offsets = [0, 32], sizes = [2, 32], strides = [1, 1]} : vector<2x128xf32> to vector<2x32xf32>
    %644 = arith.mulf %643, %606 : vector<2x32xf32>
    %645 = vector.extract_strided_slice %632 {offsets = [0, 0], sizes = [2, 32], strides = [1, 1]} : vector<2x128xf32> to vector<2x32xf32>
    %646 = vector.extract_strided_slice %633 {offsets = [0, 64], sizes = [2, 32], strides = [1, 1]} : vector<2x128xf32> to vector<2x32xf32>
    %647 = arith.mulf %645, %646 : vector<2x32xf32>
    %648 = arith.addf %644, %647 : vector<2x32xf32>
    %649 = vector.extract_strided_slice %632 {offsets = [0, 96], sizes = [2, 32], strides = [1, 1]} : vector<2x128xf32> to vector<2x32xf32>
    %650 = math.tanh %648 : vector<2x32xf32>
    %651 = arith.mulf %649, %650 : vector<2x32xf32>
    %c6_167 = arith.constant 6 : index
    %c0_168 = arith.constant 0 : index
    %c0_169 = arith.constant 0 : index
    %652 = vector.load %arg19[%c6_167, %c0_168, %c0_169] : memref<8x2x32xf32, #tpu.memory_space<vmem>>, vector<1x2x32xf32>
    %653 = vector.shape_cast %652 : vector<1x2x32xf32> to vector<2x32xf32>
    %654 = vector.shape_cast %642 : vector<2x32xf32> to vector<1x2x32xf32>
    tpu.vector_store %arg19[%c6_167, %c0_168, %c0_169], %654 {strides = array<i32>} : memref<8x2x32xf32, #tpu.memory_space<vmem>>, vector<1x2x32xf32>,
    %c1_170 = arith.constant 1 : index
    %c0_171 = arith.constant 0 : index
    %c0_172 = arith.constant 0 : index
    %655 = vector.load %arg20[%c1_170, %c0_171, %c0_172] : memref<8x2x32xf32, #tpu.memory_space<vmem>>, vector<1x2x32xf32>
    %656 = vector.shape_cast %655 : vector<1x2x32xf32> to vector<2x32xf32>
    %657 = vector.shape_cast %651 : vector<2x32xf32> to vector<1x2x32xf32>
    tpu.vector_store %arg20[%c1_170, %c0_171, %c0_172], %657 {strides = array<i32>} : memref<8x2x32xf32, #tpu.memory_space<vmem>>, vector<1x2x32xf32>,
    %658 = vector.extract_strided_slice %361 {offsets = [14, 0], sizes = [2, 128], strides = [1, 1]} : vector<16x256xf32> to vector<2x128xf32>
    %cst_173 = arith.constant dense<0.000000e+00> : vector<2x128xf32>
    %659 = tpu.matmul %642, %348, %cst_173 {dimension_numbers = #tpu.dot_dimension_numbers<[1], [0], [0], [1], [0, 0, 1, 1], [], []>} : vector<2x32xf32>, vector<32x128xf32>, vector<2x128xf32> -> vector<2x128xf32>
    %660 = arith.addf %658, %659 : vector<2x128xf32>
    %661 = vector.extract_strided_slice %361 {offsets = [0, 128], sizes = [2, 128], strides = [1, 1]} : vector<16x256xf32> to vector<2x128xf32>
    %cst_174 = arith.constant dense<0.000000e+00> : vector<2x128xf32>
    %662 = tpu.matmul %651, %349, %cst_174 {dimension_numbers = #tpu.dot_dimension_numbers<[1], [0], [0], [1], [0, 0, 1, 1], [], []>} : vector<2x32xf32>, vector<32x128xf32>, vector<2x128xf32> -> vector<2x128xf32>
    %663 = arith.addf %661, %662 : vector<2x128xf32>
    %664 = arith.negf %660 : vector<2x128xf32>
    %665 = math.exp %664 : vector<2x128xf32>
    %cst_175 = arith.constant 1.000000e+00 : f32
    %666 = vector.broadcast %cst_175 : f32 to vector<2x128xf32>
    %667 = arith.addf %666, %665 : vector<2x128xf32>
    %668 = arith.divf %666, %667 : vector<2x128xf32>
    %669 = math.tanh %660 : vector<2x128xf32>
    %670 = arith.negf %663 : vector<2x128xf32>
    %671 = math.exp %670 : vector<2x128xf32>
    %cst_176 = arith.constant 1.000000e+00 : f32
    %672 = vector.broadcast %cst_176 : f32 to vector<2x128xf32>
    %673 = arith.addf %672, %671 : vector<2x128xf32>
    %674 = arith.divf %672, %673 : vector<2x128xf32>
    %675 = math.tanh %663 : vector<2x128xf32>
    %676 = vector.extract_strided_slice %668 {offsets = [0, 32], sizes = [2, 32], strides = [1, 1]} : vector<2x128xf32> to vector<2x32xf32>
    %677 = arith.mulf %676, %639 : vector<2x32xf32>
    %678 = vector.extract_strided_slice %668 {offsets = [0, 0], sizes = [2, 32], strides = [1, 1]} : vector<2x128xf32> to vector<2x32xf32>
    %679 = vector.extract_strided_slice %669 {offsets = [0, 64], sizes = [2, 32], strides = [1, 1]} : vector<2x128xf32> to vector<2x32xf32>
    %680 = arith.mulf %678, %679 : vector<2x32xf32>
    %681 = arith.addf %677, %680 : vector<2x32xf32>
    %682 = vector.extract_strided_slice %668 {offsets = [0, 96], sizes = [2, 32], strides = [1, 1]} : vector<2x128xf32> to vector<2x32xf32>
    %683 = math.tanh %681 : vector<2x32xf32>
    %684 = arith.mulf %682, %683 : vector<2x32xf32>
    %685 = vector.extract_strided_slice %674 {offsets = [0, 32], sizes = [2, 32], strides = [1, 1]} : vector<2x128xf32> to vector<2x32xf32>
    %686 = arith.mulf %685, %648 : vector<2x32xf32>
    %687 = vector.extract_strided_slice %674 {offsets = [0, 0], sizes = [2, 32], strides = [1, 1]} : vector<2x128xf32> to vector<2x32xf32>
    %688 = vector.extract_strided_slice %675 {offsets = [0, 64], sizes = [2, 32], strides = [1, 1]} : vector<2x128xf32> to vector<2x32xf32>
    %689 = arith.mulf %687, %688 : vector<2x32xf32>
    %690 = arith.addf %686, %689 : vector<2x32xf32>
    %691 = vector.extract_strided_slice %674 {offsets = [0, 96], sizes = [2, 32], strides = [1, 1]} : vector<2x128xf32> to vector<2x32xf32>
    %692 = math.tanh %690 : vector<2x32xf32>
    %693 = arith.mulf %691, %692 : vector<2x32xf32>
    %c7_177 = arith.constant 7 : index
    %c0_178 = arith.constant 0 : index
    %c0_179 = arith.constant 0 : index
    %694 = vector.load %arg19[%c7_177, %c0_178, %c0_179] : memref<8x2x32xf32, #tpu.memory_space<vmem>>, vector<1x2x32xf32>
    %695 = vector.shape_cast %694 : vector<1x2x32xf32> to vector<2x32xf32>
    %696 = vector.shape_cast %684 : vector<2x32xf32> to vector<1x2x32xf32>
    tpu.vector_store %arg19[%c7_177, %c0_178, %c0_179], %696 {strides = array<i32>} : memref<8x2x32xf32, #tpu.memory_space<vmem>>, vector<1x2x32xf32>,
    %c0_180 = arith.constant 0 : index
    %c0_181 = arith.constant 0 : index
    %c0_182 = arith.constant 0 : index
    %697 = vector.load %arg20[%c0_180, %c0_181, %c0_182] : memref<8x2x32xf32, #tpu.memory_space<vmem>>, vector<1x2x32xf32>
    %698 = vector.shape_cast %697 : vector<1x2x32xf32> to vector<2x32xf32>
    %699 = vector.shape_cast %693 : vector<2x32xf32> to vector<1x2x32xf32>
    tpu.vector_store %arg20[%c0_180, %c0_181, %c0_182], %699 {strides = array<i32>} : memref<8x2x32xf32, #tpu.memory_space<vmem>>, vector<1x2x32xf32>,
    %c0_183 = arith.constant 0 : index
    %c0_184 = arith.constant 0 : index
    %c0_185 = arith.constant 0 : index
    %700 = vector.load %arg19[%c0_183, %c0_184, %c0_185] : memref<8x2x32xf32, #tpu.memory_space<vmem>>, vector<8x2x32xf32>
    %701 = vector.shape_cast %700 : vector<8x2x32xf32> to vector<16x32xf32>
    %c0_186 = arith.constant 0 : index
    %c0_187 = arith.constant 0 : index
    %c0_188 = arith.constant 0 : index
    %702 = vector.load %arg20[%c0_186, %c0_187, %c0_188] : memref<8x2x32xf32, #tpu.memory_space<vmem>>, vector<8x2x32xf32>
    %703 = vector.shape_cast %702 : vector<8x2x32xf32> to vector<16x32xf32>
    %c0_189 = arith.constant 0 : index
    %c0_190 = arith.constant 0 : index
    %704 = vector.load %arg11[%c0_189, %c0_190] : memref<64x2xf32, #tpu.memory_space<vmem>>, vector<64x2xf32>
    %705 = vector.extract_strided_slice %704 {offsets = [0, 0], sizes = [32, 2], strides = [1, 1]} : vector<64x2xf32> to vector<32x2xf32>
    %cst_191 = arith.constant dense<0.000000e+00> : vector<16x2xf32>
    %706 = tpu.matmul %701, %705, %cst_191 {dimension_numbers = #tpu.dot_dimension_numbers<[1], [0], [0], [1], [0, 0, 1, 1], [], []>} : vector<16x32xf32>, vector<32x2xf32>, vector<16x2xf32> -> vector<16x2xf32>
    %707 = vector.extract_strided_slice %704 {offsets = [32, 0], sizes = [32, 2], strides = [1, 1]} : vector<64x2xf32> to vector<32x2xf32>
    %cst_192 = arith.constant dense<0.000000e+00> : vector<16x2xf32>
    %708 = tpu.matmul %703, %707, %cst_192 {dimension_numbers = #tpu.dot_dimension_numbers<[1], [0], [0], [1], [0, 0, 1, 1], [], []>} : vector<16x32xf32>, vector<32x2xf32>, vector<16x2xf32> -> vector<16x2xf32>
    %709 = arith.addf %706, %708 : vector<16x2xf32>
    %c0_193 = arith.constant 0 : index
    %c0_194 = arith.constant 0 : index
    %710 = vector.load %arg12[%c0_193, %c0_194] : memref<1x2xf32, #tpu.memory_space<vmem>>, vector<1x2xf32>
    %711 = vector.broadcast %710 : vector<1x2xf32> to vector<16x2xf32>
    %712 = arith.addf %709, %711 : vector<16x2xf32>
    %cst_195 = arith.constant dense<0xFF800000> : vector<16xf32>
    %713 = vector.multi_reduction <maximumf>, %712, %cst_195 [1] : vector<16x2xf32> to vector<16xf32>
    %714 = vector.shape_cast %713 : vector<16xf32> to vector<16x1xf32>
    %715 = vector.broadcast %714 : vector<16x1xf32> to vector<16x2xf32>
    %716 = arith.subf %712, %715 : vector<16x2xf32>
    %717 = math.exp %716 : vector<16x2xf32>
    %cst_196 = arith.constant dense<0.000000e+00> : vector<16xf32>
    %718 = vector.multi_reduction <add>, %717, %cst_196 [1] : vector<16x2xf32> to vector<16xf32>
    %719 = vector.shape_cast %718 : vector<16xf32> to vector<16x1xf32>
    %720 = vector.broadcast %719 : vector<16x1xf32> to vector<16x2xf32>
    %721 = arith.divf %717, %720 : vector<16x2xf32>
    %722 = vector.shape_cast %721 : vector<16x2xf32> to vector<8x2x2xf32>
    %723 = tpu.iota {dimensions = array<i32: 2>} : vector<8x2x2xi32>
    %c0_197 = arith.constant 0 : index
    %c0_198 = arith.constant 0 : index
    %c0_199 = arith.constant 0 : index
    %724 = vector.load %arg1[%c0_197, %c0_198, %c0_199] : memref<8x2x1xi32, #tpu.memory_space<vmem>>, vector<8x2x1xi32>
    %725 = vector.broadcast %724 : vector<8x2x1xi32> to vector<8x2x2xi32>
    %726 = arith.cmpi eq, %723, %725 : vector<8x2x2xi32>
    %727 = arith.extui %726 : vector<8x2x2xi1> to vector<8x2x2xi32>
    %728 = arith.sitofp %727 : vector<8x2x2xi32> to vector<8x2x2xf32>
    %c0_200 = arith.constant 0 : index
    %c0_201 = arith.constant 0 : index
    %c0_202 = arith.constant 0 : index
    %729 = vector.load %arg2[%c0_200, %c0_201, %c0_202] : memref<8x2x1xf32, #tpu.memory_space<vmem>>, vector<8x2x1xf32>
    %c0_203 = arith.constant 0 : index
    %c0_204 = arith.constant 0 : index
    %730 = vector.load %arg13[%c0_203, %c0_204] : memref<1x2xf32, #tpu.memory_space<vmem>>, vector<1x2xf32>
    %c0_205 = arith.constant 0 : index
    %c0_206 = arith.constant 0 : index
    %731 = vector.load %arg14[%c0_205, %c0_206] : memref<1x2xf32, #tpu.memory_space<vmem>>, vector<1x2xf32>
    %c0_207 = arith.constant 0 : index
    %c0_208 = arith.constant 0 : index
    %732 = vector.load %arg15[%c0_207, %c0_208] : memref<2x2xf32, #tpu.memory_space<vmem>>, vector<2x2xf32>
    %733 = vector.extract_strided_slice %722 {offsets = [0, 0, 0], sizes = [1, 2, 2], strides = [1, 1, 1]} : vector<8x2x2xf32> to vector<1x2x2xf32>
    %734 = vector.shape_cast %733 : vector<1x2x2xf32> to vector<2x2xf32>
    %735 = vector.broadcast %730 : vector<1x2xf32> to vector<2x2xf32>
    %736 = arith.addf %735, %734 : vector<2x2xf32>
    %737 = vector.extract_strided_slice %728 {offsets = [0, 0, 0], sizes = [1, 2, 2], strides = [1, 1, 1]} : vector<8x2x2xf32> to vector<1x2x2xf32>
    %738 = vector.shape_cast %737 : vector<1x2x2xf32> to vector<2x2xf32>
    %739 = arith.mulf %736, %738 : vector<2x2xf32>
    %cst_209 = arith.constant dense<0.000000e+00> : vector<2xf32>
    %740 = vector.multi_reduction <add>, %739, %cst_209 [1] : vector<2x2xf32> to vector<2xf32>
    %741 = vector.shape_cast %740 : vector<2xf32> to vector<2x1xf32>
    %742 = vector.extract_strided_slice %728 {offsets = [0, 0, 0], sizes = [7, 2, 2], strides = [1, 1, 1]} : vector<8x2x2xf32> to vector<7x2x2xf32>
    %743 = vector.extract_strided_slice %728 {offsets = [1, 0, 0], sizes = [7, 2, 2], strides = [1, 1, 1]} : vector<8x2x2xf32> to vector<7x2x2xf32>
    %744 = vector.extract_strided_slice %742 {offsets = [0, 0, 0], sizes = [7, 2, 1], strides = [1, 1, 1]} : vector<7x2x2xf32> to vector<7x2x1xf32>
    %745 = vector.extract_strided_slice %732 {offsets = [0, 0], sizes = [1, 2], strides = [1, 1]} : vector<2x2xf32> to vector<1x2xf32>
    %746 = vector.shape_cast %745 : vector<1x2xf32> to vector<1x1x2xf32>
    %747 = vector.broadcast %744 : vector<7x2x1xf32> to vector<7x2x2xf32>
    %748 = vector.broadcast %746 : vector<1x1x2xf32> to vector<7x2x2xf32>
    %749 = arith.mulf %747, %748 : vector<7x2x2xf32>
    %cst_210 = arith.constant 0.000000e+00 : f32
    %750 = vector.broadcast %cst_210 : f32 to vector<7x2x2xf32>
    %751 = arith.addf %750, %749 : vector<7x2x2xf32>
    %752 = vector.extract_strided_slice %742 {offsets = [0, 0, 1], sizes = [7, 2, 1], strides = [1, 1, 1]} : vector<7x2x2xf32> to vector<7x2x1xf32>
    %753 = vector.extract_strided_slice %732 {offsets = [1, 0], sizes = [1, 2], strides = [1, 1]} : vector<2x2xf32> to vector<1x2xf32>
    %754 = vector.shape_cast %753 : vector<1x2xf32> to vector<1x1x2xf32>
    %755 = vector.broadcast %752 : vector<7x2x1xf32> to vector<7x2x2xf32>
    %756 = vector.broadcast %754 : vector<1x1x2xf32> to vector<7x2x2xf32>
    %757 = arith.mulf %755, %756 : vector<7x2x2xf32>
    %758 = arith.addf %751, %757 : vector<7x2x2xf32>
    %759 = vector.extract_strided_slice %722 {offsets = [1, 0, 0], sizes = [7, 2, 2], strides = [1, 1, 1]} : vector<8x2x2xf32> to vector<7x2x2xf32>
    %760 = arith.addf %758, %759 : vector<7x2x2xf32>
    %761 = arith.mulf %760, %743 : vector<7x2x2xf32>
    %cst_211 = arith.constant dense<0.000000e+00> : vector<7x2xf32>
    %762 = vector.multi_reduction <add>, %761, %cst_211 [2] : vector<7x2x2xf32> to vector<7x2xf32>
    %763 = vector.shape_cast %762 : vector<7x2xf32> to vector<7x2x1xf32>
    %764 = vector.extract_strided_slice %729 {offsets = [1, 0, 0], sizes = [7, 2, 1], strides = [1, 1, 1]} : vector<8x2x1xf32> to vector<7x2x1xf32>
    %765 = arith.mulf %763, %764 : vector<7x2x1xf32>
    %cst_212 = arith.constant dense<0.000000e+00> : vector<2x1xf32>
    %766 = vector.multi_reduction <add>, %765, %cst_212 [0] : vector<7x2x1xf32> to vector<2x1xf32>
    %767 = arith.addf %741, %766 : vector<2x1xf32>
    %cst_213 = arith.constant dense<0.000000e+00> : vector<2x1xf32>
    %768 = vector.multi_reduction <add>, %729, %cst_213 [0] : vector<8x2x1xf32> to vector<2x1xf32>
    %769 = arith.fptosi %768 : vector<2x1xf32> to vector<2x1xi32>
    %c1_i32 = arith.constant 1 : i32
    %770 = vector.broadcast %c1_i32 : i32 to vector<2x1xi32>
    %771 = arith.subi %769, %770 : vector<2x1xi32>
    %772 = tpu.iota {dimensions = array<i32: 0>} : vector<8x2x1xi32>
    %773 = vector.shape_cast %771 : vector<2x1xi32> to vector<1x2x1xi32>
    %774 = vector.broadcast %773 : vector<1x2x1xi32> to vector<8x2x1xi32>
    %775 = arith.cmpi eq, %772, %774 : vector<8x2x1xi32>
    %776 = arith.extui %775 : vector<8x2x1xi1> to vector<8x2x1xi32>
    %777 = arith.sitofp %776 : vector<8x2x1xi32> to vector<8x2x1xf32>
    %778 = vector.broadcast %777 : vector<8x2x1xf32> to vector<8x2x2xf32>
    %779 = arith.mulf %778, %728 : vector<8x2x2xf32>
    %cst_214 = arith.constant dense<0.000000e+00> : vector<2x2xf32>
    %780 = vector.multi_reduction <add>, %779, %cst_214 [0] : vector<8x2x2xf32> to vector<2x2xf32>
    %781 = vector.broadcast %731 : vector<1x2xf32> to vector<2x2xf32>
    %782 = arith.mulf %780, %781 : vector<2x2xf32>
    %cst_215 = arith.constant dense<0.000000e+00> : vector<2xf32>
    %783 = vector.multi_reduction <add>, %782, %cst_215 [1] : vector<2x2xf32> to vector<2xf32>
    %784 = vector.shape_cast %783 : vector<2xf32> to vector<2x1xf32>
    %785 = arith.addf %767, %784 : vector<2x1xf32>
    %cst_216 = arith.constant dense<0xFF800000> : vector<2xf32>
    %786 = vector.multi_reduction <maximumf>, %732, %cst_216 [1] : vector<2x2xf32> to vector<2xf32>
    %787 = vector.shape_cast %786 : vector<2xf32> to vector<2x1xf32>
    %cst_217 = arith.constant dense<0xFF800000> : vector<1xf32>
    %788 = vector.multi_reduction <maximumf>, %787, %cst_217 [0] : vector<2x1xf32> to vector<1xf32>
    %789 = vector.shape_cast %788 : vector<1xf32> to vector<1x1xf32>
    %790 = vector.broadcast %789 : vector<1x1xf32> to vector<2x2xf32>
    %791 = arith.subf %732, %790 : vector<2x2xf32>
    %792 = math.exp %791 : vector<2x2xf32>
    %793 = vector.extract_strided_slice %722 {offsets = [0, 0, 0], sizes = [1, 2, 2], strides = [1, 1, 1]} : vector<8x2x2xf32> to vector<1x2x2xf32>
    %794 = vector.shape_cast %793 : vector<1x2x2xf32> to vector<2x2xf32>
    %795 = vector.broadcast %730 : vector<1x2xf32> to vector<2x2xf32>
    %796 = arith.addf %795, %794 : vector<2x2xf32>
    %cst_218 = arith.constant dense<0xFF800000> : vector<2xf32>
    %797 = vector.multi_reduction <maximumf>, %796, %cst_218 [1] : vector<2x2xf32> to vector<2xf32>
    %798 = vector.shape_cast %797 : vector<2xf32> to vector<2x1xf32>
    %799 = vector.broadcast %798 : vector<2x1xf32> to vector<2x2xf32>
    %800 = arith.subf %796, %799 : vector<2x2xf32>
    %801 = math.exp %800 : vector<2x2xf32>
    %802 = vector.extract_strided_slice %801 {offsets = [0, 0], sizes = [2, 1], strides = [1, 1]} : vector<2x2xf32> to vector<2x1xf32>
    %803 = vector.extract_strided_slice %792 {offsets = [0, 0], sizes = [1, 2], strides = [1, 1]} : vector<2x2xf32> to vector<1x2xf32>
    %804 = vector.broadcast %802 : vector<2x1xf32> to vector<2x2xf32>
    %805 = vector.broadcast %803 : vector<1x2xf32> to vector<2x2xf32>
    %806 = arith.mulf %804, %805 : vector<2x2xf32>
    %cst_219 = arith.constant 0.000000e+00 : f32
    %807 = vector.broadcast %cst_219 : f32 to vector<2x2xf32>
    %808 = arith.addf %807, %806 : vector<2x2xf32>
    %809 = vector.extract_strided_slice %801 {offsets = [0, 1], sizes = [2, 1], strides = [1, 1]} : vector<2x2xf32> to vector<2x1xf32>
    %810 = vector.extract_strided_slice %792 {offsets = [1, 0], sizes = [1, 2], strides = [1, 1]} : vector<2x2xf32> to vector<1x2xf32>
    %811 = vector.broadcast %809 : vector<2x1xf32> to vector<2x2xf32>
    %812 = vector.broadcast %810 : vector<1x2xf32> to vector<2x2xf32>
    %813 = arith.mulf %811, %812 : vector<2x2xf32>
    %814 = arith.addf %808, %813 : vector<2x2xf32>
    %815 = vector.broadcast %789 : vector<1x1xf32> to vector<2x1xf32>
    %816 = arith.addf %798, %815 : vector<2x1xf32>
    %817 = math.log %814 : vector<2x2xf32>
    %818 = vector.broadcast %816 : vector<2x1xf32> to vector<2x2xf32>
    %819 = arith.addf %818, %817 : vector<2x2xf32>
    %820 = vector.extract_strided_slice %722 {offsets = [1, 0, 0], sizes = [1, 2, 2], strides = [1, 1, 1]} : vector<8x2x2xf32> to vector<1x2x2xf32>
    %821 = vector.shape_cast %820 : vector<1x2x2xf32> to vector<2x2xf32>
    %822 = arith.addf %819, %821 : vector<2x2xf32>
    %823 = vector.extract_strided_slice %729 {offsets = [1, 0, 0], sizes = [1, 2, 1], strides = [1, 1, 1]} : vector<8x2x1xf32> to vector<1x2x1xf32>
    %824 = vector.shape_cast %823 : vector<1x2x1xf32> to vector<2x1xf32>
    %cst_220 = arith.constant 5.000000e-01 : f32
    %825 = vector.broadcast %cst_220 : f32 to vector<2x1xf32>
    %826 = arith.cmpf ogt, %824, %825 : vector<2x1xf32>
    %827 = vector.shape_cast %826 : vector<2x1xi1> to vector<2x1xi1>
    %828 = vector.broadcast %827 : vector<2x1xi1> to vector<2x2xi1>
    %829 = arith.select %828, %822, %796 : vector<2x2xi1>, vector<2x2xf32>
    %cst_221 = arith.constant dense<0xFF800000> : vector<2xf32>
    %830 = vector.multi_reduction <maximumf>, %829, %cst_221 [1] : vector<2x2xf32> to vector<2xf32>
    %831 = vector.shape_cast %830 : vector<2xf32> to vector<2x1xf32>
    %832 = vector.broadcast %831 : vector<2x1xf32> to vector<2x2xf32>
    %833 = arith.subf %829, %832 : vector<2x2xf32>
    %834 = math.exp %833 : vector<2x2xf32>
    %835 = vector.extract_strided_slice %834 {offsets = [0, 0], sizes = [2, 1], strides = [1, 1]} : vector<2x2xf32> to vector<2x1xf32>
    %836 = vector.extract_strided_slice %792 {offsets = [0, 0], sizes = [1, 2], strides = [1, 1]} : vector<2x2xf32> to vector<1x2xf32>
    %837 = vector.broadcast %835 : vector<2x1xf32> to vector<2x2xf32>
    %838 = vector.broadcast %836 : vector<1x2xf32> to vector<2x2xf32>
    %839 = arith.mulf %837, %838 : vector<2x2xf32>
    %cst_222 = arith.constant 0.000000e+00 : f32
    %840 = vector.broadcast %cst_222 : f32 to vector<2x2xf32>
    %841 = arith.addf %840, %839 : vector<2x2xf32>
    %842 = vector.extract_strided_slice %834 {offsets = [0, 1], sizes = [2, 1], strides = [1, 1]} : vector<2x2xf32> to vector<2x1xf32>
    %843 = vector.extract_strided_slice %792 {offsets = [1, 0], sizes = [1, 2], strides = [1, 1]} : vector<2x2xf32> to vector<1x2xf32>
    %844 = vector.broadcast %842 : vector<2x1xf32> to vector<2x2xf32>
    %845 = vector.broadcast %843 : vector<1x2xf32> to vector<2x2xf32>
    %846 = arith.mulf %844, %845 : vector<2x2xf32>
    %847 = arith.addf %841, %846 : vector<2x2xf32>
    %848 = vector.broadcast %789 : vector<1x1xf32> to vector<2x1xf32>
    %849 = arith.addf %831, %848 : vector<2x1xf32>
    %850 = math.log %847 : vector<2x2xf32>
    %851 = vector.broadcast %849 : vector<2x1xf32> to vector<2x2xf32>
    %852 = arith.addf %851, %850 : vector<2x2xf32>
    %853 = vector.extract_strided_slice %722 {offsets = [2, 0, 0], sizes = [1, 2, 2], strides = [1, 1, 1]} : vector<8x2x2xf32> to vector<1x2x2xf32>
    %854 = vector.shape_cast %853 : vector<1x2x2xf32> to vector<2x2xf32>
    %855 = arith.addf %852, %854 : vector<2x2xf32>
    %856 = vector.extract_strided_slice %729 {offsets = [2, 0, 0], sizes = [1, 2, 1], strides = [1, 1, 1]} : vector<8x2x1xf32> to vector<1x2x1xf32>
    %857 = vector.shape_cast %856 : vector<1x2x1xf32> to vector<2x1xf32>
    %cst_223 = arith.constant 5.000000e-01 : f32
    %858 = vector.broadcast %cst_223 : f32 to vector<2x1xf32>
    %859 = arith.cmpf ogt, %857, %858 : vector<2x1xf32>
    %860 = vector.shape_cast %859 : vector<2x1xi1> to vector<2x1xi1>
    %861 = vector.broadcast %860 : vector<2x1xi1> to vector<2x2xi1>
    %862 = arith.select %861, %855, %829 : vector<2x2xi1>, vector<2x2xf32>
    %cst_224 = arith.constant dense<0xFF800000> : vector<2xf32>
    %863 = vector.multi_reduction <maximumf>, %862, %cst_224 [1] : vector<2x2xf32> to vector<2xf32>
    %864 = vector.shape_cast %863 : vector<2xf32> to vector<2x1xf32>
    %865 = vector.broadcast %864 : vector<2x1xf32> to vector<2x2xf32>
    %866 = arith.subf %862, %865 : vector<2x2xf32>
    %867 = math.exp %866 : vector<2x2xf32>
    %868 = vector.extract_strided_slice %867 {offsets = [0, 0], sizes = [2, 1], strides = [1, 1]} : vector<2x2xf32> to vector<2x1xf32>
    %869 = vector.extract_strided_slice %792 {offsets = [0, 0], sizes = [1, 2], strides = [1, 1]} : vector<2x2xf32> to vector<1x2xf32>
    %870 = vector.broadcast %868 : vector<2x1xf32> to vector<2x2xf32>
    %871 = vector.broadcast %869 : vector<1x2xf32> to vector<2x2xf32>
    %872 = arith.mulf %870, %871 : vector<2x2xf32>
    %cst_225 = arith.constant 0.000000e+00 : f32
    %873 = vector.broadcast %cst_225 : f32 to vector<2x2xf32>
    %874 = arith.addf %873, %872 : vector<2x2xf32>
    %875 = vector.extract_strided_slice %867 {offsets = [0, 1], sizes = [2, 1], strides = [1, 1]} : vector<2x2xf32> to vector<2x1xf32>
    %876 = vector.extract_strided_slice %792 {offsets = [1, 0], sizes = [1, 2], strides = [1, 1]} : vector<2x2xf32> to vector<1x2xf32>
    %877 = vector.broadcast %875 : vector<2x1xf32> to vector<2x2xf32>
    %878 = vector.broadcast %876 : vector<1x2xf32> to vector<2x2xf32>
    %879 = arith.mulf %877, %878 : vector<2x2xf32>
    %880 = arith.addf %874, %879 : vector<2x2xf32>
    %881 = vector.broadcast %789 : vector<1x1xf32> to vector<2x1xf32>
    %882 = arith.addf %864, %881 : vector<2x1xf32>
    %883 = math.log %880 : vector<2x2xf32>
    %884 = vector.broadcast %882 : vector<2x1xf32> to vector<2x2xf32>
    %885 = arith.addf %884, %883 : vector<2x2xf32>
    %886 = vector.extract_strided_slice %722 {offsets = [3, 0, 0], sizes = [1, 2, 2], strides = [1, 1, 1]} : vector<8x2x2xf32> to vector<1x2x2xf32>
    %887 = vector.shape_cast %886 : vector<1x2x2xf32> to vector<2x2xf32>
    %888 = arith.addf %885, %887 : vector<2x2xf32>
    %889 = vector.extract_strided_slice %729 {offsets = [3, 0, 0], sizes = [1, 2, 1], strides = [1, 1, 1]} : vector<8x2x1xf32> to vector<1x2x1xf32>
    %890 = vector.shape_cast %889 : vector<1x2x1xf32> to vector<2x1xf32>
    %cst_226 = arith.constant 5.000000e-01 : f32
    %891 = vector.broadcast %cst_226 : f32 to vector<2x1xf32>
    %892 = arith.cmpf ogt, %890, %891 : vector<2x1xf32>
    %893 = vector.shape_cast %892 : vector<2x1xi1> to vector<2x1xi1>
    %894 = vector.broadcast %893 : vector<2x1xi1> to vector<2x2xi1>
    %895 = arith.select %894, %888, %862 : vector<2x2xi1>, vector<2x2xf32>
    %cst_227 = arith.constant dense<0xFF800000> : vector<2xf32>
    %896 = vector.multi_reduction <maximumf>, %895, %cst_227 [1] : vector<2x2xf32> to vector<2xf32>
    %897 = vector.shape_cast %896 : vector<2xf32> to vector<2x1xf32>
    %898 = vector.broadcast %897 : vector<2x1xf32> to vector<2x2xf32>
    %899 = arith.subf %895, %898 : vector<2x2xf32>
    %900 = math.exp %899 : vector<2x2xf32>
    %901 = vector.extract_strided_slice %900 {offsets = [0, 0], sizes = [2, 1], strides = [1, 1]} : vector<2x2xf32> to vector<2x1xf32>
    %902 = vector.extract_strided_slice %792 {offsets = [0, 0], sizes = [1, 2], strides = [1, 1]} : vector<2x2xf32> to vector<1x2xf32>
    %903 = vector.broadcast %901 : vector<2x1xf32> to vector<2x2xf32>
    %904 = vector.broadcast %902 : vector<1x2xf32> to vector<2x2xf32>
    %905 = arith.mulf %903, %904 : vector<2x2xf32>
    %cst_228 = arith.constant 0.000000e+00 : f32
    %906 = vector.broadcast %cst_228 : f32 to vector<2x2xf32>
    %907 = arith.addf %906, %905 : vector<2x2xf32>
    %908 = vector.extract_strided_slice %900 {offsets = [0, 1], sizes = [2, 1], strides = [1, 1]} : vector<2x2xf32> to vector<2x1xf32>
    %909 = vector.extract_strided_slice %792 {offsets = [1, 0], sizes = [1, 2], strides = [1, 1]} : vector<2x2xf32> to vector<1x2xf32>
    %910 = vector.broadcast %908 : vector<2x1xf32> to vector<2x2xf32>
    %911 = vector.broadcast %909 : vector<1x2xf32> to vector<2x2xf32>
    %912 = arith.mulf %910, %911 : vector<2x2xf32>
    %913 = arith.addf %907, %912 : vector<2x2xf32>
    %914 = vector.broadcast %789 : vector<1x1xf32> to vector<2x1xf32>
    %915 = arith.addf %897, %914 : vector<2x1xf32>
    %916 = math.log %913 : vector<2x2xf32>
    %917 = vector.broadcast %915 : vector<2x1xf32> to vector<2x2xf32>
    %918 = arith.addf %917, %916 : vector<2x2xf32>
    %919 = vector.extract_strided_slice %722 {offsets = [4, 0, 0], sizes = [1, 2, 2], strides = [1, 1, 1]} : vector<8x2x2xf32> to vector<1x2x2xf32>
    %920 = vector.shape_cast %919 : vector<1x2x2xf32> to vector<2x2xf32>
    %921 = arith.addf %918, %920 : vector<2x2xf32>
    %922 = vector.extract_strided_slice %729 {offsets = [4, 0, 0], sizes = [1, 2, 1], strides = [1, 1, 1]} : vector<8x2x1xf32> to vector<1x2x1xf32>
    %923 = vector.shape_cast %922 : vector<1x2x1xf32> to vector<2x1xf32>
    %cst_229 = arith.constant 5.000000e-01 : f32
    %924 = vector.broadcast %cst_229 : f32 to vector<2x1xf32>
    %925 = arith.cmpf ogt, %923, %924 : vector<2x1xf32>
    %926 = vector.shape_cast %925 : vector<2x1xi1> to vector<2x1xi1>
    %927 = vector.broadcast %926 : vector<2x1xi1> to vector<2x2xi1>
    %928 = arith.select %927, %921, %895 : vector<2x2xi1>, vector<2x2xf32>
    %cst_230 = arith.constant dense<0xFF800000> : vector<2xf32>
    %929 = vector.multi_reduction <maximumf>, %928, %cst_230 [1] : vector<2x2xf32> to vector<2xf32>
    %930 = vector.shape_cast %929 : vector<2xf32> to vector<2x1xf32>
    %931 = vector.broadcast %930 : vector<2x1xf32> to vector<2x2xf32>
    %932 = arith.subf %928, %931 : vector<2x2xf32>
    %933 = math.exp %932 : vector<2x2xf32>
    %934 = vector.extract_strided_slice %933 {offsets = [0, 0], sizes = [2, 1], strides = [1, 1]} : vector<2x2xf32> to vector<2x1xf32>
    %935 = vector.extract_strided_slice %792 {offsets = [0, 0], sizes = [1, 2], strides = [1, 1]} : vector<2x2xf32> to vector<1x2xf32>
    %936 = vector.broadcast %934 : vector<2x1xf32> to vector<2x2xf32>
    %937 = vector.broadcast %935 : vector<1x2xf32> to vector<2x2xf32>
    %938 = arith.mulf %936, %937 : vector<2x2xf32>
    %cst_231 = arith.constant 0.000000e+00 : f32
    %939 = vector.broadcast %cst_231 : f32 to vector<2x2xf32>
    %940 = arith.addf %939, %938 : vector<2x2xf32>
    %941 = vector.extract_strided_slice %933 {offsets = [0, 1], sizes = [2, 1], strides = [1, 1]} : vector<2x2xf32> to vector<2x1xf32>
    %942 = vector.extract_strided_slice %792 {offsets = [1, 0], sizes = [1, 2], strides = [1, 1]} : vector<2x2xf32> to vector<1x2xf32>
    %943 = vector.broadcast %941 : vector<2x1xf32> to vector<2x2xf32>
    %944 = vector.broadcast %942 : vector<1x2xf32> to vector<2x2xf32>
    %945 = arith.mulf %943, %944 : vector<2x2xf32>
    %946 = arith.addf %940, %945 : vector<2x2xf32>
    %947 = vector.broadcast %789 : vector<1x1xf32> to vector<2x1xf32>
    %948 = arith.addf %930, %947 : vector<2x1xf32>
    %949 = math.log %946 : vector<2x2xf32>
    %950 = vector.broadcast %948 : vector<2x1xf32> to vector<2x2xf32>
    %951 = arith.addf %950, %949 : vector<2x2xf32>
    %952 = vector.extract_strided_slice %722 {offsets = [5, 0, 0], sizes = [1, 2, 2], strides = [1, 1, 1]} : vector<8x2x2xf32> to vector<1x2x2xf32>
    %953 = vector.shape_cast %952 : vector<1x2x2xf32> to vector<2x2xf32>
    %954 = arith.addf %951, %953 : vector<2x2xf32>
    %955 = vector.extract_strided_slice %729 {offsets = [5, 0, 0], sizes = [1, 2, 1], strides = [1, 1, 1]} : vector<8x2x1xf32> to vector<1x2x1xf32>
    %956 = vector.shape_cast %955 : vector<1x2x1xf32> to vector<2x1xf32>
    %cst_232 = arith.constant 5.000000e-01 : f32
    %957 = vector.broadcast %cst_232 : f32 to vector<2x1xf32>
    %958 = arith.cmpf ogt, %956, %957 : vector<2x1xf32>
    %959 = vector.shape_cast %958 : vector<2x1xi1> to vector<2x1xi1>
    %960 = vector.broadcast %959 : vector<2x1xi1> to vector<2x2xi1>
    %961 = arith.select %960, %954, %928 : vector<2x2xi1>, vector<2x2xf32>
    %cst_233 = arith.constant dense<0xFF800000> : vector<2xf32>
    %962 = vector.multi_reduction <maximumf>, %961, %cst_233 [1] : vector<2x2xf32> to vector<2xf32>
    %963 = vector.shape_cast %962 : vector<2xf32> to vector<2x1xf32>
    %964 = vector.broadcast %963 : vector<2x1xf32> to vector<2x2xf32>
    %965 = arith.subf %961, %964 : vector<2x2xf32>
    %966 = math.exp %965 : vector<2x2xf32>
    %967 = vector.extract_strided_slice %966 {offsets = [0, 0], sizes = [2, 1], strides = [1, 1]} : vector<2x2xf32> to vector<2x1xf32>
    %968 = vector.extract_strided_slice %792 {offsets = [0, 0], sizes = [1, 2], strides = [1, 1]} : vector<2x2xf32> to vector<1x2xf32>
    %969 = vector.broadcast %967 : vector<2x1xf32> to vector<2x2xf32>
    %970 = vector.broadcast %968 : vector<1x2xf32> to vector<2x2xf32>
    %971 = arith.mulf %969, %970 : vector<2x2xf32>
    %cst_234 = arith.constant 0.000000e+00 : f32
    %972 = vector.broadcast %cst_234 : f32 to vector<2x2xf32>
    %973 = arith.addf %972, %971 : vector<2x2xf32>
    %974 = vector.extract_strided_slice %966 {offsets = [0, 1], sizes = [2, 1], strides = [1, 1]} : vector<2x2xf32> to vector<2x1xf32>
    %975 = vector.extract_strided_slice %792 {offsets = [1, 0], sizes = [1, 2], strides = [1, 1]} : vector<2x2xf32> to vector<1x2xf32>
    %976 = vector.broadcast %974 : vector<2x1xf32> to vector<2x2xf32>
    %977 = vector.broadcast %975 : vector<1x2xf32> to vector<2x2xf32>
    %978 = arith.mulf %976, %977 : vector<2x2xf32>
    %979 = arith.addf %973, %978 : vector<2x2xf32>
    %980 = vector.broadcast %789 : vector<1x1xf32> to vector<2x1xf32>
    %981 = arith.addf %963, %980 : vector<2x1xf32>
    %982 = math.log %979 : vector<2x2xf32>
    %983 = vector.broadcast %981 : vector<2x1xf32> to vector<2x2xf32>
    %984 = arith.addf %983, %982 : vector<2x2xf32>
    %985 = vector.extract_strided_slice %722 {offsets = [6, 0, 0], sizes = [1, 2, 2], strides = [1, 1, 1]} : vector<8x2x2xf32> to vector<1x2x2xf32>
    %986 = vector.shape_cast %985 : vector<1x2x2xf32> to vector<2x2xf32>
    %987 = arith.addf %984, %986 : vector<2x2xf32>
    %988 = vector.extract_strided_slice %729 {offsets = [6, 0, 0], sizes = [1, 2, 1], strides = [1, 1, 1]} : vector<8x2x1xf32> to vector<1x2x1xf32>
    %989 = vector.shape_cast %988 : vector<1x2x1xf32> to vector<2x1xf32>
    %cst_235 = arith.constant 5.000000e-01 : f32
    %990 = vector.broadcast %cst_235 : f32 to vector<2x1xf32>
    %991 = arith.cmpf ogt, %989, %990 : vector<2x1xf32>
    %992 = vector.shape_cast %991 : vector<2x1xi1> to vector<2x1xi1>
    %993 = vector.broadcast %992 : vector<2x1xi1> to vector<2x2xi1>
    %994 = arith.select %993, %987, %961 : vector<2x2xi1>, vector<2x2xf32>
    %cst_236 = arith.constant dense<0xFF800000> : vector<2xf32>
    %995 = vector.multi_reduction <maximumf>, %994, %cst_236 [1] : vector<2x2xf32> to vector<2xf32>
    %996 = vector.shape_cast %995 : vector<2xf32> to vector<2x1xf32>
    %997 = vector.broadcast %996 : vector<2x1xf32> to vector<2x2xf32>
    %998 = arith.subf %994, %997 : vector<2x2xf32>
    %999 = math.exp %998 : vector<2x2xf32>
    %1000 = vector.extract_strided_slice %999 {offsets = [0, 0], sizes = [2, 1], strides = [1, 1]} : vector<2x2xf32> to vector<2x1xf32>
    %1001 = vector.extract_strided_slice %792 {offsets = [0, 0], sizes = [1, 2], strides = [1, 1]} : vector<2x2xf32> to vector<1x2xf32>
    %1002 = vector.broadcast %1000 : vector<2x1xf32> to vector<2x2xf32>
    %1003 = vector.broadcast %1001 : vector<1x2xf32> to vector<2x2xf32>
    %1004 = arith.mulf %1002, %1003 : vector<2x2xf32>
    %cst_237 = arith.constant 0.000000e+00 : f32
    %1005 = vector.broadcast %cst_237 : f32 to vector<2x2xf32>
    %1006 = arith.addf %1005, %1004 : vector<2x2xf32>
    %1007 = vector.extract_strided_slice %999 {offsets = [0, 1], sizes = [2, 1], strides = [1, 1]} : vector<2x2xf32> to vector<2x1xf32>
    %1008 = vector.extract_strided_slice %792 {offsets = [1, 0], sizes = [1, 2], strides = [1, 1]} : vector<2x2xf32> to vector<1x2xf32>
    %1009 = vector.broadcast %1007 : vector<2x1xf32> to vector<2x2xf32>
    %1010 = vector.broadcast %1008 : vector<1x2xf32> to vector<2x2xf32>
    %1011 = arith.mulf %1009, %1010 : vector<2x2xf32>
    %1012 = arith.addf %1006, %1011 : vector<2x2xf32>
    %1013 = vector.broadcast %789 : vector<1x1xf32> to vector<2x1xf32>
    %1014 = arith.addf %996, %1013 : vector<2x1xf32>
    %1015 = math.log %1012 : vector<2x2xf32>
    %1016 = vector.broadcast %1014 : vector<2x1xf32> to vector<2x2xf32>
    %1017 = arith.addf %1016, %1015 : vector<2x2xf32>
    %1018 = vector.extract_strided_slice %722 {offsets = [7, 0, 0], sizes = [1, 2, 2], strides = [1, 1, 1]} : vector<8x2x2xf32> to vector<1x2x2xf32>
    %1019 = vector.shape_cast %1018 : vector<1x2x2xf32> to vector<2x2xf32>
    %1020 = arith.addf %1017, %1019 : vector<2x2xf32>
    %1021 = vector.extract_strided_slice %729 {offsets = [7, 0, 0], sizes = [1, 2, 1], strides = [1, 1, 1]} : vector<8x2x1xf32> to vector<1x2x1xf32>
    %1022 = vector.shape_cast %1021 : vector<1x2x1xf32> to vector<2x1xf32>
    %cst_238 = arith.constant 5.000000e-01 : f32
    %1023 = vector.broadcast %cst_238 : f32 to vector<2x1xf32>
    %1024 = arith.cmpf ogt, %1022, %1023 : vector<2x1xf32>
    %1025 = vector.shape_cast %1024 : vector<2x1xi1> to vector<2x1xi1>
    %1026 = vector.broadcast %1025 : vector<2x1xi1> to vector<2x2xi1>
    %1027 = arith.select %1026, %1020, %994 : vector<2x2xi1>, vector<2x2xf32>
    %1028 = vector.broadcast %731 : vector<1x2xf32> to vector<2x2xf32>
    %1029 = arith.addf %1027, %1028 : vector<2x2xf32>
    %cst_239 = arith.constant dense<0xFF800000> : vector<2xf32>
    %1030 = vector.multi_reduction <maximumf>, %1029, %cst_239 [1] : vector<2x2xf32> to vector<2xf32>
    %1031 = vector.shape_cast %1030 : vector<2xf32> to vector<2x1xf32>
    %1032 = vector.broadcast %1031 : vector<2x1xf32> to vector<2x2xf32>
    %1033 = arith.subf %1029, %1032 : vector<2x2xf32>
    %1034 = math.exp %1033 : vector<2x2xf32>
    %cst_240 = arith.constant dense<0.000000e+00> : vector<2xf32>
    %1035 = vector.multi_reduction <add>, %1034, %cst_240 [1] : vector<2x2xf32> to vector<2xf32>
    %1036 = vector.shape_cast %1035 : vector<2xf32> to vector<2x1xf32>
    %1037 = math.log %1036 : vector<2x1xf32>
    %1038 = arith.addf %1031, %1037 : vector<2x1xf32>
    %1039 = arith.subf %785, %1038 : vector<2x1xf32>
    %cst_241 = arith.constant dense<0.000000e+00> : vector<1xf32>
    %1040 = vector.multi_reduction <add>, %1039, %cst_241 [0] : vector<2x1xf32> to vector<1xf32>
    %1041 = vector.shape_cast %1040 : vector<1xf32> to vector<1x1xf32>
    %cst_242 = arith.constant 0.000000e+00 : f32
    %1042 = vector.broadcast %cst_242 : f32 to vector<1x1xf32>
    %1043 = arith.subf %1042, %1041 : vector<1x1xf32>
    %c0_243 = arith.constant 0 : index
    %c0_244 = arith.constant 0 : index
    %1044 = vector.load %arg16[%c0_243, %c0_244] : memref<1x1xf32, #tpu.memory_space<vmem>>, vector<1x1xf32>
    tpu.vector_store %arg16[%c0_243, %c0_244], %1043 {strides = array<i32>} : memref<1x1xf32, #tpu.memory_space<vmem>>, vector<1x1xf32>,
    return
  }
}

</mosaic_0001>

<bundles_post_ra>
// kernel: tpu_custom_call.1
= control target key start
LH: loop header
LB: loop body
LE: loop exit
PB: predicated region body
PF: predicated region fallthrough
CT: control target
= control target key end

     0   :  { %s5380_s0 = inlined_call_operand.hbm [shape: f32[8,2,16], index: 0, kind: input, shape index: {}]   ;;  %s5381_s1 = inlined_call_operand.vmem [shape: s32[8,2,1], index: 1, kind: input, shape index: {}]   ;;  %s5382_s2 = inlined_call_operand.vmem [shape: f32[8,2,1], index: 2, kind: input, shape index: {}]   ;;  %s5383_s3 = inlined_call_operand.vmem [shape: f32[16,256], index: 3, kind: input, shape index: {}]   ;;  %s5384_s4 = inlined_call_operand.vmem [shape: f32[32,128], index: 4, kind: input, shape index: {}]   ;;  %s5385_s5 = inlined_call_operand.vmem [shape: f32[32,128], index: 5, kind: input, shape index: {}]   ;;  %s5386_s6 = inlined_call_operand.vmem [shape: f32[1,256], index: 6, kind: input, shape index: {}]   ;;  %s5387_s7 = inlined_call_operand.hbm [shape: f32[64,256], index: 7, kind: input, shape index: {}]   ;;  %s5388_s8 = inlined_call_operand.hbm [shape: f32[32,128], index: 8, kind: input, shape index: {}]   ;;  %s5389_s9 = inlined_call_operand.hbm [shape: f32[32,128], index: 9, kind: input, shape index: {}]   ;;  %s5390_s10 = inlined_call_operand.vmem [shape: f32[1,256], index: 10, kind: input, shape index: {}]   ;;  %s5391_s11 = inlined_call_operand.vmem [shape: f32[64,2], index: 11, kind: input, shape index: {}]   ;;  %s5392_s12 = inlined_call_operand.vmem [shape: f32[1,2], index: 12, kind: input, shape index: {}]   ;;  %s5393_s13 = inlined_call_operand.vmem [shape: f32[1,2], index: 13, kind: input, shape index: {}]   ;;  %s5394_s14 = inlined_call_operand.vmem [shape: f32[1,2], index: 14, kind: input, shape index: {}]   ;;  %s5395_s15 = inlined_call_operand.vmem [shape: f32[2,2], index: 15, kind: input, shape index: {}]   ;;  %s5396_s16 = inlined_call_operand.hbm [shape: f32[1,1], index: 16, kind: output, shape index: {}]  }
   0x1   :  { %5397 = sst [smem:[#allocation19_spill]] %s5380_s0 }
   0x2   :  { %21 = vsyncpa [#allocation7], 0 }
   0x3   :  { %22 = vsyncpa [#allocation10], 0 }
   0x4   :  { %23 = vsyncpa [#allocation13], 0  ;;  %s54_s23 = sshll.u32 %s5387_s7, 4  ;;  %s55_s23 = int_to_ptr.hbm [resolvable:$true] %s54_s23 }
   0x5   :  { %24 = vsyncpa [#allocation8], 0  ;;  %s4173_s24 = smov [#allocation9]   ;;  %s5398_s28 = sld [smem:[#allocation19_spill]] }
   0x6   :  { %s56_s25 = sshll.u32 %s4173_s24, 4  ;;  %s4174_s30 = smov 256   ;;  %s57_s25 = int_to_ptr.vmem [resolvable:$true] %s56_s25 }
   0x7   :  { %s4175_s0 = smov 16   ;;  %s4176_s17 = smov [#allocation6]  }
   0x8   :  { %62 = dma.hbm_to_vmem [thread:$0]  %s55_s23, 2048, %s57_s25, [#allocation10], %s4174_s30, %s4174_s30, %s4175_s0  }
   0x9   :  { %s31_s18 = sshll.u32 %s4176_s17, 4  ;;  %s4177_s19 = smov 32   ;;  %s32_s18 = int_to_ptr.vmem [resolvable:$true] %s31_s18 }
   0xa   :  { %s4178_s20 = smov 2   ;;  %s67_s22 = sshll.u32 %s5388_s8, 4  ;;  %s68_s22 = int_to_ptr.hbm [resolvable:$true] %s67_s22 }
   0xb   :  { %s29_s29 = sshll.u32 %s5398_s28, 4  ;;  %s4179_s24 = smov [#allocation11]   ;;  %s30_s29 = int_to_ptr.hbm [resolvable:$true] %s29_s29 }
   0xc   :  { %37 = dma.hbm_to_vmem [thread:$0]  %s30_s29, 256, %s32_s18, [#allocation7], %s4177_s19, %s4177_s19, %s4178_s20  }
   0xd   :  { %s69_s26 = sshll.u32 %s4179_s24, 4  ;;  %s80_s23 = sshll.u32 %s5389_s9, 4  ;;  %s70_s26 = int_to_ptr.vmem [resolvable:$true] %s69_s26  ;;  %s81_s23 = int_to_ptr.hbm [resolvable:$true] %s80_s23 }
   0xe   :  { %s4180_s25 = smov 128   ;;  %s4181_s30 = smov 8  }
   0xf   :  { %75 = dma.hbm_to_vmem [thread:$0]  %s68_s22, 512, %s70_s26, [#allocation10], %s4180_s25, %s4180_s25, %s4181_s30  }
  0x10   :  { %s4182_s0 = smov [#allocation12]  }
  0x11   :  { %s82_s17 = sshll.u32 %s4182_s0, 4  ;;  %s83_s17 = int_to_ptr.vmem [resolvable:$true] %s82_s17 }
  0x12   :  { %88 = dma.hbm_to_vmem [thread:$0]  %s81_s23, 512, %s83_s17, [#allocation13], %s4180_s25, %s4180_s25, %s4181_s30  }
  0x13   :  { %4165 = dma.done.wait [#allocation7], 256  }
  0x14   :  { %4166 = vsyncadd [#allocation7], 4294967040 }
  0x15   :  { %4167 = dma.done.wait [#allocation10], 2560  }
  0x16   :  { %4168 = vsyncadd [#allocation10], 4294964736 }
  0x17   :  { %4169 = dma.done.wait [#allocation13], 512  }
  0x18   :  { %4170 = vsyncadd [#allocation13], 4294966784  ;;  %v120_v0 = vld [vmem:[%s5383_s3 + $0x18] sm:$0xff]  ;;  %v118_v1 = vld [vmem:[%s5383_s3 + $0x8] sm:$0xff]  ;;  %vm168_vm0 = vcmask 130048   ;;  %v4183_v22 = vmov 0.0  }
  0x19   :  { %v134_v2 = vld [vmem:[#allocation6 + $0x8] sm:$0x3]  ;;  %3657 = vmatpush.msra.mxu3 %v120_v0  ;;  %v135_v3 = vld [vmem:[#allocation6 + $0xa] sm:$0x3]  ;;  %v136_v4 = vld [vmem:[#allocation6 + $0xc] sm:$0x3]  ;;  %210 = vmatpush.msra.mxu1 %v120_v0 }
  0x1a   :  { %v137_v5 = vld [vmem:[#allocation6 + $0xe] sm:$0x3]  ;;  %159 = vst [vmem:[#allocation1 + $0x20] ss:$4 sm:$0xff] %v134_v2  ;;  %v4296_v6 = vld [vmem:[%s5385_s5 + $0x18] sm:$0xff]  ;;  %v117_v9 = vld [vmem:[%s5383_s3] sm:$0xff] }
  0x1b   :  { %v119_v7 = vld [vmem:[%s5383_s3 + $0x10] sm:$0xff]  ;;  %3658 = vmatpush.msra.mxu3 %v118_v1  ;;  %161 = vst [vmem:[#allocation1 + $0x21] ss:$4 sm:$0xff] %v135_v3  ;;  %v4312_v10 = vld [vmem:[%s5384_s4 + $0x18] sm:$0xff]  ;;  %v4318_v11 = vld [vmem:[%s5385_s5 + $0x8] sm:$0xff]  ;;  %211 = vmatpush.msra.mxu1 %v118_v1  ;;  %vm219_vm9 = vcmask 261120  }
  0x1c   :  { %3655 = vmatpush.msra.mxu2 %v119_v7  ;;  %v4304_v8 = vld [vmem:[%s5385_s5 + $0x10] sm:$0xff]  ;;  %163 = vst [vmem:[#allocation1 + $0x22] ss:$4 sm:$0xff] %v136_v4  ;;  %187 = vmatpush.msra.mxu0 %v119_v7  ;;  %v4323_v12 = vld [vmem:[%s5385_s5] sm:$0xff]  ;;  %v130_v14 = vld [vmem:[#allocation6] sm:$0x3] }
  0x1d   :  { %256 = vmatpush.msrb.mxu3 %v4296_v6  ;;  %165 = vst [vmem:[#allocation1 + $0x23] ss:$4 sm:$0xff] %v137_v5  ;;  %v4328_v13 = vld [vmem:[%s5384_s4 + $0x10] sm:$0xff]  ;;  %v4335_v15 = vld [vmem:[%s5384_s4 + $0x8] sm:$0xff]  ;;  %550 = vmatpush.msrb.mxu1 %v4296_v6  ;;  %v4343_v19 = vld [vmem:[%s5384_s4] sm:$0xff]  ;;  %vm346_vm10 = vcmask 254976  }
  0x1e   :  { %3656 = vmatpush.msra.mxu2 %v117_v9  ;;  %v131_v16 = vld [vmem:[#allocation6 + $0x2] sm:$0x3]  ;;  %v132_v17 = vld [vmem:[#allocation6 + $0x4] sm:$0x3]  ;;  %188 = vmatpush.msra.mxu0 %v117_v9  ;;  %v133_v18 = vld [vmem:[#allocation6 + $0x6] sm:$0x3] }
  0x1f   :  { %257 = vmatpush.msrb.mxu3 %v4304_v8  ;;  %151 = vst [vmem:[#allocation1] ss:$4 sm:$0xff] %v130_v14  ;;  %551 = vmatpush.msrb.mxu1 %v4304_v8  ;;  %v4388_v23 = vld [vmem:[%s5386_s6] sm:$0x3]  ;;  %s4184_s6 = smov 64   ;;  %s3550_s23 = sshll.u32 %s5396_s16, 4  ;;  %s3551_s23 = int_to_ptr.hbm [resolvable:$true] %s3550_s23 }
  0x20   :  { %235 = vmatpush.msrb.mxu2 %v4312_v10  ;;  %153 = vst [vmem:[#allocation1 + $0x1] ss:$4 sm:$0xff] %v131_v16  ;;  %521 = vmatpush.msrb.mxu0 %v4312_v10  ;;  %v139_v24 = vperm.slane %v4388_v23, 0  ;;  %v140_v28 = vperm.slane %v4388_v23, 1 }
  0x21   :  { %258 = vmatpush.msrb.mxu3 %v4318_v11  ;;  %155 = vst [vmem:[#allocation1 + $0x2] ss:$4 sm:$0xff] %v132_v17  ;;  %552 = vmatpush.msrb.mxu1 %v4318_v11 }
  0x22   :  { %236 = vmatpush.msrb.mxu2 %v4328_v13  ;;  %157 = vst [vmem:[#allocation1 + $0x3] ss:$4 sm:$0xff] %v133_v18  ;;  %522 = vmatpush.msrb.mxu0 %v4328_v13 }
  0x23   :  { %259 = vmatpush.msrb.mxu3 %v4323_v12  ;;  %553 = vmatpush.msrb.mxu1 %v4323_v12 }
  0x24   :  { %237 = vmatpush.msrb.mxu2 %v4335_v15  ;;  %v167_v20 = vld.sshfl [vmem:[#allocation1 + $0x20] sm:$0xff pattern:$0x73625140]  ;;  %523 = vmatpush.msrb.mxu0 %v4335_v15 }
  0x25   :  { %3565 = vmatmul.msk.f32.vlgmr.msra.gmra.mxu3 %vm168_vm0, %v167_v20  ;;  %3563 = vmatmul.msk.f32.vlgmr.msra.gmra.mxu2 %vm168_vm0, %v167_v20 }
  0x26   :  { %238 = vmatpush.msrb.mxu2 %v4343_v19  ;;  %398 = vmatpush.msra.mxu3 %v4296_v6 }
  0x27   :  { %524 = vmatpush.msrb.mxu0 %v4343_v19 }
  0x28   :  { %369 = vmatpush.msra.mxu2 %v4312_v10  ;;  %399 = vmatpush.msra.mxu3 %v4304_v8 }
  0x29   :  { %v166_v21 = vld.sshfl [vmem:[#allocation1] sm:$0xff pattern:$0x73625140] }
  0x2a   :  { %370 = vmatpush.msra.mxu2 %v4328_v13  ;;  %3562 = vmatmul.msk.f32.vlgmr.msra.gmra.mxu0 %vm168_vm0, %v166_v21 }
  0x2b   :  { %400 = vmatpush.msra.mxu3 %v4318_v11  ;;  %3564 = vmatmul.msk.f32.vlgmr.msra.gmra.mxu1 %vm168_vm0, %v166_v21 }
  0x2c   :  { %371 = vmatpush.msra.mxu2 %v4335_v15  ;;  %841 = vmatpush.msra.mxu1 %v4296_v6 }
  0x2d   :  { %401 = vmatpush.msra.mxu3 %v4323_v12  ;;  %239 = vmatmul.f32.vlgmr.msrb.gmra.mxu2 %v4183_v22 }
  0x2e   :  { %260 = vmatmul.f32.vlgmr.msrb.gmra.mxu3 %v4183_v22  ;;  %372 = vmatpush.msra.mxu2 %v4343_v19 }
  0x2f   :  { %700 = vmatpush.msrb.mxu3 %v4296_v6  ;;  %842 = vmatpush.msra.mxu1 %v4304_v8 }
  0x30   :  { %671 = vmatpush.msrb.mxu2 %v4312_v10  ;;  %818 = vmatpush.msra.mxu0 %v4312_v10 }
  0x31   :  { %701 = vmatpush.msrb.mxu3 %v4304_v8  ;;  %843 = vmatpush.msra.mxu1 %v4318_v11 }
  0x32   :  { %672 = vmatpush.msrb.mxu2 %v4328_v13  ;;  %819 = vmatpush.msra.mxu0 %v4328_v13 }
  0x33   :  { %702 = vmatpush.msrb.mxu3 %v4318_v11  ;;  %844 = vmatpush.msra.mxu1 %v4323_v12 }
  0x34   :  { %673 = vmatpush.msrb.mxu2 %v4335_v15  ;;  %820 = vmatpush.msra.mxu0 %v4335_v15 }
  0x35   :  { %703 = vmatpush.msrb.mxu3 %v4323_v12 }
  0x36   :  { %674 = vmatpush.msrb.mxu2 %v4343_v19  ;;  %821 = vmatpush.msra.mxu0 %v4343_v19 }
  0xa7   :  { %v190_v32 = vpop.f32.mrf.mxu0 }
  0xa8   :  { %v216_v25 = vpop.f32.mrf.mxu3  ;;  %v193_v26 = vpop.f32.mrf.mxu2  ;;  %v4399_v34 = vadd.f32 %v190_v32, %v139_v24 }
  0xa9   :  { %v4391_v27 = vadd.f32 %v193_v26, %v139_v24  ;;  %v4396_v30 = vadd.f32 %v216_v25, %v140_v28 }
  0xb0   :  { %v240_v35 = vpop.f32.mrf.mxu2 }
  0xb1   :  { %v261_v29 = vpop.f32.mrf.mxu3  ;;  %v243_v36 = vadd.f32 %v240_v35, %v4399_v34 }
  0xb2   :  { %v265_v31 = vrot.slane %v261_v29, 2 }
  0xb3   :  { %v3566_v40 = vmul.f32 -1.442695, %v243_v36 }
  0xb4   :  { %v267_v33 = vadd.f32 %v265_v31, %v4396_v30 }
  0xb6   :  { %3746 = vtanh.f32 %v267_v33  ;;  %v3567_v39 = vmul.f32 -1.442695, %v267_v33 }
  0xb7   :  { %3748 = vtanh.f32 %v243_v36 }
  0xb8   :  { %3750 = vpow2.f32 %v3567_v39 }
  0xb9   :  { %3752 = vpow2.f32 %v3566_v40 }
  0xbc   :  { %v3747_v37 = vpop.eup %3746 }
  0xbd   :  { %327 = vrot.lane.b32.xlu0 %v3747_v37, %s4184_s6  ;;  %v3749_v38 = vpop.eup %3748 }
  0xbe   :  { %v3751_v41 = vpop.eup %3750 }
  0xbf   :  { %v291_v42 = vadd.f32 1.0, %v3751_v41  ;;  %v3753_v43 = vpop.eup %3752 }
  0xc0   :  { %v271_v44 = vadd.f32 1.0, %v3753_v43 }
  0xc1   :  { %3754 = vrcp.f32 %v291_v42  ;;  %v303_v53 = vand.u32 2147483648, %v291_v42  ;;  %vm297_vm2 = vweird.f32 %v291_v42  ;;  %v301_v54 = vand.u32 2147483647, %v291_v42 }
  0xc2   :  { %3756 = vrcp.f32 %v271_v44  ;;  %vm277_vm5 = vweird.f32 %v271_v44  ;;  %v283_v60 = vand.u32 2147483648, %v271_v44  ;;  %v281_v63 = vand.u32 2147483647, %v271_v44 }
  0xc3   :  { %v304_v57 = vor.u32 1.1754944e-38, %v303_v53  ;;  %vm302_vm4 = vcmp.eq.f32.partialorder %v301_v54, 8.507059e+37 }
  0xc4   :  { %v284_v0 = vor.u32 1.1754944e-38, %v283_v60  ;;  %vm282_vm8 = vcmp.eq.f32.partialorder %v281_v63, 8.507059e+37 }
  0xc5   :  { %310 = vrot.lane.b32.xlu0 %v3749_v38, %s4184_s6 }
  0xc7   :  { %v3755_v45 = vpop.eup %3754 }
  0xc8   :  { %v293_v46 = vmul.f32 %v3755_v45, %v291_v42  ;;  %v3757_v48 = vpop.eup %3756  ;;  %vm298_vm1 = vweird.f32 %v3755_v45 }
  0xc9   :  { %v273_v50 = vmul.f32 %v3757_v48, %v271_v44  ;;  %vm299_vm3 = vmor %vm297_vm2, %vm298_vm1  ;;  %vm278_vm6 = vweird.f32 %v3757_v48 }
  0xca   :  { %v294_v47 = vsub.f32 1.0, %v293_v46  ;;  %vm279_vm7 = vmor %vm277_vm5, %vm278_vm6 }
  0xcb   :  { %v274_v52 = vsub.f32 1.0, %v273_v50 }
  0xcc   :  { %v295_v49 = vmul.f32 %v3755_v45, %v294_v47 }
  0xcd   :  { %v275_v56 = vmul.f32 %v3757_v48, %v274_v52 }
  0xce   :  { %v296_v51 = vadd.f32 %v3755_v45, %v295_v49 }
  0xcf   :  { %v276_v62 = vadd.f32 %v3757_v48, %v275_v56 }
  0xd0   :  { %v300_v55 = vsel %vm299_vm3, %v3755_v45, %v296_v51 }
  0xd1   :  { %v305_v59 = vsel %vm302_vm4, %v304_v57, %v300_v55  ;;  %v280_v1 = vsel %vm279_vm7, %v3757_v48, %v276_v62 }
  0xd2   :  { %v285_v3 = vsel %vm282_vm8, %v284_v0, %v280_v1  ;;  %v325_v5 = vmul.f32 0.0, %v305_v59 }
  0xd3   :  { %v308_v14 = vmul.f32 0.0, %v285_v3 }
 0x12f   :  { %v328_v58 = vpop.permute.xlu0 %327 }
 0x130   :  { %v330_v61 = vmul.f32 %v328_v58, %v305_v59 }
 0x132   :  { %332 = vrot.lane.b32.xlu1 %v330_v61, %s4177_s19 }
 0x137   :  { %v311_v2 = vpop.permute.xlu0 %310 }
 0x138   :  { %v313_v4 = vmul.f32 %v311_v2, %v285_v3 }
 0x13a   :  { %315 = vrot.lane.b32.xlu1 %v313_v4, %s4177_s19 }
 0x1a4   :  { %v333_v7 = vpop.permute.xlu1 %332 }
 0x1a5   :  { %v4406_v9 = vadd.f32 %v333_v7, %v325_v5 }
 0x1a7   :  { %3758 = vtanh.f32 %v4406_v9 }
 0x1ac   :  { %v316_v16 = vpop.permute.xlu1 %315 }
 0x1ad   :  { %v3759_v17 = vpop.eup %3758  ;;  %v4409_v18 = vadd.f32 %v316_v16, %v308_v14  ;;  %v471_v16 = vrot.slane %v4406_v9, 2 }
 0x1ae   :  { %338 = vrot.lane.b32.xlu2 %v3759_v17, %s4184_s6 }
 0x1af   :  { %3760 = vtanh.f32 %v4409_v18 }
 0x1b5   :  { %v3761_v20 = vpop.eup %3760 }
 0x1b6   :  { %321 = vrot.lane.b32.xlu2 %v3761_v20, %s4184_s6 }
 0x208   :  { %v339_v21 = vpop.permute.xlu2 %338 }
 0x209   :  { %v4414_v24 = vmul.f32 %v339_v21, %v305_v59 }
 0x20b   :  { %v381_v25 = vrot.slane %v4414_v24, 6 }
 0x20d   :  { %382 = vrot.lane.b32.xlu0 %v381_v25, %s4177_s19  ;;  %v451_v25 = vrot.slane %v4409_v18, 6 }
 0x210   :  { %v322_v26 = vpop.permute.xlu2 %321 }
 0x211   :  { %v324_v29 = vmul.f32 %v322_v26, %v285_v3 }
 0x213   :  { %343 = vrot.lane.b32.xlu1 %v324_v29, %s4177_s19 }
 0x27f   :  { %v383_v31 = vpop.permute.xlu0 %382 }
 0x280   :  { %3569 = vmatmul.msk.f32.vlgmr.msra.gmra.mxu3 %vm219_vm9, %v383_v31 }
 0x281   :  { %988 = vmatpush.msra.mxu3 %v4296_v6 }
 0x283   :  { %989 = vmatpush.msra.mxu3 %v4304_v8 }
 0x285   :  { %v344_v32 = vpop.permute.xlu1 %343  ;;  %990 = vmatpush.msra.mxu3 %v4318_v11 }
 0x286   :  { %347 = vst.msk [vmem:[#allocation2] sm:$0x3] %vm346_vm10, %v344_v32  ;;  %3568 = vmatmul.msk.f32.vlgmr.msra.gmra.mxu2 %vm219_vm9, %v344_v32 }
 0x287   :  { %991 = vmatpush.msra.mxu3 %v4323_v12  ;;  %959 = vmatpush.msra.mxu2 %v4312_v10 }
 0x289   :  { %960 = vmatpush.msra.mxu2 %v4328_v13 }
 0x28b   :  { %961 = vmatpush.msra.mxu2 %v4335_v15 }
 0x28d   :  { %962 = vmatpush.msra.mxu2 %v4343_v19 }
 0x303   :  { %v403_v33 = vpop.f32.mrf.mxu3 }
 0x304   :  { %v407_v35 = vrot.slane %v403_v33, 4 }
 0x306   :  { %v409_v36 = vadd.f32 %v407_v35, %v4396_v30 }
 0x308   :  { %3762 = vtanh.f32 %v409_v36  ;;  %v3571_v42 = vmul.f32 -1.442695, %v409_v36 }
 0x309   :  { %v374_v37 = vpop.f32.mrf.mxu2 }
 0x30a   :  { %v378_v38 = vrot.slane %v374_v37, 6 }
 0x30c   :  { %v380_v39 = vadd.f32 %v378_v38, %v4399_v34 }
 0x30e   :  { %v3763_v40 = vpop.eup %3762  ;;  %3764 = vtanh.f32 %v380_v39  ;;  %v3570_v47 = vmul.f32 -1.442695, %v380_v39 }
 0x30f   :  { %475 = vrot.lane.b32.xlu2 %v3763_v40, %s4184_s6  ;;  %3766 = vpow2.f32 %v3571_v42 }
 0x314   :  { %v3765_v41 = vpop.eup %3764 }
 0x315   :  { %455 = vrot.lane.b32.xlu0 %v3765_v41, %s4184_s6  ;;  %v3767_v43 = vpop.eup %3766  ;;  %v4464_v41 = vpop.f32.mrf.mxu1 }
 0x316   :  { %v433_v44 = vadd.f32 1.0, %v3767_v43 }
 0x318   :  { %3768 = vrcp.f32 %v433_v44  ;;  %v445_v51 = vand.u32 2147483648, %v433_v44  ;;  %vm439_vm12 = vweird.f32 %v433_v44  ;;  %v443_v53 = vand.u32 2147483647, %v433_v44 }
 0x319   :  { %3770 = vpow2.f32 %v3570_v47 }
 0x31a   :  { %v446_v56 = vor.u32 1.1754944e-38, %v445_v51  ;;  %vm444_vm14 = vcmp.eq.f32.partialorder %v443_v53, 8.507059e+37 }
 0x31e   :  { %v3769_v45 = vpop.eup %3768 }
 0x31f   :  { %v435_v46 = vmul.f32 %v3769_v45, %v433_v44  ;;  %vm440_vm11 = vweird.f32 %v3769_v45  ;;  %v3771_v52 = vpop.eup %3770 }
 0x320   :  { %vm441_vm13 = vmor %vm439_vm12, %vm440_vm11  ;;  %v413_v55 = vadd.f32 1.0, %v3771_v52 }
 0x321   :  { %v436_v48 = vsub.f32 1.0, %v435_v46 }
 0x322   :  { %3772 = vrcp.f32 %v413_v55  ;;  %v425_v1 = vand.u32 2147483648, %v413_v55  ;;  %vm419_vm0 = vweird.f32 %v413_v55  ;;  %v423_v2 = vand.u32 2147483647, %v413_v55 }
 0x323   :  { %v437_v49 = vmul.f32 %v3769_v45, %v436_v48 }
 0x324   :  { %v426_v4 = vor.u32 1.1754944e-38, %v425_v1  ;;  %vm424_vm2 = vcmp.eq.f32.partialorder %v423_v2, 8.507059e+37 }
 0x325   :  { %v438_v50 = vadd.f32 %v3769_v45, %v437_v49 }
 0x327   :  { %v442_v54 = vsel %vm441_vm13, %v3769_v45, %v438_v50 }
 0x328   :  { %v447_v58 = vsel %vm444_vm14, %v446_v56, %v442_v54  ;;  %v3773_v60 = vpop.eup %3772 }
 0x329   :  { %v415_v61 = vmul.f32 %v3773_v60, %v413_v55  ;;  %vm420_vm15 = vweird.f32 %v3773_v60  ;;  %v473_v17 = vmul.f32 %v471_v16, %v447_v58 }
 0x32a   :  { %vm421_vm1 = vmor %vm419_vm0, %vm420_vm15 }
 0x32b   :  { %v416_v62 = vsub.f32 1.0, %v415_v61 }
 0x32d   :  { %v417_v63 = vmul.f32 %v3773_v60, %v416_v62 }
 0x32f   :  { %v418_v0 = vadd.f32 %v3773_v60, %v417_v63 }
 0x331   :  { %v422_v3 = vsel %vm421_vm1, %v3773_v60, %v418_v0 }
 0x332   :  { %v427_v7 = vsel %vm424_vm2, %v426_v4, %v422_v3 }
 0x333   :  { %v453_v26 = vmul.f32 %v451_v25, %v427_v7 }
 0x369   :  { %v476_v57 = vpop.permute.xlu2 %475 }
 0x36a   :  { %v478_v59 = vmul.f32 %v476_v57, %v447_v58 }
 0x36c   :  { %480 = vrot.lane.b32.xlu1 %v478_v59, %s4177_s19 }
 0x387   :  { %v456_v5 = vpop.permute.xlu0 %455 }
 0x388   :  { %v458_v14 = vmul.f32 %v456_v5, %v427_v7 }
 0x38a   :  { %460 = vrot.lane.b32.xlu2 %v458_v14, %s4177_s19 }
 0x3de   :  { %v481_v20 = vpop.permute.xlu1 %480 }
 0x3df   :  { %v4437_v21 = vadd.f32 %v481_v20, %v473_v17 }
 0x3e1   :  { %3774 = vtanh.f32 %v4437_v21 }
 0x3e4   :  { %v461_v29 = vpop.permute.xlu2 %460 }
 0x3e5   :  { %v4441_v31 = vadd.f32 %v461_v29, %v453_v26 }
 0x3e7   :  { %v3775_v32 = vpop.eup %3774  ;;  %3776 = vtanh.f32 %v4441_v31 }
 0x3e8   :  { %486 = vrot.lane.b32.xlu0 %v3775_v32, %s4184_s6 }
 0x3ed   :  { %v3777_v33 = vpop.eup %3776 }
 0x3ee   :  { %466 = vrot.lane.b32.xlu1 %v3777_v33, %s4184_s6 }
 0x45a   :  { %v487_v9 = vpop.permute.xlu0 %486 }
 0x45b   :  { %v4446_v35 = vmul.f32 %v487_v9, %v447_v58  ;;  %v623_v9 = vrot.slane %v4437_v21, 2 }
 0x45d   :  { %v533_v36 = vrot.slane %v4446_v35, 4 }
 0x45f   :  { %534 = vrot.lane.b32.xlu2 %v533_v36, %s4177_s19 }
 0x460   :  { %v467_v18 = vpop.permute.xlu1 %466 }
 0x461   :  { %v4450_v37 = vmul.f32 %v467_v18, %v427_v7 }
 0x463   :  { %v504_v38 = vrot.slane %v4450_v37, 2 }
 0x465   :  { %505 = vrot.lane.b32.xlu0 %v504_v38, %s4177_s19 }
 0x4b9   :  { %v535_v39 = vpop.permute.xlu2 %534 }
 0x4ba   :  { %3573 = vmatmul.msk.f32.vlgmr.msrb.gmra.mxu1 %vm219_vm9, %v535_v39  ;;  %v603_v39 = vrot.slane %v4441_v31, 6 }
 0x4bb   :  { %1138 = vmatpush.msrb.mxu1 %v4296_v6 }
 0x4bd   :  { %1139 = vmatpush.msrb.mxu1 %v4304_v8 }
 0x4bf   :  { %1140 = vmatpush.msrb.mxu1 %v4318_v11 }
 0x4c1   :  { %1141 = vmatpush.msrb.mxu1 %v4323_v12 }
 0x4d7   :  { %v506_v40 = vpop.permute.xlu0 %505 }
 0x4d8   :  { %3572 = vmatmul.msk.f32.vlgmr.msrb.gmra.mxu0 %vm219_vm9, %v506_v40 }
 0x4d9   :  { %1109 = vmatpush.msrb.mxu0 %v4312_v10 }
 0x4db   :  { %1110 = vmatpush.msrb.mxu0 %v4328_v13 }
 0x4dd   :  { %1111 = vmatpush.msrb.mxu0 %v4335_v15 }
 0x4df   :  { %1112 = vmatpush.msrb.mxu0 %v4343_v19 }
 0x537   :  { %v555_v42 = vpop.f32.mrf.mxu1 }
 0x538   :  { %v559_v43 = vrot.slane %v555_v42, 6 }
 0x53a   :  { %v561_v44 = vadd.f32 %v559_v43, %v4396_v30 }
 0x53c   :  { %3778 = vtanh.f32 %v561_v44  ;;  %v3575_v50 = vmul.f32 -1.442695, %v561_v44 }
 0x542   :  { %v3779_v45 = vpop.eup %3778 }
 0x543   :  { %627 = vrot.lane.b32.xlu1 %v3779_v45, %s4184_s6 }
 0x555   :  { %v526_v46 = vpop.f32.mrf.mxu0 }
 0x556   :  { %v530_v47 = vrot.slane %v526_v46, 4 }
 0x558   :  { %v532_v48 = vadd.f32 %v530_v47, %v4399_v34 }
 0x55a   :  { %3780 = vtanh.f32 %v532_v48  ;;  %v3574_v51 = vmul.f32 -1.442695, %v532_v48 }
 0x55b   :  { %3782 = vpow2.f32 %v3575_v50 }
 0x55c   :  { %3784 = vpow2.f32 %v3574_v51 }
 0x560   :  { %v3781_v49 = vpop.eup %3780 }
 0x561   :  { %607 = vrot.lane.b32.xlu2 %v3781_v49, %s4184_s6  ;;  %v3783_v52 = vpop.eup %3782 }
 0x562   :  { %v585_v53 = vadd.f32 1.0, %v3783_v52  ;;  %v3785_v54 = vpop.eup %3784 }
 0x563   :  { %v565_v55 = vadd.f32 1.0, %v3785_v54 }
 0x564   :  { %3786 = vrcp.f32 %v585_v53  ;;  %v597_v0 = vand.u32 2147483648, %v585_v53  ;;  %vm591_vm4 = vweird.f32 %v585_v53  ;;  %v595_v1 = vand.u32 2147483647, %v585_v53 }
 0x565   :  { %3788 = vrcp.f32 %v565_v55  ;;  %v577_v16 = vand.u32 2147483648, %v565_v55  ;;  %vm571_vm8 = vweird.f32 %v565_v55  ;;  %v575_v20 = vand.u32 2147483647, %v565_v55 }
 0x566   :  { %v598_v4 = vor.u32 1.1754944e-38, %v597_v0  ;;  %vm596_vm6 = vcmp.eq.f32.partialorder %v595_v1, 8.507059e+37 }
 0x567   :  { %v578_v26 = vor.u32 1.1754944e-38, %v577_v16  ;;  %vm576_vm12 = vcmp.eq.f32.partialorder %v575_v20, 8.507059e+37 }
 0x56a   :  { %v3787_v56 = vpop.eup %3786 }
 0x56b   :  { %v587_v57 = vmul.f32 %v3787_v56, %v585_v53  ;;  %v3789_v58 = vpop.eup %3788  ;;  %vm592_vm3 = vweird.f32 %v3787_v56 }
 0x56c   :  { %v567_v60 = vmul.f32 %v3789_v58, %v565_v55  ;;  %vm593_vm5 = vmor %vm591_vm4, %vm592_vm3  ;;  %vm572_vm7 = vweird.f32 %v3789_v58 }
 0x56d   :  { %v588_v59 = vsub.f32 1.0, %v587_v57  ;;  %vm573_vm11 = vmor %vm571_vm8, %vm572_vm7 }
 0x56e   :  { %v568_v62 = vsub.f32 1.0, %v567_v60 }
 0x56f   :  { %v589_v61 = vmul.f32 %v3787_v56, %v588_v59 }
 0x570   :  { %v569_v2 = vmul.f32 %v3789_v58, %v568_v62 }
 0x571   :  { %v590_v63 = vadd.f32 %v3787_v56, %v589_v61 }
 0x572   :  { %v570_v5 = vadd.f32 %v3789_v58, %v569_v2 }
 0x573   :  { %v594_v3 = vsel %vm593_vm5, %v3787_v56, %v590_v63 }
 0x574   :  { %v599_v14 = vsel %vm596_vm6, %v598_v4, %v594_v3  ;;  %v574_v25 = vsel %vm573_vm11, %v3789_v58, %v570_v5 }
 0x575   :  { %v579_v32 = vsel %vm576_vm12, %v578_v26, %v574_v25  ;;  %v625_v36 = vmul.f32 %v623_v9, %v599_v14 }
 0x576   :  { %v605_v40 = vmul.f32 %v603_v39, %v579_v32 }
 0x5b5   :  { %v628_v7 = vpop.permute.xlu1 %627 }
 0x5b6   :  { %v630_v17 = vmul.f32 %v628_v7, %v599_v14 }
 0x5b8   :  { %632 = vrot.lane.b32.xlu0 %v630_v17, %s4177_s19 }
 0x5bb   :  { %v608_v29 = vpop.permute.xlu2 %607 }
 0x5bc   :  { %v610_v33 = vmul.f32 %v608_v29, %v579_v32 }
 0x5be   :  { %612 = vrot.lane.b32.xlu1 %v610_v33, %s4177_s19 }
 0x62a   :  { %v633_v18 = vpop.permute.xlu0 %632 }
 0x62b   :  { %v4473_v38 = vadd.f32 %v633_v18, %v625_v36 }
 0x62d   :  { %3790 = vtanh.f32 %v4473_v38  ;;  %v770_v33 = vrot.slane %v4473_v38, 2 }
 0x630   :  { %v613_v42 = vpop.permute.xlu1 %612 }
 0x631   :  { %v4477_v43 = vadd.f32 %v613_v42, %v605_v40 }
 0x633   :  { %v3791_v44 = vpop.eup %3790  ;;  %3792 = vtanh.f32 %v4477_v43  ;;  %v750_v40 = vrot.slane %v4477_v43, 6 }
 0x634   :  { %638 = vrot.lane.b32.xlu2 %v3791_v44, %s4184_s6 }
 0x639   :  { %v3793_v45 = vpop.eup %3792 }
 0x63a   :  { %618 = vrot.lane.b32.xlu0 %v3793_v45, %s4184_s6 }
 0x68e   :  { %v639_v21 = vpop.permute.xlu2 %638 }
 0x68f   :  { %v4482_v46 = vmul.f32 %v639_v21, %v599_v14 }
 0x691   :  { %v683_v47 = vrot.slane %v4482_v46, 2 }
 0x693   :  { %684 = vrot.lane.b32.xlu1 %v683_v47, %s4177_s19 }
 0x6ac   :  { %v619_v31 = vpop.permute.xlu0 %618 }
 0x6ad   :  { %v4486_v48 = vmul.f32 %v619_v31, %v579_v32 }
 0x6af   :  { %v654_v49 = vrot.slane %v4486_v48, 4 }
 0x6b1   :  { %655 = vrot.lane.b32.xlu2 %v654_v49, %s4177_s19 }
 0x705   :  { %v685_v50 = vpop.permute.xlu1 %684 }
 0x706   :  { %3577 = vmatmul.msk.f32.vlgmr.msrb.gmra.mxu3 %vm219_vm9, %v685_v50 }
 0x707   :  { %1288 = vmatpush.msrb.mxu3 %v4296_v6 }
 0x709   :  { %1289 = vmatpush.msrb.mxu3 %v4304_v8 }
 0x70b   :  { %v656_v51 = vpop.permute.xlu2 %655  ;;  %1290 = vmatpush.msrb.mxu3 %v4318_v11 }
 0x70c   :  { %3576 = vmatmul.msk.f32.vlgmr.msrb.gmra.mxu2 %vm219_vm9, %v656_v51 }
 0x70d   :  { %1291 = vmatpush.msrb.mxu3 %v4323_v12  ;;  %1259 = vmatpush.msrb.mxu2 %v4312_v10 }
 0x70f   :  { %1260 = vmatpush.msrb.mxu2 %v4328_v13 }
 0x711   :  { %1261 = vmatpush.msrb.mxu2 %v4335_v15 }
 0x713   :  { %1262 = vmatpush.msrb.mxu2 %v4343_v19 }
 0x789   :  { %v705_v52 = vpop.f32.mrf.mxu3 }
 0x78a   :  { %v708_v6 = vadd.f32 %v705_v52, %v4396_v30 }
 0x78c   :  { %3794 = vtanh.f32 %v708_v6  ;;  %v3579_v10 = vmul.f32 -1.442695, %v708_v6 }
 0x78f   :  { %v676_v8 = vpop.f32.mrf.mxu2 }
 0x790   :  { %v680_v53 = vrot.slane %v676_v8, 2  ;;  %v4527_v8 = vadd.f32 %v4464_v41, %v140_v28 }
 0x792   :  { %v3795_v54 = vpop.eup %3794  ;;  %v682_v11 = vadd.f32 %v680_v53, %v4399_v34 }
 0x793   :  { %774 = vrot.lane.b32.xlu0 %v3795_v54, %s4184_s6 }
 0x794   :  { %3796 = vtanh.f32 %v682_v11  ;;  %v3578_v13 = vmul.f32 -1.442695, %v682_v11 }
 0x795   :  { %3798 = vpow2.f32 %v3579_v10 }
 0x796   :  { %3800 = vpow2.f32 %v3578_v13 }
 0x79a   :  { %v3797_v12 = vpop.eup %3796 }
 0x79b   :  { %754 = vrot.lane.b32.xlu1 %v3797_v12, %s4184_s6  ;;  %v3799_v15 = vpop.eup %3798 }
 0x79c   :  { %v732_v19 = vadd.f32 1.0, %v3799_v15  ;;  %v3801_v30 = vpop.eup %3800 }
 0x79d   :  { %v712_v55 = vadd.f32 1.0, %v3801_v30 }
 0x79e   :  { %3802 = vrcp.f32 %v732_v19  ;;  %v744_v63 = vand.u32 2147483648, %v732_v19  ;;  %vm738_vm14 = vweird.f32 %v732_v19  ;;  %v742_v0 = vand.u32 2147483647, %v732_v19 }
 0x79f   :  { %3804 = vrcp.f32 %v712_v55  ;;  %v724_v16 = vand.u32 2147483648, %v712_v55  ;;  %vm718_vm2 = vweird.f32 %v712_v55  ;;  %v722_v17 = vand.u32 2147483647, %v712_v55 }
 0x7a0   :  { %v745_v3 = vor.u32 1.1754944e-38, %v744_v63  ;;  %vm743_vm0 = vcmp.eq.f32.partialorder %v742_v0, 8.507059e+37 }
 0x7a1   :  { %v725_v25 = vor.u32 1.1754944e-38, %v724_v16  ;;  %vm723_vm4 = vcmp.eq.f32.partialorder %v722_v17, 8.507059e+37 }
 0x7a4   :  { %v3803_v56 = vpop.eup %3802 }
 0x7a5   :  { %v734_v57 = vmul.f32 %v3803_v56, %v732_v19  ;;  %v3805_v34 = vpop.eup %3804  ;;  %vm739_vm13 = vweird.f32 %v3803_v56 }
 0x7a6   :  { %v714_v60 = vmul.f32 %v3805_v34, %v712_v55  ;;  %vm740_vm15 = vmor %vm738_vm14, %vm739_vm13  ;;  %vm719_vm1 = vweird.f32 %v3805_v34 }
 0x7a7   :  { %v735_v58 = vsub.f32 1.0, %v734_v57  ;;  %vm720_vm3 = vmor %vm718_vm2, %vm719_vm1 }
 0x7a8   :  { %v715_v62 = vsub.f32 1.0, %v714_v60 }
 0x7a9   :  { %v736_v59 = vmul.f32 %v3803_v56, %v735_v58 }
 0x7aa   :  { %v716_v2 = vmul.f32 %v3805_v34, %v715_v62 }
 0x7ab   :  { %v737_v61 = vadd.f32 %v3803_v56, %v736_v59 }
 0x7ac   :  { %v717_v14 = vadd.f32 %v3805_v34, %v716_v2 }
 0x7ad   :  { %v741_v1 = vsel %vm740_vm15, %v3803_v56, %v737_v61 }
 0x7ae   :  { %v746_v5 = vsel %vm743_vm0, %v745_v3, %v741_v1  ;;  %v721_v20 = vsel %vm720_vm3, %v3805_v34, %v717_v14 }
 0x7af   :  { %v726_v29 = vsel %vm723_vm4, %v725_v25, %v721_v20  ;;  %v772_v9 = vmul.f32 %v770_v33, %v746_v5 }
 0x7b0   :  { %v752_v42 = vmul.f32 %v750_v40, %v726_v29 }
 0x805   :  { %v775_v4 = vpop.permute.xlu0 %774 }
 0x806   :  { %v777_v7 = vmul.f32 %v775_v4, %v746_v5 }
 0x808   :  { %779 = vrot.lane.b32.xlu2 %v777_v7, %s4177_s19 }
 0x80d   :  { %v755_v26 = vpop.permute.xlu1 %754 }
 0x80e   :  { %v757_v32 = vmul.f32 %v755_v26, %v726_v29 }
 0x810   :  { %759 = vrot.lane.b32.xlu0 %v757_v32, %s4177_s19 }
 0x862   :  { %v780_v36 = vpop.permute.xlu2 %779 }
 0x863   :  { %v4507_v18 = vadd.f32 %v780_v36, %v772_v9 }
 0x865   :  { %3806 = vtanh.f32 %v4507_v18  ;;  %v914_v32 = vrot.slane %v4507_v18, 2 }
 0x86b   :  { %v3807_v39 = vpop.eup %3806 }
 0x86c   :  { %785 = vrot.lane.b32.xlu1 %v3807_v39, %s4184_s6 }
 0x882   :  { %v760_v44 = vpop.permute.xlu0 %759 }
 0x883   :  { %v4512_v45 = vadd.f32 %v760_v44, %v752_v42 }
 0x885   :  { %3808 = vtanh.f32 %v4512_v45  ;;  %v894_v39 = vrot.slane %v4512_v45, 6 }
 0x88b   :  { %v3809_v21 = vpop.eup %3808 }
 0x88c   :  { %765 = vrot.lane.b32.xlu2 %v3809_v21, %s4184_s6 }
 0x8de   :  { %v786_v38 = vpop.permute.xlu1 %785 }
 0x8df   :  { %v788_v47 = vmul.f32 %v786_v38, %v746_v5 }
 0x8e1   :  { %796 = vrot.lane.b32.xlu0 %v788_v47, %s4177_s19 }
 0x8e6   :  { %v766_v31 = vpop.permute.xlu2 %765 }
 0x8e7   :  { %v4517_v49 = vmul.f32 %v766_v31, %v726_v29 }
 0x8e9   :  { %v801_v50 = vrot.slane %v4517_v49, 6 }
 0x8eb   :  { %802 = vrot.lane.b32.xlu1 %v801_v50, %s4177_s19 }
 0x953   :  { %v797_v43 = vpop.permute.xlu0 %796 }
 0x954   :  { %800 = vst.msk [vmem:[#allocation3 + $0x8] sm:$0x3] %vm346_vm10, %v797_v43  ;;  %3581 = vmatmul.msk.f32.vlgmr.msra.gmra.mxu1 %vm219_vm9, %v797_v43 }
 0x95b   :  { %v1425_v51 = vld [vmem:[#allocation3 + $0x8] sm:$0x3] }
 0x95c   :  { %1445 = vst [vmem:[#allocation1 + $0x20] ss:$4 sm:$0xff] %v1425_v51 }
 0x95d   :  { %v803_v52 = vpop.permute.xlu1 %802 }
 0x95e   :  { %3580 = vmatmul.msk.f32.vlgmr.msra.gmra.mxu0 %vm219_vm9, %v803_v52 }
 0x9d1   :  { %v846_v6 = vpop.f32.mrf.mxu1 }
 0x9d2   :  { %v850_v53 = vrot.slane %v846_v6, 2 }
 0x9d4   :  { %v852_v54 = vadd.f32 %v850_v53, %v4527_v8 }
 0x9d6   :  { %3810 = vtanh.f32 %v852_v54  ;;  %v3583_v15 = vmul.f32 -1.442695, %v852_v54 }
 0x9db   :  { %v823_v11 = vpop.f32.mrf.mxu0 }
 0x9dc   :  { %v3811_v12 = vpop.eup %3810  ;;  %v826_v10 = vadd.f32 %v823_v11, %v4391_v27 }
 0x9dd   :  { %918 = vrot.lane.b32.xlu2 %v3811_v12, %s4184_s6 }
 0x9de   :  { %3812 = vtanh.f32 %v826_v10  ;;  %v3582_v55 = vmul.f32 -1.442695, %v826_v10 }
 0x9df   :  { %3814 = vpow2.f32 %v3583_v15 }
 0x9e4   :  { %v3813_v13 = vpop.eup %3812 }
 0x9e5   :  { %898 = vrot.lane.b32.xlu0 %v3813_v13, %s4184_s6  ;;  %v3815_v23 = vpop.eup %3814 }
 0x9e6   :  { %v876_v19 = vadd.f32 1.0, %v3815_v23 }
 0x9e8   :  { %3816 = vrcp.f32 %v876_v19  ;;  %v888_v58 = vand.u32 2147483648, %v876_v19  ;;  %vm882_vm6 = vweird.f32 %v876_v19  ;;  %v886_v34 = vand.u32 2147483647, %v876_v19 }
 0x9e9   :  { %3818 = vpow2.f32 %v3582_v55 }
 0x9ea   :  { %v889_v61 = vor.u32 1.1754944e-38, %v888_v58  ;;  %vm887_vm8 = vcmp.eq.f32.partialorder %v886_v34, 8.507059e+37 }
 0x9ee   :  { %v3817_v28 = vpop.eup %3816 }
 0x9ef   :  { %v878_v41 = vmul.f32 %v3817_v28, %v876_v19  ;;  %vm883_vm5 = vweird.f32 %v3817_v28  ;;  %v3819_v59 = vpop.eup %3818 }
 0x9f0   :  { %vm884_vm7 = vmor %vm882_vm6, %vm883_vm5  ;;  %v856_v62 = vadd.f32 1.0, %v3819_v59 }
 0x9f1   :  { %v879_v30 = vsub.f32 1.0, %v878_v41 }
 0x9f2   :  { %3820 = vrcp.f32 %v856_v62  ;;  %v868_v14 = vand.u32 2147483648, %v856_v62  ;;  %vm862_vm12 = vweird.f32 %v856_v62  ;;  %v866_v16 = vand.u32 2147483647, %v856_v62 }
 0x9f3   :  { %v880_v56 = vmul.f32 %v3817_v28, %v879_v30 }
 0x9f4   :  { %v869_v20 = vor.u32 1.1754944e-38, %v868_v14  ;;  %vm867_vm14 = vcmp.eq.f32.partialorder %v866_v16, 8.507059e+37 }
 0x9f5   :  { %v881_v57 = vadd.f32 %v3817_v28, %v880_v56 }
 0x9f7   :  { %v885_v60 = vsel %vm884_vm7, %v3817_v28, %v881_v57 }
 0x9f8   :  { %v890_v0 = vsel %vm887_vm8, %v889_v61, %v885_v60  ;;  %v3821_v2 = vpop.eup %3820 }
 0x9f9   :  { %v858_v3 = vmul.f32 %v3821_v2, %v856_v62  ;;  %vm863_vm11 = vweird.f32 %v3821_v2  ;;  %v916_v33 = vmul.f32 %v914_v32, %v890_v0 }
 0x9fa   :  { %vm864_vm13 = vmor %vm862_vm12, %vm863_vm11 }
 0x9fb   :  { %v859_v4 = vsub.f32 1.0, %v858_v3 }
 0x9fd   :  { %v860_v5 = vmul.f32 %v3821_v2, %v859_v4 }
 0x9ff   :  { %v861_v7 = vadd.f32 %v3821_v2, %v860_v5 }
 0xa01   :  { %v865_v17 = vsel %vm864_vm13, %v3821_v2, %v861_v7 }
 0xa02   :  { %v870_v26 = vsel %vm867_vm14, %v869_v20, %v865_v17 }
 0xa03   :  { %v896_v40 = vmul.f32 %v894_v39, %v870_v26 }
 0xa37   :  { %v919_v63 = vpop.permute.xlu2 %918 }
 0xa38   :  { %v921_v1 = vmul.f32 %v919_v63, %v890_v0 }
 0xa3a   :  { %923 = vrot.lane.b32.xlu1 %v921_v1, %s4177_s19 }
 0xa57   :  { %v899_v25 = vpop.permute.xlu0 %898 }
 0xa58   :  { %v901_v29 = vmul.f32 %v899_v25, %v870_v26 }
 0xa5a   :  { %903 = vrot.lane.b32.xlu2 %v901_v29, %s4177_s19 }
 0xaac   :  { %v924_v9 = vpop.permute.xlu1 %923 }
 0xaad   :  { %v4536_v36 = vadd.f32 %v924_v9, %v916_v33 }
 0xaaf   :  { %3822 = vtanh.f32 %v4536_v36  ;;  %v1061_v32 = vrot.slane %v4536_v36, 2 }
 0xab4   :  { %v904_v42 = vpop.permute.xlu2 %903 }
 0xab5   :  { %v3823_v44 = vpop.eup %3822  ;;  %v4540_v21 = vadd.f32 %v904_v42, %v896_v40 }
 0xab6   :  { %929 = vrot.lane.b32.xlu0 %v3823_v44, %s4184_s6 }
 0xab7   :  { %3824 = vtanh.f32 %v4540_v21  ;;  %v1041_v40 = vrot.slane %v4540_v21, 6 }
 0xabd   :  { %v3825_v38 = vpop.eup %3824 }
 0xabe   :  { %909 = vrot.lane.b32.xlu1 %v3825_v38, %s4184_s6 }
 0xb28   :  { %v930_v18 = vpop.permute.xlu0 %929 }
 0xb29   :  { %v4545_v47 = vmul.f32 %v930_v18, %v890_v0 }
 0xb2b   :  { %v971_v31 = vrot.slane %v4545_v47, 6 }
 0xb2d   :  { %972 = vrot.lane.b32.xlu2 %v971_v31, %s4177_s19 }
 0xb30   :  { %v910_v45 = vpop.permute.xlu1 %909 }
 0xb31   :  { %v912_v50 = vmul.f32 %v910_v45, %v870_v26 }
 0xb33   :  { %934 = vrot.lane.b32.xlu0 %v912_v50, %s4177_s19 }
 0xb87   :  { %v973_v43 = vpop.permute.xlu2 %972 }
 0xb88   :  { %3585 = vmatmul.msk.f32.vlgmr.msra.gmra.mxu3 %vm219_vm9, %v973_v43 }
 0xba5   :  { %v935_v51 = vpop.permute.xlu0 %934 }
 0xba6   :  { %938 = vst.msk [vmem:[#allocation2 + $0x8] sm:$0x3] %vm346_vm10, %v935_v51  ;;  %3584 = vmatmul.msk.f32.vlgmr.msra.gmra.mxu2 %vm219_vm9, %v935_v51 }
 0xc0b   :  { %v993_v52 = vpop.f32.mrf.mxu3 }
 0xc0c   :  { %v997_v6 = vrot.slane %v993_v52, 4 }
 0xc0e   :  { %v999_v53 = vadd.f32 %v997_v6, %v4527_v8 }
 0xc10   :  { %3826 = vtanh.f32 %v999_v53  ;;  %v3587_v15 = vmul.f32 -1.442695, %v999_v53 }
 0xc16   :  { %v3827_v54 = vpop.eup %3826 }
 0xc17   :  { %1065 = vrot.lane.b32.xlu1 %v3827_v54, %s4184_s6 }
 0xc29   :  { %v964_v11 = vpop.f32.mrf.mxu2 }
 0xc2a   :  { %v968_v12 = vrot.slane %v964_v11, 6 }
 0xc2c   :  { %v970_v10 = vadd.f32 %v968_v12, %v4391_v27 }
 0xc2e   :  { %3828 = vtanh.f32 %v970_v10  ;;  %v3586_v23 = vmul.f32 -1.442695, %v970_v10 }
 0xc2f   :  { %3830 = vpow2.f32 %v3587_v15 }
 0xc30   :  { %3832 = vpow2.f32 %v3586_v23 }
 0xc34   :  { %v3829_v13 = vpop.eup %3828 }
 0xc35   :  { %1045 = vrot.lane.b32.xlu2 %v3829_v13, %s4184_s6  ;;  %v3831_v19 = vpop.eup %3830 }
 0xc36   :  { %v1023_v28 = vadd.f32 1.0, %v3831_v19  ;;  %v3833_v41 = vpop.eup %3832 }
 0xc37   :  { %v1003_v30 = vadd.f32 1.0, %v3833_v41 }
 0xc38   :  { %3834 = vrcp.f32 %v1023_v28  ;;  %v1035_v62 = vand.u32 2147483648, %v1023_v28  ;;  %vm1029_vm0 = vweird.f32 %v1023_v28  ;;  %v1033_v63 = vand.u32 2147483647, %v1023_v28 }
 0xc39   :  { %3836 = vrcp.f32 %v1003_v30  ;;  %v1015_v7 = vand.u32 2147483648, %v1003_v30  ;;  %vm1009_vm4 = vweird.f32 %v1003_v30  ;;  %v1013_v16 = vand.u32 2147483647, %v1003_v30 }
 0xc3a   :  { %v1036_v2 = vor.u32 1.1754944e-38, %v1035_v62  ;;  %vm1034_vm2 = vcmp.eq.f32.partialorder %v1033_v63, 8.507059e+37 }
 0xc3b   :  { %v1016_v20 = vor.u32 1.1754944e-38, %v1015_v7  ;;  %vm1014_vm6 = vcmp.eq.f32.partialorder %v1013_v16, 8.507059e+37 }
 0xc3e   :  { %v3835_v55 = vpop.eup %3834 }
 0xc3f   :  { %v1025_v56 = vmul.f32 %v3835_v55, %v1023_v28  ;;  %v3837_v57 = vpop.eup %3836  ;;  %vm1030_vm15 = vweird.f32 %v3835_v55 }
 0xc40   :  { %v1005_v34 = vmul.f32 %v3837_v57, %v1003_v30  ;;  %vm1031_vm1 = vmor %vm1029_vm0, %vm1030_vm15  ;;  %vm1010_vm3 = vweird.f32 %v3837_v57 }
 0xc41   :  { %v1026_v58 = vsub.f32 1.0, %v1025_v56  ;;  %vm1011_vm5 = vmor %vm1009_vm4, %vm1010_vm3 }
 0xc42   :  { %v1006_v60 = vsub.f32 1.0, %v1005_v34 }
 0xc43   :  { %v1027_v59 = vmul.f32 %v3835_v55, %v1026_v58 }
 0xc44   :  { %v1007_v0 = vmul.f32 %v3837_v57, %v1006_v60 }
 0xc45   :  { %v1028_v61 = vadd.f32 %v3835_v55, %v1027_v59 }
 0xc46   :  { %v1008_v3 = vadd.f32 %v3837_v57, %v1007_v0 }
 0xc47   :  { %v1032_v1 = vsel %vm1031_vm1, %v3835_v55, %v1028_v61 }
 0xc48   :  { %v1037_v5 = vsel %vm1034_vm2, %v1036_v2, %v1032_v1  ;;  %v1012_v17 = vsel %vm1011_vm5, %v3837_v57, %v1008_v3 }
 0xc49   :  { %v1017_v26 = vsel %vm1014_vm6, %v1016_v20, %v1012_v17  ;;  %v1063_v33 = vmul.f32 %v1061_v32, %v1037_v5 }
 0xc4a   :  { %v1043_v42 = vmul.f32 %v1041_v40, %v1017_v26 }
 0xc89   :  { %v1066_v4 = vpop.permute.xlu1 %1065 }
 0xc8a   :  { %v1068_v14 = vmul.f32 %v1066_v4, %v1037_v5 }
 0xc8c   :  { %1070 = vrot.lane.b32.xlu0 %v1068_v14, %s4177_s19 }
 0xc8f   :  { %v1046_v25 = vpop.permute.xlu2 %1045 }
 0xc90   :  { %v1048_v29 = vmul.f32 %v1046_v25, %v1017_v26 }
 0xc92   :  { %1050 = vrot.lane.b32.xlu1 %v1048_v29, %s4177_s19 }
 0xcfe   :  { %v1071_v9 = vpop.permute.xlu0 %1070 }
 0xcff   :  { %v4560_v39 = vadd.f32 %v1071_v9, %v1063_v33 }
 0xd01   :  { %3838 = vtanh.f32 %v4560_v39  ;;  %v1211_v9 = vrot.slane %v4560_v39, 2 }
 0xd04   :  { %v1051_v44 = vpop.permute.xlu1 %1050 }
 0xd05   :  { %v4564_v38 = vadd.f32 %v1051_v44, %v1043_v42 }
 0xd07   :  { %v3839_v18 = vpop.eup %3838  ;;  %3840 = vtanh.f32 %v4564_v38 }
 0xd08   :  { %1076 = vrot.lane.b32.xlu2 %v3839_v18, %s4184_s6 }
 0xd0d   :  { %v3841_v31 = vpop.eup %3840 }
 0xd0e   :  { %1056 = vrot.lane.b32.xlu0 %v3841_v31, %s4184_s6  ;;  %v1191_v31 = vrot.slane %v4564_v38, 6 }
 0xd62   :  { %v1077_v36 = vpop.permute.xlu2 %1076 }
 0xd63   :  { %v4569_v45 = vmul.f32 %v1077_v36, %v1037_v5 }
 0xd65   :  { %v1121_v50 = vrot.slane %v4569_v45, 4 }
 0xd67   :  { %1122 = vrot.lane.b32.xlu1 %v1121_v50, %s4177_s19 }
 0xd80   :  { %v1057_v21 = vpop.permute.xlu0 %1056 }
 0xd81   :  { %v4573_v43 = vmul.f32 %v1057_v21, %v1017_v26 }
 0xd83   :  { %v1092_v51 = vrot.slane %v4573_v43, 2 }
 0xd85   :  { %1093 = vrot.lane.b32.xlu2 %v1092_v51, %s4177_s19 }
 0xdd9   :  { %v1123_v52 = vpop.permute.xlu1 %1122 }
 0xdda   :  { %3589 = vmatmul.msk.f32.vlgmr.msrb.gmra.mxu1 %vm219_vm9, %v1123_v52 }
 0xddf   :  { %v1094_v6 = vpop.permute.xlu2 %1093 }
 0xde0   :  { %3588 = vmatmul.msk.f32.vlgmr.msrb.gmra.mxu0 %vm219_vm9, %v1094_v6 }
 0xe57   :  { %v1143_v53 = vpop.f32.mrf.mxu1 }
 0xe58   :  { %v1147_v54 = vrot.slane %v1143_v53, 6 }
 0xe5a   :  { %v1149_v11 = vadd.f32 %v1147_v54, %v4527_v8 }
 0xe5c   :  { %3842 = vtanh.f32 %v1149_v11  ;;  %v3591_v19 = vmul.f32 -1.442695, %v1149_v11 }
 0xe5d   :  { %v1114_v12 = vpop.f32.mrf.mxu0 }
 0xe5e   :  { %v1118_v10 = vrot.slane %v1114_v12, 4 }
 0xe60   :  { %v1120_v13 = vadd.f32 %v1118_v10, %v4391_v27 }
 0xe62   :  { %v3843_v15 = vpop.eup %3842  ;;  %3844 = vtanh.f32 %v1120_v13  ;;  %v3590_v28 = vmul.f32 -1.442695, %v1120_v13 }
 0xe63   :  { %1215 = vrot.lane.b32.xlu0 %v3843_v15, %s4184_s6  ;;  %3846 = vpow2.f32 %v3591_v19 }
 0xe64   :  { %3848 = vpow2.f32 %v3590_v28 }
 0xe68   :  { %v3845_v23 = vpop.eup %3844 }
 0xe69   :  { %1195 = vrot.lane.b32.xlu1 %v3845_v23, %s4184_s6  ;;  %v3847_v41 = vpop.eup %3846 }
 0xe6a   :  { %v1173_v30 = vadd.f32 1.0, %v3847_v41  ;;  %v3849_v55 = vpop.eup %3848 }
 0xe6b   :  { %v1153_v56 = vadd.f32 1.0, %v3849_v55 }
 0xe6c   :  { %3850 = vrcp.f32 %v1173_v30  ;;  %v1185_v0 = vand.u32 2147483648, %v1173_v30  ;;  %vm1179_vm8 = vweird.f32 %v1173_v30  ;;  %v1183_v1 = vand.u32 2147483647, %v1173_v30 }
 0xe6d   :  { %3852 = vrcp.f32 %v1153_v56  ;;  %v1165_v16 = vand.u32 2147483648, %v1153_v56  ;;  %vm1159_vm14 = vweird.f32 %v1153_v56  ;;  %v1163_v20 = vand.u32 2147483647, %v1153_v56 }
 0xe6e   :  { %v1186_v4 = vor.u32 1.1754944e-38, %v1185_v0  ;;  %vm1184_vm12 = vcmp.eq.f32.partialorder %v1183_v1, 8.507059e+37 }
 0xe6f   :  { %v1166_v26 = vor.u32 1.1754944e-38, %v1165_v16  ;;  %vm1164_vm0 = vcmp.eq.f32.partialorder %v1163_v20, 8.507059e+37 }
 0xe72   :  { %v3851_v57 = vpop.eup %3850 }
 0xe73   :  { %v1175_v58 = vmul.f32 %v3851_v57, %v1173_v30  ;;  %v3853_v34 = vpop.eup %3852  ;;  %vm1180_vm7 = vweird.f32 %v3851_v57 }
 0xe74   :  { %v1155_v60 = vmul.f32 %v3853_v34, %v1153_v56  ;;  %vm1181_vm11 = vmor %vm1179_vm8, %vm1180_vm7  ;;  %vm1160_vm13 = vweird.f32 %v3853_v34 }
 0xe75   :  { %v1176_v59 = vsub.f32 1.0, %v1175_v58  ;;  %vm1161_vm15 = vmor %vm1159_vm14, %vm1160_vm13  ;;  %vm495_vm13 = vcmask 257026  }
 0xe76   :  { %v1156_v62 = vsub.f32 1.0, %v1155_v60 }
 0xe77   :  { %v1177_v61 = vmul.f32 %v3851_v57, %v1176_v59 }
 0xe78   :  { %v1157_v2 = vmul.f32 %v3853_v34, %v1156_v62 }
 0xe79   :  { %v1178_v63 = vadd.f32 %v3851_v57, %v1177_v61 }
 0xe7a   :  { %v1158_v5 = vadd.f32 %v3853_v34, %v1157_v2 }
 0xe7b   :  { %v1182_v3 = vsel %vm1181_vm11, %v3851_v57, %v1178_v63  ;;  %vm353_vm11 = vcmask 261126  }
 0xe7c   :  { %v1187_v14 = vsel %vm1184_vm12, %v1186_v4, %v1182_v3  ;;  %v1162_v25 = vsel %vm1161_vm15, %v3853_v34, %v1158_v5  ;;  %vm502_vm12 = vcmask 259076  }
 0xe7d   :  { %v1167_v32 = vsel %vm1164_vm0, %v1166_v26, %v1162_v25  ;;  %v1213_v40 = vmul.f32 %v1211_v9, %v1187_v14 }
 0xe7e   :  { %v1193_v36 = vmul.f32 %v1191_v31, %v1167_v32 }
 0xed5   :  { %v1216_v7 = vpop.permute.xlu0 %1215 }
 0xed6   :  { %v1218_v17 = vmul.f32 %v1216_v7, %v1187_v14 }
 0xed8   :  { %1220 = vrot.lane.b32.xlu2 %v1218_v17, %s4177_s19 }
 0xedb   :  { %v1196_v29 = vpop.permute.xlu1 %1195 }
 0xedc   :  { %v1198_v33 = vmul.f32 %v1196_v29, %v1167_v32 }
 0xede   :  { %1200 = vrot.lane.b32.xlu0 %v1198_v33, %s4177_s19 }
 0xf32   :  { %v1221_v42 = vpop.permute.xlu2 %1220 }
 0xf33   :  { %v4586_v44 = vadd.f32 %v1221_v42, %v1213_v40 }
 0xf35   :  { %3854 = vtanh.f32 %v4586_v44  ;;  %v1358_v40 = vrot.slane %v4586_v44, 2 }
 0xf3b   :  { %v3855_v18 = vpop.eup %3854 }
 0xf3c   :  { %1226 = vrot.lane.b32.xlu1 %v3855_v18, %s4184_s6 }
 0xf50   :  { %v1201_v50 = vpop.permute.xlu0 %1200 }
 0xf51   :  { %v4591_v21 = vadd.f32 %v1201_v50, %v1193_v36 }
 0xf53   :  { %3856 = vtanh.f32 %v4591_v21  ;;  %v1338_v36 = vrot.slane %v4591_v21, 6 }
 0xf59   :  { %v3857_v51 = vpop.eup %3856 }
 0xf5a   :  { %1206 = vrot.lane.b32.xlu2 %v3857_v51, %s4184_s6 }
 0xfae   :  { %v1227_v39 = vpop.permute.xlu1 %1226 }
 0xfaf   :  { %v4595_v52 = vmul.f32 %v1227_v39, %v1187_v14 }
 0xfb1   :  { %v1271_v6 = vrot.slane %v4595_v52, 2 }
 0xfb3   :  { %1272 = vrot.lane.b32.xlu0 %v1271_v6, %s4177_s19 }
 0xfb4   :  { %v1207_v53 = vpop.permute.xlu2 %1206 }
 0xfb5   :  { %v4599_v54 = vmul.f32 %v1207_v53, %v1167_v32 }
 0xfb7   :  { %v1242_v38 = vrot.slane %v4599_v54, 4 }
 0xfb9   :  { %1243 = vrot.lane.b32.xlu1 %v1242_v38, %s4177_s19 }
0x1025   :  { %v1273_v11 = vpop.permute.xlu0 %1272 }
0x1026   :  { %3593 = vmatmul.msk.f32.vlgmr.msrb.gmra.mxu3 %vm219_vm9, %v1273_v11 }
0x102b   :  { %v1244_v12 = vpop.permute.xlu1 %1243 }
0x102c   :  { %3592 = vmatmul.msk.f32.vlgmr.msrb.gmra.mxu2 %vm219_vm9, %v1244_v12 }
0x10a9   :  { %v1293_v10 = vpop.f32.mrf.mxu3 }
0x10aa   :  { %v1296_v13 = vadd.f32 %v1293_v10, %v4527_v8 }
0x10ac   :  { %3858 = vtanh.f32 %v1296_v13  ;;  %v3595_v30 = vmul.f32 -1.442695, %v1296_v13 }
0x10af   :  { %v1264_v15 = vpop.f32.mrf.mxu2 }
0x10b0   :  { %v1268_v23 = vrot.slane %v1264_v15, 2 }
0x10b2   :  { %v3859_v19 = vpop.eup %3858  ;;  %v1270_v28 = vadd.f32 %v1268_v23, %v4391_v27 }
0x10b3   :  { %1362 = vrot.lane.b32.xlu2 %v3859_v19, %s4184_s6 }
0x10b4   :  { %3860 = vtanh.f32 %v1270_v28  ;;  %v3594_v34 = vmul.f32 -1.442695, %v1270_v28 }
0x10b5   :  { %3862 = vpow2.f32 %v3595_v30  ;;  %v1417_v30 = vld [vmem:[#allocation2 + $0x8] sm:$0x3] }
0x10ba   :  { %v3861_v41 = vpop.eup %3860 }
0x10bb   :  { %1342 = vrot.lane.b32.xlu0 %v3861_v41, %s4184_s6  ;;  %v3863_v55 = vpop.eup %3862 }
0x10bc   :  { %v1320_v56 = vadd.f32 1.0, %v3863_v55  ;;  %v1402_v55 = vld [vmem:[#allocation9 + $0x70] sm:$0xff] }
0x10bd   :  { %1470 = vmatpush.msra.mxu0 %v1402_v55 }
0x10be   :  { %3864 = vrcp.f32 %v1320_v56  ;;  %v1332_v27 = vand.u32 2147483648, %v1320_v56  ;;  %vm1326_vm2 = vweird.f32 %v1320_v56  ;;  %v1330_v61 = vand.u32 2147483647, %v1320_v56 }
0x10bf   :  { %3866 = vpow2.f32 %v3594_v34  ;;  %v1399_v34 = vld [vmem:[#allocation9 + $0x58] sm:$0xff] }
0x10c0   :  { %v1333_v0 = vor.u32 1.1754944e-38, %v1332_v27  ;;  %vm1331_vm4 = vcmp.eq.f32.partialorder %v1330_v61, 8.507059e+37  ;;  %v1395_v27 = vld [vmem:[#allocation9 + $0x38] sm:$0xff]  ;;  %v1394_v61 = vld [vmem:[#allocation9 + $0x30] sm:$0xff] }
0x10c1   :  { %1568 = vmatpush.msra.mxu3 %v1395_v27  ;;  %1545 = vmatpush.msra.mxu2 %v1394_v61 }
0x10c4   :  { %v3865_v57 = vpop.eup %3864 }
0x10c5   :  { %v1322_v58 = vmul.f32 %v3865_v57, %v1320_v56  ;;  %vm1327_vm1 = vweird.f32 %v3865_v57  ;;  %v3867_v62 = vpop.eup %3866  ;;  %v1403_v56 = vld [vmem:[#allocation9 + $0x78] sm:$0xff] }
0x10c6   :  { %vm1328_vm3 = vmor %vm1326_vm2, %vm1327_vm1  ;;  %v1300_v1 = vadd.f32 1.0, %v3867_v62  ;;  %1493 = vmatpush.msra.mxu1 %v1403_v56  ;;  %v1393_v62 = vld [vmem:[#allocation9 + $0x28] sm:$0xff] }
0x10c7   :  { %v1323_v8 = vsub.f32 1.0, %v1322_v58  ;;  %v1401_v58 = vld [vmem:[#allocation9 + $0x68] sm:$0xff]  ;;  %1569 = vmatpush.msra.mxu3 %v1393_v62 }
0x10c8   :  { %3868 = vrcp.f32 %v1300_v1  ;;  %v1312_v20 = vand.u32 2147483648, %v1300_v1  ;;  %vm1306_vm6 = vweird.f32 %v1300_v1  ;;  %v1310_v25 = vand.u32 2147483647, %v1300_v1  ;;  %1494 = vmatpush.msra.mxu1 %v1401_v58 }
0x10c9   :  { %v1324_v59 = vmul.f32 %v3865_v57, %v1323_v8  ;;  %v1398_v8 = vld [vmem:[#allocation9 + $0x50] sm:$0xff] }
0x10ca   :  { %v1313_v29 = vor.u32 1.1754944e-38, %v1312_v20  ;;  %vm1311_vm8 = vcmp.eq.f32.partialorder %v1310_v25, 8.507059e+37  ;;  %1495 = vmatpush.msra.mxu1 %v1399_v34  ;;  %v4672_v20 = vld [vmem:[#allocation12 + $0x8] sm:$0xff]  ;;  %v4674_v25 = vld [vmem:[#allocation11] sm:$0xff] }
0x10cb   :  { %v1325_v60 = vadd.f32 %v3865_v57, %v1324_v59  ;;  %v1396_v59 = vld [vmem:[#allocation9 + $0x40] sm:$0xff] }
0x10cd   :  { %v1329_v63 = vsel %vm1328_vm3, %v3865_v57, %v1325_v60  ;;  %v1400_v57 = vld [vmem:[#allocation9 + $0x60] sm:$0xff]  ;;  %v1397_v60 = vld [vmem:[#allocation9 + $0x48] sm:$0xff] }
0x10ce   :  { %v1334_v3 = vsel %vm1331_vm4, %v1333_v0, %v1329_v63  ;;  %v3869_v5 = vpop.eup %3868  ;;  %1471 = vmatpush.msra.mxu0 %v1400_v57  ;;  %1496 = vmatpush.msra.mxu1 %v1397_v60  ;;  %v1392_v63 = vld [vmem:[#allocation9 + $0x20] sm:$0xff]  ;;  %v1391_v0 = vld [vmem:[#allocation9 + $0x18] sm:$0xff] }
0x10cf   :  { %v1302_v7 = vmul.f32 %v3869_v5, %v1300_v1  ;;  %vm1307_vm5 = vweird.f32 %v3869_v5  ;;  %v1360_v42 = vmul.f32 %v1358_v40, %v1334_v3  ;;  %1546 = vmatpush.msra.mxu2 %v1392_v63  ;;  %v1390_v1 = vld [vmem:[#allocation9 + $0x10] sm:$0xff]  ;;  %1570 = vmatpush.msra.mxu3 %v1391_v0 }
0x10d0   :  { %vm1308_vm7 = vmor %vm1306_vm6, %vm1307_vm5  ;;  %1472 = vmatpush.msra.mxu0 %v1398_v8 }
0x10d1   :  { %v1303_v14 = vsub.f32 1.0, %v1302_v7  ;;  %1547 = vmatpush.msra.mxu2 %v1390_v1  ;;  %v4655_v7 = vld [vmem:[#allocation12 + $0x10] sm:$0xff] }
0x10d2   :  { %1473 = vmatpush.msra.mxu0 %v1396_v59 }
0x10d3   :  { %v1304_v16 = vmul.f32 %v3869_v5, %v1303_v14  ;;  %v4659_v14 = vld [vmem:[#allocation11 + $0x10] sm:$0xff] }
0x10d5   :  { %v1305_v17 = vadd.f32 %v3869_v5, %v1304_v16  ;;  %v4661_v16 = vld [vmem:[#allocation11 + $0x8] sm:$0xff] }
0x10d7   :  { %v1309_v26 = vsel %vm1308_vm7, %v3869_v5, %v1305_v17  ;;  %v4653_v5 = vld [vmem:[#allocation11 + $0x18] sm:$0xff] }
0x10d8   :  { %v1314_v33 = vsel %vm1311_vm8, %v1313_v29, %v1309_v26  ;;  %1600 = vmatpush.msrb.mxu0 %v4653_v5  ;;  %v4676_v26 = vld [vmem:[#allocation12] sm:$0xff] }
0x10d9   :  { %v1340_v50 = vmul.f32 %v1338_v36, %v1314_v33 }
0x10da   :  { %1601 = vmatpush.msrb.mxu0 %v4659_v14 }
0x10dc   :  { %1602 = vmatpush.msrb.mxu0 %v4661_v16 }
0x10de   :  { %1603 = vmatpush.msrb.mxu0 %v4674_v25 }
0x110d   :  { %v1363_v2 = vpop.permute.xlu2 %1362 }
0x110e   :  { %v1365_v4 = vmul.f32 %v1363_v2, %v1334_v3  ;;  %v1389_v2 = vld [vmem:[#allocation9 + $0x8] sm:$0xff] }
0x110f   :  { %1571 = vmatpush.msra.mxu3 %v1389_v2 }
0x1110   :  { %1367 = vrot.lane.b32.xlu1 %v1365_v4, %s4177_s19  ;;  %v4651_v4 = vld [vmem:[#allocation12 + $0x18] sm:$0xff] }
0x1111   :  { %1621 = vmatpush.msrb.mxu1 %v4651_v4  ;;  %1761 = vmatpush.msrb.mxu3 %v4651_v4 }
0x1113   :  { %1622 = vmatpush.msrb.mxu1 %v4655_v7  ;;  %1762 = vmatpush.msrb.mxu3 %v4655_v7 }
0x1115   :  { %1623 = vmatpush.msrb.mxu1 %v4672_v20  ;;  %1763 = vmatpush.msrb.mxu3 %v4672_v20 }
0x1117   :  { %1624 = vmatpush.msrb.mxu1 %v4676_v26  ;;  %1764 = vmatpush.msrb.mxu3 %v4676_v26 }
0x112d   :  { %v1343_v32 = vpop.permute.xlu0 %1342 }
0x112e   :  { %v1345_v9 = vmul.f32 %v1343_v32, %v1314_v33 }
0x1130   :  { %1347 = vrot.lane.b32.xlu2 %v1345_v9, %s4177_s19 }
0x1138   :  { %940 = vrot.lane.b32.xlu2 %v4545_v47, %s4177_s19 }
0x1140   :  { %498 = vrot.lane.b32.xlu2 %v4446_v35, %s4177_s19 }
0x1182   :  { %v1368_v18 = vpop.permute.xlu1 %1367 }
0x1183   :  { %v1370_v31 = vadd.f32 %v1368_v18, %v1360_v42 }
0x1185   :  { %3870 = vtanh.f32 %v1370_v31 }
0x118a   :  { %v1348_v51 = vpop.permute.xlu2 %1347 }
0x118b   :  { %v3871_v39 = vpop.eup %3870  ;;  %v1350_v6 = vadd.f32 %v1348_v51, %v1340_v50 }
0x118c   :  { %1373 = vrot.lane.b32.xlu0 %v3871_v39, %s4184_s6 }
0x118d   :  { %3872 = vtanh.f32 %v1350_v6  ;;  %v4725_v6 = vld [vmem:[%s5390_s10] sm:$0x3] }
0x1192   :  { %v941_v47 = vpop.permute.xlu2 %940 }
0x1193   :  { %v3873_v53 = vpop.eup %3872  ;;  %944 = vst.msk [vmem:[#allocation3] sm:$0xc0] %vm353_vm11, %v941_v47 }
0x1194   :  { %1087 = vrot.lane.b32.xlu0 %v4569_v45, %s4177_s19  ;;  %1353 = vrot.lane.b32.xlu1 %v3873_v53, %s4184_s6 }
0x119a   :  { %v1424_v35 = vld [vmem:[#allocation3 + $0x6] sm:$0x3]  ;;  %v499_v44 = vpop.permute.xlu2 %498 }
0x119b   :  { %1443 = vst [vmem:[#allocation1 + $0x3] ss:$4 sm:$0xff] %v1424_v35  ;;  %v1581_v35 = vperm.slane %v4725_v6, 1 }
0x119c   :  { %503 = vst.msk [vmem:[#allocation3 + $0x8] sm:$0x30] %vm502_vm12, %v499_v44  ;;  %349 = vrot.lane.b32.xlu0 %v4414_v24, %s4177_s19  ;;  %1237 = vrot.lane.b32.xlu1 %v4595_v52, %s4177_s19 }
0x11a3   :  { %v1427_v21 = vld [vmem:[#allocation3 + $0xc] sm:$0x3] }
0x11a4   :  { %1449 = vst [vmem:[#allocation1 + $0x22] ss:$4 sm:$0xff] %v1427_v21  ;;  %643 = vrot.lane.b32.xlu0 %v4486_v48, %s4177_s19  ;;  %491 = vrot.lane.b32.xlu1 %v4450_v37, %s4177_s19 }
0x11ac   :  { %1081 = vrot.lane.b32.xlu0 %v4573_v43, %s4177_s19  ;;  %649 = vrot.lane.b32.xlu1 %v4482_v46, %s4177_s19 }
0x11b4   :  { %1231 = vrot.lane.b32.xlu1 %v4599_v54, %s4177_s19 }
0x11fe   :  { %v1374_v24 = vpop.permute.xlu0 %1373 }
0x11ff   :  { %v1376_v45 = vmul.f32 %v1374_v24, %v1334_v3  ;;  %v1388_v3 = vld [vmem:[#allocation9] sm:$0xff] }
0x1200   :  { %1548 = vmatpush.msra.mxu2 %v1388_v3 }
0x1201   :  { %1384 = vrot.lane.b32.xlu2 %v1376_v45, %s4177_s19 }
0x1202   :  { %1732 = vmatpush.msrb.mxu2 %v4653_v5 }
0x1204   :  { %1733 = vmatpush.msrb.mxu2 %v4659_v14 }
0x1206   :  { %v1088_v52 = vpop.permute.xlu0 %1087  ;;  %v1354_v38 = vpop.permute.xlu1 %1353  ;;  %1734 = vmatpush.msrb.mxu2 %v4661_v16 }
0x1207   :  { %1091 = vst.msk [vmem:[#allocation3] sm:$0x30] %vm502_vm12, %v1088_v52  ;;  %v1356_v46 = vmul.f32 %v1354_v38, %v1314_v33  ;;  %v1413_v33 = vld [vmem:[#allocation2] sm:$0x3] }
0x1208   :  { %1735 = vmatpush.msrb.mxu2 %v4674_v25 }
0x1209   :  { %790 = vrot.lane.b32.xlu2 %v4517_v49, %s4177_s19 }
0x120e   :  { %v1423_v37 = vld [vmem:[#allocation3 + $0x4] sm:$0x3]  ;;  %v350_v48 = vpop.permute.xlu0 %349  ;;  %v1238_v43 = vpop.permute.xlu1 %1237 }
0x120f   :  { %1441 = vst [vmem:[#allocation1 + $0x2] ss:$4 sm:$0xff] %v1423_v37 }
0x1210   :  { %354 = vst.msk [vmem:[#allocation3 + $0x8] sm:$0xc0] %vm353_vm11, %v350_v48 }
0x1211   :  { %1241 = vst.msk [vmem:[#allocation3] sm:$0xc] %vm495_vm13, %v1238_v43  ;;  %1378 = vrot.lane.b32.xlu2 %v1356_v46, %s4177_s19  ;;  %v1580_v43 = vperm.slane %v4725_v6, 0 }
0x1216   :  { %v644_v54 = vpop.permute.xlu0 %643  ;;  %v492_v11 = vpop.permute.xlu1 %491 }
0x1217   :  { %v1428_v12 = vld [vmem:[#allocation3 + $0xe] sm:$0x3]  ;;  %647 = vst.msk [vmem:[#allocation2] sm:$0x30] %vm502_vm12, %v644_v54 }
0x1218   :  { %1451 = vst [vmem:[#allocation1 + $0x23] ss:$4 sm:$0xff] %v1428_v12  ;;  %v1422_v10 = vld [vmem:[#allocation3 + $0x2] sm:$0x3] }
0x1219   :  { %1439 = vst [vmem:[#allocation1 + $0x1] ss:$4 sm:$0xff] %v1422_v10 }
0x121a   :  { %496 = vst.msk [vmem:[#allocation2] sm:$0xc] %vm495_vm13, %v492_v11 }
0x121e   :  { %v1082_v49 = vpop.permute.xlu0 %1081  ;;  %v650_v13 = vpop.permute.xlu1 %649  ;;  %v1415_v18 = vld [vmem:[#allocation2 + $0x4] sm:$0x3] }
0x121f   :  { %1085 = vst.msk [vmem:[#allocation2 + $0x8] sm:$0xc] %vm495_vm13, %v1082_v49 }
0x1220   :  { %653 = vst.msk [vmem:[#allocation3 + $0x8] sm:$0xc] %vm495_vm13, %v650_v13 }
0x1221   :  { %v1414_v40 = vld [vmem:[#allocation2 + $0x2] sm:$0x3] }
0x1226   :  { %v1232_v15 = vpop.permute.xlu1 %1231  ;;  %v1418_v19 = vld [vmem:[#allocation2 + $0xa] sm:$0x3] }
0x1227   :  { %v1426_v23 = vld [vmem:[#allocation3 + $0xa] sm:$0x3]  ;;  %1235 = vst.msk [vmem:[#allocation2 + $0x8] sm:$0x30] %vm502_vm12, %v1232_v15 }
0x1228   :  { %1447 = vst [vmem:[#allocation1 + $0x21] ss:$4 sm:$0xff] %v1426_v23 }
0x122e   :  { %v1419_v41 = vld [vmem:[#allocation2 + $0xc] sm:$0x3] }
0x122f   :  { %v4649_v28 = vld.sshfl [vmem:[#allocation1 + $0x20] sm:$0xff pattern:$0x73625140] }
0x1230   :  { %1522 = vst [vmem:[#allocation1 + $0x21] ss:$4 sm:$0xff] %v1418_v19 }
0x1231   :  { %1520 = vst [vmem:[#allocation1 + $0x20] ss:$4 sm:$0xff] %v1417_v30 }
0x1232   :  { %1524 = vst [vmem:[#allocation1 + $0x22] ss:$4 sm:$0xff] %v1419_v41 }
0x125b   :  { %v1385_v17 = vpop.permute.xlu2 %1384 }
0x125c   :  { %1387 = vst.msk [vmem:[#allocation3] sm:$0x3] %vm346_vm10, %v1385_v17 }
0x1263   :  { %v1421_v29 = vld [vmem:[#allocation3] sm:$0x3]  ;;  %v791_v32 = vpop.permute.xlu2 %790 }
0x1264   :  { %1437 = vst [vmem:[#allocation1] ss:$4 sm:$0xff] %v1421_v29 }
0x1265   :  { %794 = vst.msk [vmem:[#allocation2] sm:$0xc0] %vm353_vm11, %v791_v32 }
0x126b   :  { %v1452_v9 = vld.sshfl [vmem:[#allocation1] sm:$0xff pattern:$0x73625140]  ;;  %v1379_v31 = vpop.permute.xlu2 %1378 }
0x126c   :  { %1512 = vst [vmem:[#allocation1] ss:$4 sm:$0xff] %v1413_v33  ;;  %v1416_v42 = vld [vmem:[#allocation2 + $0x6] sm:$0x3]  ;;  %3596 = vmatmul.msk.f32.vlgmr.msra.gmra.mxu0 %vm219_vm9, %v1452_v9  ;;  %3598 = vmatmul.msk.f32.vlgmr.msra.gmra.mxu1 %vm219_vm9, %v1452_v9 }
0x126d   :  { %1514 = vst [vmem:[#allocation1 + $0x1] ss:$4 sm:$0xff] %v1414_v40  ;;  %1911 = vmatpush.msra.mxu1 %v4651_v4  ;;  %1882 = vmatpush.msra.mxu0 %v4653_v5 }
0x126e   :  { %1516 = vst [vmem:[#allocation1 + $0x2] ss:$4 sm:$0xff] %v1415_v18 }
0x126f   :  { %1518 = vst [vmem:[#allocation1 + $0x3] ss:$4 sm:$0xff] %v1416_v42  ;;  %1912 = vmatpush.msra.mxu1 %v4655_v7  ;;  %1883 = vmatpush.msra.mxu0 %v4659_v14 }
0x1270   :  { %1382 = vst.msk [vmem:[#allocation2 + $0x8] sm:$0xc0] %vm353_vm11, %v1379_v31 }
0x1271   :  { %1913 = vmatpush.msra.mxu1 %v4672_v20  ;;  %1884 = vmatpush.msra.mxu0 %v4661_v16 }
0x1273   :  { %1914 = vmatpush.msra.mxu1 %v4676_v26  ;;  %1885 = vmatpush.msra.mxu0 %v4674_v25 }
0x1274   :  { %3597 = vmatmul.msk.f32.gmra.mxu0 %vm219_vm9, %v4649_v28  ;;  %3599 = vmatmul.msk.f32.gmra.mxu1 %vm219_vm9, %v4649_v28 }
0x1276   :  { %v1527_v36 = vld.sshfl [vmem:[#allocation1] sm:$0xff pattern:$0x73625140] }
0x1277   :  { %v1420_v50 = vld [vmem:[#allocation2 + $0xe] sm:$0x3]  ;;  %3600 = vmatmul.msk.f32.vlgmr.msra.gmra.mxu2 %vm219_vm9, %v1527_v36  ;;  %3602 = vmatmul.msk.f32.vlgmr.msra.gmra.mxu3 %vm219_vm9, %v1527_v36 }
0x1278   :  { %1526 = vst [vmem:[#allocation1 + $0x23] ss:$4 sm:$0xff] %v1420_v50  ;;  %2061 = vmatpush.msra.mxu3 %v4651_v4  ;;  %2032 = vmatpush.msra.mxu2 %v4653_v5 }
0x127a   :  { %2062 = vmatpush.msra.mxu3 %v4655_v7  ;;  %2033 = vmatpush.msra.mxu2 %v4659_v14 }
0x127c   :  { %1604 = vmatmul.f32.vlgmr.msrb.gmra.mxu0 %v4183_v22  ;;  %1625 = vmatmul.f32.vlgmr.msrb.gmra.mxu1 %v4183_v22 }
0x127d   :  { %2063 = vmatpush.msra.mxu3 %v4672_v20  ;;  %2202 = vmatpush.msrb.mxu1 %v4651_v4 }
0x127e   :  { %2034 = vmatpush.msra.mxu2 %v4661_v16  ;;  %2179 = vmatpush.msrb.mxu0 %v4653_v5 }
0x127f   :  { %v1528_v51 = vld.sshfl [vmem:[#allocation1 + $0x20] sm:$0xff pattern:$0x73625140]  ;;  %2064 = vmatpush.msra.mxu3 %v4676_v26  ;;  %2203 = vmatpush.msrb.mxu1 %v4655_v7 }
0x1280   :  { %3601 = vmatmul.msk.f32.gmra.mxu2 %vm219_vm9, %v1528_v51  ;;  %3603 = vmatmul.msk.f32.gmra.mxu3 %vm219_vm9, %v1528_v51 }
0x1281   :  { %2204 = vmatpush.msrb.mxu1 %v4672_v20  ;;  %2035 = vmatpush.msra.mxu2 %v4674_v25 }
0x1282   :  { %2180 = vmatpush.msrb.mxu0 %v4659_v14 }
0x1283   :  { %2205 = vmatpush.msrb.mxu1 %v4676_v26 }
0x1284   :  { %2181 = vmatpush.msrb.mxu0 %v4661_v16 }
0x1286   :  { %2182 = vmatpush.msrb.mxu0 %v4674_v25 }
0x12e9   :  { %v1498_v39 = vpop.f32.mrf.mxu1  ;;  %v1475_v47 = vpop.f32.mrf.mxu0 }
0x12f1   :  { %v1501_v53 = vpop.f32.mrf.mxu1  ;;  %v1478_v38 = vpop.f32.mrf.mxu0 }
0x12f9   :  { %v1626_v52 = vpop.f32.mrf.mxu1  ;;  %v1605_v42 = vpop.f32.mrf.mxu0 }
0x12fa   :  { %v1550_v44 = vpop.f32.mrf.mxu2  ;;  %v1573_v21 = vpop.f32.mrf.mxu3  ;;  %v1630_v11 = vrot.slane %v1626_v52, 2 }
0x12fb   :  { %v1574_v24 = vadd.f32 %v1573_v21, %v1498_v39  ;;  %v1551_v32 = vadd.f32 %v1550_v44, %v1475_v47 }
0x12fd   :  { %v4728_v45 = vadd.f32 %v1581_v35, %v1574_v24  ;;  %v4749_v40 = vadd.f32 %v1580_v43, %v1551_v32 }
0x12ff   :  { %v1608_v18 = vadd.f32 %v1605_v42, %v4749_v40 }
0x1303   :  { %v1553_v37 = vpop.f32.mrf.mxu2  ;;  %v1576_v48 = vpop.f32.mrf.mxu3 }
0x1304   :  { %v1554_v46 = vadd.f32 %v1553_v37, %v1478_v38  ;;  %v1577_v54 = vadd.f32 %v1576_v48, %v1501_v53 }
0x1306   :  { %v4731_v12 = vadd.f32 %v1580_v43, %v1554_v46  ;;  %v4733_v10 = vadd.f32 %v1581_v35, %v1577_v54  ;;  %v3604_v46 = vmul.f32 -1.442695, %v1608_v18 }
0x1308   :  { %v1632_v49 = vadd.f32 %v1630_v11, %v4733_v10 }
0x130a   :  { %3874 = vtanh.f32 %v1632_v49  ;;  %v3605_v15 = vmul.f32 -1.442695, %v1632_v49 }
0x130c   :  { %3876 = vpow2.f32 %v3605_v15 }
0x1310   :  { %v3875_v13 = vpop.eup %3874 }
0x1311   :  { %1692 = vrot.lane.b32.xlu0 %v3875_v13, %s4184_s6 }
0x1312   :  { %v3877_v23 = vpop.eup %3876 }
0x1313   :  { %v1656_v19 = vadd.f32 1.0, %v3877_v23 }
0x1315   :  { %3878 = vrcp.f32 %v1656_v19  ;;  %v1668_v57 = vand.u32 2147483648, %v1656_v19  ;;  %vm1662_vm15 = vweird.f32 %v1656_v19  ;;  %v1666_v58 = vand.u32 2147483647, %v1656_v19 }
0x1317   :  { %v1669_v34 = vor.u32 1.1754944e-38, %v1668_v57  ;;  %vm1667_vm1 = vcmp.eq.f32.partialorder %v1666_v58, 8.507059e+37 }
0x131b   :  { %v3879_v28 = vpop.eup %3878 }
0x131c   :  { %v1658_v41 = vmul.f32 %v3879_v28, %v1656_v19  ;;  %vm1663_vm14 = vweird.f32 %v3879_v28 }
0x131d   :  { %vm1664_vm0 = vmor %vm1662_vm15, %vm1663_vm14 }
0x131e   :  { %v1659_v30 = vsub.f32 1.0, %v1658_v41 }
0x1320   :  { %v1660_v55 = vmul.f32 %v3879_v28, %v1659_v30 }
0x1322   :  { %v1661_v56 = vadd.f32 %v3879_v28, %v1660_v55 }
0x1324   :  { %v1665_v8 = vsel %vm1664_vm0, %v3879_v28, %v1661_v56 }
0x1325   :  { %v1670_v60 = vsel %vm1667_vm1, %v1669_v34, %v1665_v8 }
0x1326   :  { %v1690_v61 = vmul.f32 0.0, %v1670_v60 }
0x1383   :  { %v1693_v59 = vpop.permute.xlu0 %1692 }
0x1384   :  { %v1695_v27 = vmul.f32 %v1693_v59, %v1670_v60 }
0x1386   :  { %1697 = vrot.lane.b32.xlu1 %v1695_v27, %s4177_s19 }
0x13f8   :  { %v1698_v62 = vpop.permute.xlu1 %1697 }
0x13f9   :  { %v1700_v63 = vadd.f32 %v1698_v62, %v1690_v61 }
0x13fb   :  { %3880 = vtanh.f32 %v1700_v63  ;;  %v1834_v15 = vrot.slane %v1700_v63, 2 }
0x1401   :  { %v3881_v0 = vpop.eup %3880 }
0x1402   :  { %1703 = vrot.lane.b32.xlu2 %v3881_v0, %s4184_s6 }
0x145c   :  { %v1704_v1 = vpop.permute.xlu2 %1703 }
0x145d   :  { %v4739_v2 = vmul.f32 %v1704_v1, %v1670_v60 }
0x145f   :  { %v1744_v3 = vrot.slane %v4739_v2, 6 }
0x1461   :  { %1745 = vrot.lane.b32.xlu0 %v1744_v3, %s4177_s19 }
0x14d3   :  { %v1746_v17 = vpop.permute.xlu0 %1745 }
0x14d4   :  { %3607 = vmatmul.msk.f32.vlgmr.msrb.gmra.mxu3 %vm219_vm9, %v1746_v17 }
0x14d5   :  { %2349 = vmatpush.msrb.mxu3 %v4651_v4 }
0x14d7   :  { %2350 = vmatpush.msrb.mxu3 %v4655_v7 }
0x14d9   :  { %2351 = vmatpush.msrb.mxu3 %v4672_v20 }
0x14db   :  { %2352 = vmatpush.msrb.mxu3 %v4676_v26 }
0x1557   :  { %v1766_v29 = vpop.f32.mrf.mxu3 }
0x1558   :  { %v1770_v33 = vrot.slane %v1766_v29, 4 }
0x155a   :  { %v1772_v9 = vadd.f32 %v1770_v33, %v4733_v10 }
0x155c   :  { %3882 = vtanh.f32 %v1772_v9  ;;  %v3609_v50 = vmul.f32 -1.442695, %v1772_v9 }
0x155d   :  { %3884 = vtanh.f32 %v1608_v18 }
0x155e   :  { %3886 = vpow2.f32 %v3609_v50 }
0x1562   :  { %v3883_v31 = vpop.eup %3882 }
0x1563   :  { %1838 = vrot.lane.b32.xlu1 %v3883_v31, %s4184_s6  ;;  %v3885_v36 = vpop.eup %3884 }
0x1564   :  { %v3887_v51 = vpop.eup %3886 }
0x1565   :  { %v1796_v39 = vadd.f32 1.0, %v3887_v51 }
0x1567   :  { %3888 = vrcp.f32 %v1796_v39  ;;  %v1808_v21 = vand.u32 2147483648, %v1796_v39  ;;  %vm1802_vm3 = vweird.f32 %v1796_v39  ;;  %v1806_v24 = vand.u32 2147483647, %v1796_v39 }
0x1568   :  { %3890 = vpow2.f32 %v3604_v46 }
0x1569   :  { %v1809_v38 = vor.u32 1.1754944e-38, %v1808_v21  ;;  %vm1807_vm5 = vcmp.eq.f32.partialorder %v1806_v24, 8.507059e+37 }
0x156b   :  { %1675 = vrot.lane.b32.xlu1 %v3885_v36, %s4184_s6 }
0x156d   :  { %v3889_v6 = vpop.eup %3888 }
0x156e   :  { %v1798_v47 = vmul.f32 %v3889_v6, %v1796_v39  ;;  %vm1803_vm2 = vweird.f32 %v3889_v6  ;;  %v3891_v54 = vpop.eup %3890 }
0x156f   :  { %vm1804_vm4 = vmor %vm1802_vm3, %vm1803_vm2  ;;  %v1636_v11 = vadd.f32 1.0, %v3891_v54 }
0x1570   :  { %v1799_v53 = vsub.f32 1.0, %v1798_v47 }
0x1571   :  { %3892 = vrcp.f32 %v1636_v11  ;;  %v1648_v57 = vand.u32 2147483648, %v1636_v11  ;;  %vm1642_vm7 = vweird.f32 %v1636_v11  ;;  %v1646_v58 = vand.u32 2147483647, %v1636_v11 }
0x1572   :  { %v1800_v35 = vmul.f32 %v3889_v6, %v1799_v53 }
0x1573   :  { %v1649_v34 = vor.u32 1.1754944e-38, %v1648_v57  ;;  %vm1647_vm14 = vcmp.eq.f32.partialorder %v1646_v58, 8.507059e+37 }
0x1574   :  { %v1801_v44 = vadd.f32 %v3889_v6, %v1800_v35 }
0x1576   :  { %v1805_v52 = vsel %vm1804_vm4, %v3889_v6, %v1801_v44 }
0x1577   :  { %v1810_v48 = vsel %vm1807_vm5, %v1809_v38, %v1805_v52  ;;  %v3893_v49 = vpop.eup %3892 }
0x1578   :  { %v1638_v13 = vmul.f32 %v3893_v49, %v1636_v11  ;;  %v1836_v23 = vmul.f32 %v1834_v15, %v1810_v48  ;;  %vm1643_vm6 = vweird.f32 %v3893_v49 }
0x1579   :  { %vm1644_vm8 = vmor %vm1642_vm7, %vm1643_vm6 }
0x157a   :  { %v1639_v19 = vsub.f32 1.0, %v1638_v13 }
0x157c   :  { %v1640_v30 = vmul.f32 %v3893_v49, %v1639_v19 }
0x157e   :  { %v1641_v55 = vadd.f32 %v3893_v49, %v1640_v30 }
0x1580   :  { %v1645_v8 = vsel %vm1644_vm8, %v3893_v49, %v1641_v55 }
0x1581   :  { %v1650_v60 = vsel %vm1647_vm14, %v1649_v34, %v1645_v8 }
0x1582   :  { %v1673_v0 = vmul.f32 0.0, %v1650_v60 }
0x15d5   :  { %v1839_v37 = vpop.permute.xlu1 %1838 }
0x15d6   :  { %v1841_v43 = vmul.f32 %v1839_v37, %v1810_v48 }
0x15d8   :  { %1843 = vrot.lane.b32.xlu2 %v1841_v43, %s4177_s19 }
0x15dd   :  { %v1676_v59 = vpop.permute.xlu1 %1675 }
0x15de   :  { %v1678_v27 = vmul.f32 %v1676_v59, %v1650_v60 }
0x1632   :  { %v1844_v28 = vpop.permute.xlu2 %1843 }
0x1633   :  { %v4755_v41 = vadd.f32 %v1844_v28, %v1836_v23 }
0x1635   :  { %3894 = vtanh.f32 %v4755_v41  ;;  %v1984_v28 = vrot.slane %v4755_v41, 2 }
0x163b   :  { %v3895_v56 = vpop.eup %3894 }
0x163c   :  { %1849 = vrot.lane.b32.xlu0 %v3895_v56, %s4184_s6 }
0x1644   :  { %1680 = vrot.lane.b32.xlu0 %v1678_v27, %s4177_s19 }
0x16ae   :  { %v1850_v61 = vpop.permute.xlu0 %1849 }
0x16af   :  { %v4760_v62 = vmul.f32 %v1850_v61, %v1810_v48 }
0x16b1   :  { %v1894_v63 = vrot.slane %v4760_v62, 4 }
0x16b3   :  { %1895 = vrot.lane.b32.xlu2 %v1894_v63, %s4177_s19 }
0x16b6   :  { %v1681_v1 = vpop.permute.xlu0 %1680 }
0x16b7   :  { %v4764_v3 = vadd.f32 %v1681_v1, %v1673_v0 }
0x16b9   :  { %3896 = vtanh.f32 %v4764_v3 }
0x16bf   :  { %v3897_v17 = vpop.eup %3896 }
0x16c0   :  { %1686 = vrot.lane.b32.xlu1 %v3897_v17, %s4184_s6 }
0x170d   :  { %v1896_v29 = vpop.permute.xlu2 %1895 }
0x170e   :  { %3611 = vmatmul.msk.f32.vlgmr.msra.gmra.mxu1 %vm219_vm9, %v1896_v29 }
0x170f   :  { %2499 = vmatpush.msra.mxu1 %v4651_v4 }
0x1711   :  { %2500 = vmatpush.msra.mxu1 %v4655_v7 }
0x1713   :  { %2501 = vmatpush.msra.mxu1 %v4672_v20 }
0x1715   :  { %2502 = vmatpush.msra.mxu1 %v4676_v26 }
0x1732   :  { %v1687_v32 = vpop.permute.xlu1 %1686 }
0x1733   :  { %v1689_v33 = vmul.f32 %v1687_v32, %v1650_v60 }
0x1735   :  { %1708 = vrot.lane.b32.xlu2 %v1689_v33, %s4177_s19  ;;  %v1814_v33 = vrot.slane %v4764_v3, 6 }
0x178b   :  { %v1916_v9 = vpop.f32.mrf.mxu1 }
0x178c   :  { %v1920_v42 = vrot.slane %v1916_v9, 6 }
0x178e   :  { %v1922_v18 = vadd.f32 %v1920_v42, %v4733_v10 }
0x178f   :  { %v1709_v31 = vpop.permute.xlu2 %1708 }
0x1790   :  { %3898 = vtanh.f32 %v1922_v18  ;;  %1711 = vst.msk [vmem:[#allocation4] sm:$0x3] %vm346_vm10, %v1709_v31  ;;  %3606 = vmatmul.msk.f32.vlgmr.msrb.gmra.mxu2 %vm219_vm9, %v1709_v31  ;;  %v3613_v50 = vmul.f32 -1.442695, %v1922_v18 }
0x1791   :  { %2320 = vmatpush.msrb.mxu2 %v4653_v5 }
0x1792   :  { %3900 = vpow2.f32 %v3613_v50 }
0x1793   :  { %2321 = vmatpush.msrb.mxu2 %v4659_v14 }
0x1795   :  { %2322 = vmatpush.msrb.mxu2 %v4661_v16 }
0x1796   :  { %v3899_v36 = vpop.eup %3898 }
0x1797   :  { %1988 = vrot.lane.b32.xlu0 %v3899_v36, %s4184_s6  ;;  %2323 = vmatpush.msrb.mxu2 %v4674_v25 }
0x1798   :  { %v3901_v51 = vpop.eup %3900 }
0x1799   :  { %v1946_v39 = vadd.f32 1.0, %v3901_v51 }
0x179b   :  { %3902 = vrcp.f32 %v1946_v39  ;;  %v1958_v21 = vand.u32 2147483648, %v1946_v39  ;;  %vm1952_vm0 = vweird.f32 %v1946_v39  ;;  %v1956_v24 = vand.u32 2147483647, %v1946_v39 }
0x179d   :  { %v1959_v38 = vor.u32 1.1754944e-38, %v1958_v21  ;;  %vm1957_vm2 = vcmp.eq.f32.partialorder %v1956_v24, 8.507059e+37 }
0x17a1   :  { %v3903_v6 = vpop.eup %3902 }
0x17a2   :  { %v1948_v47 = vmul.f32 %v3903_v6, %v1946_v39  ;;  %vm1953_vm15 = vweird.f32 %v3903_v6 }
0x17a3   :  { %vm1954_vm1 = vmor %vm1952_vm0, %vm1953_vm15 }
0x17a4   :  { %v1949_v53 = vsub.f32 1.0, %v1948_v47 }
0x17a6   :  { %v1950_v35 = vmul.f32 %v3903_v6, %v1949_v53 }
0x17a8   :  { %v1951_v44 = vadd.f32 %v3903_v6, %v1950_v35 }
0x17aa   :  { %v1955_v52 = vsel %vm1954_vm1, %v3903_v6, %v1951_v44 }
0x17ab   :  { %v1960_v37 = vsel %vm1957_vm2, %v1959_v38, %v1955_v52 }
0x17ac   :  { %v1986_v30 = vmul.f32 %v1984_v28, %v1960_v37 }
0x1809   :  { %v1989_v48 = vpop.permute.xlu0 %1988 }
0x180a   :  { %v1991_v43 = vmul.f32 %v1989_v48, %v1960_v37 }
0x180c   :  { %1993 = vrot.lane.b32.xlu1 %v1991_v43, %s4177_s19 }
0x1813   :  { %v1737_v46 = vpop.f32.mrf.mxu2 }
0x1814   :  { %v1741_v54 = vrot.slane %v1737_v46, 6 }
0x1816   :  { %v1743_v11 = vadd.f32 %v1741_v54, %v4749_v40 }
0x1818   :  { %3904 = vtanh.f32 %v1743_v11  ;;  %v3608_v13 = vmul.f32 -1.442695, %v1743_v11 }
0x181a   :  { %3906 = vpow2.f32 %v3608_v13 }
0x181e   :  { %v3905_v49 = vpop.eup %3904 }
0x181f   :  { %1818 = vrot.lane.b32.xlu1 %v3905_v49, %s4184_s6 }
0x1820   :  { %v3907_v15 = vpop.eup %3906 }
0x1821   :  { %v1776_v23 = vadd.f32 1.0, %v3907_v15 }
0x1823   :  { %3908 = vrcp.f32 %v1776_v23  ;;  %v1788_v60 = vand.u32 2147483648, %v1776_v23  ;;  %vm1782_vm4 = vweird.f32 %v1776_v23  ;;  %v1786_v27 = vand.u32 2147483647, %v1776_v23 }
0x1825   :  { %v1789_v41 = vor.u32 1.1754944e-38, %v1788_v60  ;;  %vm1787_vm6 = vcmp.eq.f32.partialorder %v1786_v27, 8.507059e+37 }
0x1829   :  { %v3909_v19 = vpop.eup %3908 }
0x182a   :  { %v1778_v56 = vmul.f32 %v3909_v19, %v1776_v23  ;;  %vm1783_vm3 = vweird.f32 %v3909_v19 }
0x182b   :  { %vm1784_vm5 = vmor %vm1782_vm4, %vm1783_vm3 }
0x182c   :  { %v1779_v58 = vsub.f32 1.0, %v1778_v56 }
0x182e   :  { %v1780_v8 = vmul.f32 %v3909_v19, %v1779_v58 }
0x1830   :  { %v1781_v59 = vadd.f32 %v3909_v19, %v1780_v8 }
0x1832   :  { %v1785_v61 = vsel %vm1784_vm5, %v3909_v19, %v1781_v59 }
0x1833   :  { %v1790_v0 = vsel %vm1787_vm6, %v1789_v41, %v1785_v61 }
0x1834   :  { %v1816_v9 = vmul.f32 %v1814_v33, %v1790_v0 }
0x187e   :  { %v1994_v55 = vpop.permute.xlu1 %1993 }
0x187f   :  { %v4786_v57 = vadd.f32 %v1994_v55, %v1986_v30 }
0x1881   :  { %3910 = vtanh.f32 %v4786_v57  ;;  %v2131_v55 = vrot.slane %v4786_v57, 2 }
0x1887   :  { %v3911_v34 = vpop.eup %3910 }
0x1888   :  { %1999 = vrot.lane.b32.xlu2 %v3911_v34, %s4184_s6 }
0x1891   :  { %v1819_v63 = vpop.permute.xlu1 %1818 }
0x1892   :  { %v1821_v1 = vmul.f32 %v1819_v63, %v1790_v0 }
0x1894   :  { %1823 = vrot.lane.b32.xlu2 %v1821_v1, %s4177_s19 }
0x18e2   :  { %v2000_v17 = vpop.permute.xlu2 %1999 }
0x18e3   :  { %v4791_v29 = vmul.f32 %v2000_v17, %v1960_v37 }
0x18e5   :  { %v2044_v32 = vrot.slane %v4791_v29, 2 }
0x18e7   :  { %2045 = vrot.lane.b32.xlu0 %v2044_v32, %s4177_s19 }
0x18ee   :  { %v1824_v42 = vpop.permute.xlu2 %1823 }
0x18ef   :  { %v4796_v18 = vadd.f32 %v1824_v42, %v1816_v9 }
0x18f1   :  { %3912 = vtanh.f32 %v4796_v18  ;;  %v1964_v9 = vrot.slane %v4796_v18, 6 }
0x18f7   :  { %v3913_v31 = vpop.eup %3912 }
0x18f8   :  { %1829 = vrot.lane.b32.xlu0 %v3913_v31, %s4184_s6 }
0x1959   :  { %v2046_v36 = vpop.permute.xlu0 %2045 }
0x195a   :  { %3615 = vmatmul.msk.f32.vlgmr.msra.gmra.mxu3 %vm219_vm9, %v2046_v36 }
0x195b   :  { %2649 = vmatpush.msra.mxu3 %v4651_v4 }
0x195d   :  { %2650 = vmatpush.msra.mxu3 %v4655_v7 }
0x195f   :  { %2651 = vmatpush.msra.mxu3 %v4672_v20 }
0x1961   :  { %2652 = vmatpush.msra.mxu3 %v4676_v26 }
0x196a   :  { %v1830_v3 = vpop.permute.xlu0 %1829 }
0x196b   :  { %v4805_v50 = vmul.f32 %v1830_v3, %v1790_v0 }
0x196d   :  { %v1865_v51 = vrot.slane %v4805_v50, 2 }
0x196f   :  { %1866 = vrot.lane.b32.xlu1 %v1865_v51, %s4177_s19 }
0x19dd   :  { %v2066_v39 = vpop.f32.mrf.mxu3 }
0x19de   :  { %v2069_v6 = vadd.f32 %v2066_v39, %v4733_v10 }
0x19e0   :  { %3914 = vtanh.f32 %v2069_v6  ;;  %v3617_v7 = vmul.f32 -1.442695, %v2069_v6 }
0x19e1   :  { %v1867_v47 = vpop.permute.xlu1 %1866 }
0x19e2   :  { %3610 = vmatmul.msk.f32.vlgmr.msra.gmra.mxu0 %vm219_vm9, %v1867_v47  ;;  %3916 = vpow2.f32 %v3617_v7 }
0x19e3   :  { %2470 = vmatpush.msra.mxu0 %v4653_v5 }
0x19e5   :  { %2471 = vmatpush.msra.mxu0 %v4659_v14 }
0x19e6   :  { %v3915_v4 = vpop.eup %3914 }
0x19e7   :  { %2135 = vrot.lane.b32.xlu2 %v3915_v4, %s4184_s6  ;;  %2472 = vmatpush.msra.mxu0 %v4661_v16 }
0x19e8   :  { %v3917_v20 = vpop.eup %3916 }
0x19e9   :  { %2473 = vmatpush.msra.mxu0 %v4674_v25  ;;  %v2093_v26 = vadd.f32 1.0, %v3917_v20 }
0x19eb   :  { %3918 = vrcp.f32 %v2093_v26  ;;  %v2105_v24 = vand.u32 2147483648, %v2093_v26  ;;  %vm2099_vm8 = vweird.f32 %v2093_v26  ;;  %v2103_v52 = vand.u32 2147483647, %v2093_v26 }
0x19ed   :  { %v2106_v37 = vor.u32 1.1754944e-38, %v2105_v24  ;;  %vm2104_vm15 = vcmp.eq.f32.partialorder %v2103_v52, 8.507059e+37 }
0x19f1   :  { %v3919_v10 = vpop.eup %3918 }
0x19f2   :  { %v2095_v53 = vmul.f32 %v3919_v10, %v2093_v26  ;;  %vm2100_vm7 = vweird.f32 %v3919_v10 }
0x19f3   :  { %vm2101_vm14 = vmor %vm2099_vm8, %vm2100_vm7 }
0x19f4   :  { %v2096_v35 = vsub.f32 1.0, %v2095_v53 }
0x19f6   :  { %v2097_v44 = vmul.f32 %v3919_v10, %v2096_v35 }
0x19f8   :  { %v2098_v21 = vadd.f32 %v3919_v10, %v2097_v44 }
0x19fa   :  { %v2102_v38 = vsel %vm2101_vm14, %v3919_v10, %v2098_v21 }
0x19fb   :  { %v2107_v48 = vsel %vm2104_vm15, %v2106_v37, %v2102_v38 }
0x19fc   :  { %v2133_v56 = vmul.f32 %v2131_v55, %v2107_v48 }
0x1a41   :  { %v2136_v43 = vpop.permute.xlu2 %2135 }
0x1a42   :  { %v2138_v46 = vmul.f32 %v2136_v43, %v2107_v48 }
0x1a44   :  { %2140 = vrot.lane.b32.xlu0 %v2138_v46, %s4177_s19 }
0x1a5f   :  { %v1887_v54 = vpop.f32.mrf.mxu0 }
0x1a60   :  { %v1891_v11 = vrot.slane %v1887_v54, 4 }
0x1a62   :  { %v1893_v49 = vadd.f32 %v1891_v11, %v4749_v40 }
0x1a64   :  { %3920 = vtanh.f32 %v1893_v49  ;;  %v3612_v15 = vmul.f32 -1.442695, %v1893_v49 }
0x1a66   :  { %3922 = vpow2.f32 %v3612_v15 }
0x1a6a   :  { %v3921_v13 = vpop.eup %3920 }
0x1a6b   :  { %1968 = vrot.lane.b32.xlu2 %v3921_v13, %s4184_s6 }
0x1a6c   :  { %v3923_v23 = vpop.eup %3922 }
0x1a6d   :  { %v1926_v19 = vadd.f32 1.0, %v3923_v23 }
0x1a6f   :  { %3924 = vrcp.f32 %v1926_v19  ;;  %v1938_v61 = vand.u32 2147483648, %v1926_v19  ;;  %vm1932_vm1 = vweird.f32 %v1926_v19  ;;  %v1936_v41 = vand.u32 2147483647, %v1926_v19 }
0x1a71   :  { %v1939_v0 = vor.u32 1.1754944e-38, %v1938_v61  ;;  %vm1937_vm3 = vcmp.eq.f32.partialorder %v1936_v41, 8.507059e+37 }
0x1a75   :  { %v3925_v28 = vpop.eup %3924 }
0x1a76   :  { %v1928_v30 = vmul.f32 %v3925_v28, %v1926_v19  ;;  %vm1933_vm0 = vweird.f32 %v3925_v28 }
0x1a77   :  { %vm1934_vm2 = vmor %vm1932_vm1, %vm1933_vm0 }
0x1a78   :  { %v1929_v8 = vsub.f32 1.0, %v1928_v30 }
0x1a7a   :  { %v1930_v59 = vmul.f32 %v3925_v28, %v1929_v8 }
0x1a7c   :  { %v1931_v60 = vadd.f32 %v3925_v28, %v1930_v59 }
0x1a7e   :  { %v1935_v63 = vsel %vm1934_vm2, %v3925_v28, %v1931_v60 }
0x1a7f   :  { %v1940_v1 = vsel %vm1937_vm3, %v1939_v0, %v1935_v63 }
0x1a80   :  { %v1966_v42 = vmul.f32 %v1964_v9, %v1940_v1 }
0x1ab6   :  { %v2141_v58 = vpop.permute.xlu0 %2140 }
0x1ab7   :  { %v4820_v34 = vadd.f32 %v2141_v58, %v2133_v56 }
0x1ab9   :  { %3926 = vtanh.f32 %v4820_v34  ;;  %v2275_v55 = vrot.slane %v4820_v34, 2 }
0x1abf   :  { %v3927_v27 = vpop.eup %3926 }
0x1ac0   :  { %2146 = vrot.lane.b32.xlu1 %v3927_v27, %s4184_s6 }
0x1ac5   :  { %v1969_v57 = vpop.permute.xlu2 %1968 }
0x1ac6   :  { %v1971_v17 = vmul.f32 %v1969_v57, %v1940_v1 }
0x1ac8   :  { %1973 = vrot.lane.b32.xlu1 %v1971_v17, %s4177_s19 }
0x1b32   :  { %v2147_v32 = vpop.permute.xlu1 %2146 }
0x1b33   :  { %v2149_v33 = vmul.f32 %v2147_v32, %v2107_v48 }
0x1b35   :  { %2157 = vrot.lane.b32.xlu0 %v2149_v33, %s4177_s19 }
0x1b3a   :  { %v1974_v31 = vpop.permute.xlu1 %1973 }
0x1b3b   :  { %v4827_v36 = vadd.f32 %v1974_v31, %v1966_v42 }
0x1b3d   :  { %3928 = vtanh.f32 %v4827_v36  ;;  %v2111_v9 = vrot.slane %v4827_v36, 6 }
0x1b43   :  { %v3929_v3 = vpop.eup %3928 }
0x1b44   :  { %1979 = vrot.lane.b32.xlu2 %v3929_v3, %s4184_s6 }
0x1b9e   :  { %v1980_v51 = vpop.permute.xlu2 %1979 }
0x1b9f   :  { %v4831_v39 = vmul.f32 %v1980_v51, %v1940_v1 }
0x1ba1   :  { %v2015_v6 = vrot.slane %v4831_v39, 4 }
0x1ba3   :  { %2016 = vrot.lane.b32.xlu0 %v2015_v6, %s4177_s19 }
0x1ba7   :  { %v2158_v47 = vpop.permute.xlu0 %2157 }
0x1ba8   :  { %2161 = vst.msk [vmem:[#allocation5 + $0x8] sm:$0x3] %vm346_vm10, %v2158_v47  ;;  %3619 = vmatmul.msk.f32.vlgmr.msrb.gmra.mxu1 %vm219_vm9, %v2158_v47 }
0x1baf   :  { %v2761_v18 = vld [vmem:[#allocation5 + $0x8] sm:$0x3] }
0x1bb0   :  { %2789 = vst [vmem:[#allocation1 + $0x20] ss:$4 sm:$0xff] %v2761_v18 }
0x1c15   :  { %v2017_v4 = vpop.permute.xlu0 %2016 }
0x1c16   :  { %3614 = vmatmul.msk.f32.vlgmr.msra.gmra.mxu2 %vm219_vm9, %v2017_v4 }
0x1c17   :  { %2620 = vmatpush.msra.mxu2 %v4653_v5 }
0x1c19   :  { %2621 = vmatpush.msra.mxu2 %v4659_v14 }
0x1c1b   :  { %2622 = vmatpush.msra.mxu2 %v4661_v16 }
0x1c1d   :  { %2623 = vmatpush.msra.mxu2 %v4674_v25 }
0x1c25   :  { %v2207_v7 = vpop.f32.mrf.mxu1 }
0x1c26   :  { %v2211_v20 = vrot.slane %v2207_v7, 2 }
0x1c28   :  { %v2213_v26 = vadd.f32 %v2211_v20, %v4728_v45 }
0x1c2a   :  { %3930 = vtanh.f32 %v2213_v26  ;;  %v3621_v53 = vmul.f32 -1.442695, %v2213_v26 }
0x1c2c   :  { %3932 = vpow2.f32 %v3621_v53 }
0x1c30   :  { %v3931_v10 = vpop.eup %3930 }
0x1c31   :  { %2279 = vrot.lane.b32.xlu1 %v3931_v10, %s4184_s6 }
0x1c32   :  { %v3933_v35 = vpop.eup %3932 }
0x1c33   :  { %v2237_v44 = vadd.f32 1.0, %v3933_v35 }
0x1c35   :  { %3934 = vrcp.f32 %v2237_v44  ;;  %v2249_v25 = vand.u32 2147483648, %v2237_v44  ;;  %vm2243_vm5 = vweird.f32 %v2237_v44  ;;  %v2247_v38 = vand.u32 2147483647, %v2237_v44 }
0x1c37   :  { %v2250_v43 = vor.u32 1.1754944e-38, %v2249_v25  ;;  %vm2248_vm7 = vcmp.eq.f32.partialorder %v2247_v38, 8.507059e+37 }
0x1c3b   :  { %v3935_v5 = vpop.eup %3934 }
0x1c3c   :  { %v2239_v21 = vmul.f32 %v3935_v5, %v2237_v44  ;;  %vm2244_vm4 = vweird.f32 %v3935_v5 }
0x1c3d   :  { %vm2245_vm6 = vmor %vm2243_vm5, %vm2244_vm4 }
0x1c3e   :  { %v2240_v14 = vsub.f32 1.0, %v2239_v21 }
0x1c40   :  { %v2241_v24 = vmul.f32 %v3935_v5, %v2240_v14 }
0x1c42   :  { %v2242_v52 = vadd.f32 %v3935_v5, %v2241_v24 }
0x1c44   :  { %v2246_v48 = vsel %vm2245_vm6, %v3935_v5, %v2242_v52 }
0x1c45   :  { %v2251_v54 = vsel %vm2248_vm7, %v2250_v43, %v2246_v48 }
0x1c46   :  { %v2277_v56 = vmul.f32 %v2275_v55, %v2251_v54 }
0x1c99   :  { %v2037_v16 = vpop.f32.mrf.mxu2 }
0x1c9a   :  { %v2041_v37 = vrot.slane %v2037_v16, 2 }
0x1c9c   :  { %v2043_v46 = vadd.f32 %v2041_v37, %v4749_v40 }
0x1c9e   :  { %3936 = vtanh.f32 %v2043_v46  ;;  %v3616_v15 = vmul.f32 -1.442695, %v2043_v46 }
0x1ca0   :  { %3938 = vpow2.f32 %v3616_v15 }
0x1ca3   :  { %v2280_v11 = vpop.permute.xlu1 %2279 }
0x1ca4   :  { %v2282_v49 = vmul.f32 %v2280_v11, %v2251_v54  ;;  %v3937_v13 = vpop.eup %3936 }
0x1ca6   :  { %2284 = vrot.lane.b32.xlu2 %v2282_v49, %s4177_s19  ;;  %v3939_v23 = vpop.eup %3938 }
0x1ca7   :  { %v2073_v19 = vadd.f32 1.0, %v3939_v23 }
0x1ca9   :  { %3940 = vrcp.f32 %v2073_v19  ;;  %v2085_v61 = vand.u32 2147483648, %v2073_v19  ;;  %vm2079_vm14 = vweird.f32 %v2073_v19  ;;  %v2083_v41 = vand.u32 2147483647, %v2073_v19 }
0x1cab   :  { %v2086_v0 = vor.u32 1.1754944e-38, %v2085_v61  ;;  %vm2084_vm0 = vcmp.eq.f32.partialorder %v2083_v41, 8.507059e+37 }
0x1cae   :  { %2115 = vrot.lane.b32.xlu2 %v3937_v13, %s4184_s6 }
0x1caf   :  { %v3941_v28 = vpop.eup %3940 }
0x1cb0   :  { %v2075_v30 = vmul.f32 %v3941_v28, %v2073_v19  ;;  %vm2080_vm8 = vweird.f32 %v3941_v28 }
0x1cb1   :  { %vm2081_vm15 = vmor %vm2079_vm14, %vm2080_vm8 }
0x1cb2   :  { %v2076_v58 = vsub.f32 1.0, %v2075_v30 }
0x1cb4   :  { %v2077_v59 = vmul.f32 %v3941_v28, %v2076_v58 }
0x1cb6   :  { %v2078_v60 = vadd.f32 %v3941_v28, %v2077_v59 }
0x1cb8   :  { %v2082_v63 = vsel %vm2081_vm15, %v3941_v28, %v2078_v60 }
0x1cb9   :  { %v2087_v57 = vsel %vm2084_vm0, %v2086_v0, %v2082_v63 }
0x1cba   :  { %v2113_v42 = vmul.f32 %v2111_v9, %v2087_v57 }
0x1d00   :  { %v2285_v40 = vpop.permute.xlu2 %2284 }
0x1d01   :  { %v4848_v8 = vadd.f32 %v2285_v40, %v2277_v56 }
0x1d03   :  { %3942 = vtanh.f32 %v4848_v8  ;;  %v2422_v30 = vrot.slane %v4848_v8, 2 }
0x1d08   :  { %v2116_v34 = vpop.permute.xlu2 %2115 }
0x1d09   :  { %v3943_v27 = vpop.eup %3942  ;;  %v2118_v1 = vmul.f32 %v2116_v34, %v2087_v57 }
0x1d0a   :  { %2290 = vrot.lane.b32.xlu0 %v3943_v27, %s4184_s6 }
0x1d12   :  { %2120 = vrot.lane.b32.xlu0 %v2118_v1, %s4177_s19 }
0x1d7c   :  { %v2291_v17 = vpop.permute.xlu0 %2290 }
0x1d7d   :  { %v4853_v32 = vmul.f32 %v2291_v17, %v2251_v54 }
0x1d7f   :  { %v2332_v33 = vrot.slane %v4853_v32, 6 }
0x1d81   :  { %2333 = vrot.lane.b32.xlu1 %v2332_v33, %s4177_s19 }
0x1d84   :  { %v2121_v31 = vpop.permute.xlu0 %2120 }
0x1d85   :  { %v4858_v3 = vadd.f32 %v2121_v31, %v2113_v42 }
0x1d87   :  { %3944 = vtanh.f32 %v4858_v3  ;;  %v2255_v9 = vrot.slane %v4858_v3, 6 }
0x1d8d   :  { %v3945_v51 = vpop.eup %3944 }
0x1d8e   :  { %2126 = vrot.lane.b32.xlu1 %v3945_v51, %s4184_s6 }
0x1df3   :  { %v2334_v6 = vpop.permute.xlu1 %2333 }
0x1df4   :  { %3623 = vmatmul.msk.f32.vlgmr.msrb.gmra.mxu3 %vm219_vm9, %v2334_v6 }
0x1e00   :  { %v2127_v47 = vpop.permute.xlu1 %2126 }
0x1e01   :  { %v4863_v18 = vmul.f32 %v2127_v47, %v2087_v57 }
0x1e03   :  { %v2162_v4 = vrot.slane %v4863_v18, 6 }
0x1e05   :  { %2163 = vrot.lane.b32.xlu2 %v2162_v4, %s4177_s19 }
0x1e5f   :  { %v2164_v36 = vpop.permute.xlu2 %2163 }
0x1e60   :  { %3618 = vmatmul.msk.f32.vlgmr.msrb.gmra.mxu0 %vm219_vm9, %v2164_v36 }
0x1e77   :  { %v2354_v7 = vpop.f32.mrf.mxu3 }
0x1e78   :  { %v2358_v20 = vrot.slane %v2354_v7, 4 }
0x1e7a   :  { %v2360_v26 = vadd.f32 %v2358_v20, %v4728_v45 }
0x1e7c   :  { %3946 = vtanh.f32 %v2360_v26  ;;  %v3625_v53 = vmul.f32 -1.442695, %v2360_v26 }
0x1e7e   :  { %3948 = vpow2.f32 %v3625_v53 }
0x1e82   :  { %v3947_v10 = vpop.eup %3946 }
0x1e83   :  { %2426 = vrot.lane.b32.xlu0 %v3947_v10, %s4184_s6 }
0x1e84   :  { %v3949_v35 = vpop.eup %3948 }
0x1e85   :  { %v2384_v44 = vadd.f32 1.0, %v3949_v35 }
0x1e87   :  { %3950 = vrcp.f32 %v2384_v44  ;;  %v2396_v37 = vand.u32 2147483648, %v2384_v44  ;;  %vm2390_vm2 = vweird.f32 %v2384_v44  ;;  %v2394_v48 = vand.u32 2147483647, %v2384_v44 }
0x1e89   :  { %v2397_v46 = vor.u32 1.1754944e-38, %v2396_v37  ;;  %vm2395_vm4 = vcmp.eq.f32.partialorder %v2394_v48, 8.507059e+37 }
0x1e8d   :  { %v3951_v14 = vpop.eup %3950 }
0x1e8e   :  { %v2386_v24 = vmul.f32 %v3951_v14, %v2384_v44  ;;  %vm2391_vm1 = vweird.f32 %v3951_v14 }
0x1e8f   :  { %vm2392_vm3 = vmor %vm2390_vm2, %vm2391_vm1 }
0x1e90   :  { %v2387_v52 = vsub.f32 1.0, %v2386_v24 }
0x1e92   :  { %v2388_v25 = vmul.f32 %v3951_v14, %v2387_v52 }
0x1e94   :  { %v2389_v38 = vadd.f32 %v3951_v14, %v2388_v25 }
0x1e96   :  { %v2393_v43 = vsel %vm2392_vm3, %v3951_v14, %v2389_v38 }
0x1e97   :  { %v2398_v54 = vsel %vm2395_vm4, %v2397_v46, %v2393_v43 }
0x1e98   :  { %v2424_v55 = vmul.f32 %v2422_v30, %v2398_v54 }
0x1edd   :  { %v2184_v5 = vpop.f32.mrf.mxu0 }
0x1ede   :  { %v2187_v21 = vadd.f32 %v2184_v5, %v4731_v12 }
0x1ee0   :  { %3952 = vtanh.f32 %v2187_v21  ;;  %v3620_v13 = vmul.f32 -1.442695, %v2187_v21 }
0x1ee2   :  { %3954 = vpow2.f32 %v3620_v13 }
0x1ee6   :  { %v3953_v16 = vpop.eup %3952 }
0x1ee7   :  { %2259 = vrot.lane.b32.xlu0 %v3953_v16, %s4184_s6 }
0x1ee8   :  { %v3955_v15 = vpop.eup %3954 }
0x1ee9   :  { %v2217_v23 = vadd.f32 1.0, %v3955_v15 }
0x1eeb   :  { %3956 = vrcp.f32 %v2217_v23  ;;  %v2229_v61 = vand.u32 2147483648, %v2217_v23  ;;  %vm2223_vm6 = vweird.f32 %v2217_v23  ;;  %v2227_v41 = vand.u32 2147483647, %v2217_v23 }
0x1eed   :  { %v2230_v8 = vor.u32 1.1754944e-38, %v2229_v61  ;;  %vm2228_vm8 = vcmp.eq.f32.partialorder %v2227_v41, 8.507059e+37 }
0x1ef1   :  { %v3957_v19 = vpop.eup %3956 }
0x1ef2   :  { %v2219_v28 = vmul.f32 %v3957_v19, %v2217_v23  ;;  %vm2224_vm5 = vweird.f32 %v3957_v19 }
0x1ef3   :  { %vm2225_vm7 = vmor %vm2223_vm6, %vm2224_vm5 }
0x1ef4   :  { %v2220_v56 = vsub.f32 1.0, %v2219_v28 }
0x1ef5   :  { %v2427_v11 = vpop.permute.xlu0 %2426 }
0x1ef6   :  { %v2429_v49 = vmul.f32 %v2427_v11, %v2398_v54  ;;  %v2221_v59 = vmul.f32 %v3957_v19, %v2220_v56 }
0x1ef8   :  { %2431 = vrot.lane.b32.xlu1 %v2429_v49, %s4177_s19  ;;  %v2222_v60 = vadd.f32 %v3957_v19, %v2221_v59 }
0x1efa   :  { %v2226_v63 = vsel %vm2225_vm7, %v3957_v19, %v2222_v60 }
0x1efb   :  { %v2231_v34 = vsel %vm2228_vm8, %v2230_v8, %v2226_v63 }
0x1efc   :  { %v2257_v42 = vmul.f32 %v2255_v9, %v2231_v34 }
0x1f59   :  { %v2260_v0 = vpop.permute.xlu0 %2259 }
0x1f5a   :  { %v2262_v57 = vmul.f32 %v2260_v0, %v2231_v34 }
0x1f6a   :  { %v2432_v40 = vpop.permute.xlu1 %2431 }
0x1f6b   :  { %v4874_v58 = vadd.f32 %v2432_v40, %v2424_v55 }
0x1f6d   :  { %3958 = vtanh.f32 %v4874_v58  ;;  %v2572_v15 = vrot.slane %v4874_v58, 2 }
0x1f73   :  { %v3959_v27 = vpop.eup %3958 }
0x1f74   :  { %2437 = vrot.lane.b32.xlu2 %v3959_v27, %s4184_s6 }
0x1f7c   :  { %2264 = vrot.lane.b32.xlu2 %v2262_v57, %s4177_s19 }
0x1fce   :  { %v2438_v1 = vpop.permute.xlu2 %2437 }
0x1fcf   :  { %v4879_v17 = vmul.f32 %v2438_v1, %v2398_v54 }
0x1fd1   :  { %v2482_v33 = vrot.slane %v4879_v17, 4 }
0x1fd3   :  { %2483 = vrot.lane.b32.xlu1 %v2482_v33, %s4177_s19 }
0x1fd6   :  { %v2265_v31 = vpop.permute.xlu2 %2264 }
0x1fd7   :  { %v4884_v51 = vadd.f32 %v2265_v31, %v2257_v42 }
0x1fd9   :  { %3960 = vtanh.f32 %v4884_v51  ;;  %v2402_v31 = vrot.slane %v4884_v51, 6 }
0x1fdf   :  { %v3961_v6 = vpop.eup %3960 }
0x1fe0   :  { %2270 = vrot.lane.b32.xlu0 %v3961_v6, %s4184_s6 }
0x2045   :  { %v2484_v47 = vpop.permute.xlu1 %2483 }
0x2046   :  { %3627 = vmatmul.msk.f32.vlgmr.msra.gmra.mxu1 %vm219_vm9, %v2484_v47 }
0x2052   :  { %v2271_v4 = vpop.permute.xlu0 %2270 }
0x2053   :  { %v2273_v36 = vmul.f32 %v2271_v4, %v2231_v34 }
0x2055   :  { %2295 = vrot.lane.b32.xlu1 %v2273_v36, %s4177_s19 }
0x20c3   :  { %v2504_v7 = vpop.f32.mrf.mxu1 }
0x20c4   :  { %v2508_v3 = vrot.slane %v2504_v7, 6 }
0x20c6   :  { %v2510_v20 = vadd.f32 %v2508_v3, %v4728_v45 }
0x20c7   :  { %v2296_v26 = vpop.permute.xlu1 %2295 }
0x20c8   :  { %3962 = vtanh.f32 %v2510_v20  ;;  %2299 = vst.msk [vmem:[#allocation4 + $0x8] sm:$0x3] %vm346_vm10, %v2296_v26  ;;  %3622 = vmatmul.msk.f32.vlgmr.msrb.gmra.mxu2 %vm219_vm9, %v2296_v26  ;;  %v3629_v53 = vmul.f32 -1.442695, %v2510_v20 }
0x20ca   :  { %3964 = vpow2.f32 %v3629_v53 }
0x20ce   :  { %v3963_v10 = vpop.eup %3962 }
0x20cf   :  { %2576 = vrot.lane.b32.xlu2 %v3963_v10, %s4184_s6 }
0x20d0   :  { %v3965_v35 = vpop.eup %3964 }
0x20d1   :  { %v2534_v44 = vadd.f32 1.0, %v3965_v35 }
0x20d3   :  { %3966 = vrcp.f32 %v2534_v44  ;;  %v2546_v52 = vand.u32 2147483648, %v2534_v44  ;;  %vm2540_vm15 = vweird.f32 %v2534_v44  ;;  %v2544_v25 = vand.u32 2147483647, %v2534_v44 }
0x20d5   :  { %v2547_v37 = vor.u32 1.1754944e-38, %v2546_v52  ;;  %vm2545_vm1 = vcmp.eq.f32.partialorder %v2544_v25, 8.507059e+37 }
0x20d9   :  { %v3967_v5 = vpop.eup %3966 }
0x20da   :  { %v2536_v21 = vmul.f32 %v3967_v5, %v2534_v44  ;;  %vm2541_vm14 = vweird.f32 %v3967_v5 }
0x20db   :  { %vm2542_vm0 = vmor %vm2540_vm15, %vm2541_vm14 }
0x20dc   :  { %v2537_v14 = vsub.f32 1.0, %v2536_v21 }
0x20de   :  { %v2538_v24 = vmul.f32 %v3967_v5, %v2537_v14 }
0x20e0   :  { %v2539_v16 = vadd.f32 %v3967_v5, %v2538_v24 }
0x20e2   :  { %v2543_v38 = vsel %vm2542_vm0, %v3967_v5, %v2539_v16 }
0x20e3   :  { %v2548_v48 = vsel %vm2545_vm1, %v2547_v37, %v2543_v38 }
0x20e4   :  { %v2574_v19 = vmul.f32 %v2572_v15, %v2548_v48 }
0x2129   :  { %v2577_v43 = vpop.permute.xlu2 %2576 }
0x212a   :  { %v2579_v46 = vmul.f32 %v2577_v43, %v2548_v48 }
0x212c   :  { %2581 = vrot.lane.b32.xlu0 %v2579_v46, %s4177_s19 }
0x214b   :  { %v2325_v54 = vpop.f32.mrf.mxu2 }
0x214c   :  { %v2329_v11 = vrot.slane %v2325_v54, 6 }
0x214e   :  { %v2331_v49 = vadd.f32 %v2329_v11, %v4731_v12 }
0x2150   :  { %3968 = vtanh.f32 %v2331_v49  ;;  %v3624_v23 = vmul.f32 -1.442695, %v2331_v49 }
0x2152   :  { %3970 = vpow2.f32 %v3624_v23 }
0x2156   :  { %v3969_v13 = vpop.eup %3968 }
0x2157   :  { %2406 = vrot.lane.b32.xlu0 %v3969_v13, %s4184_s6 }
0x2158   :  { %v3971_v55 = vpop.eup %3970 }
0x2159   :  { %v2364_v40 = vadd.f32 1.0, %v3971_v55 }
0x215b   :  { %v2376_v58 = vand.u32 2147483648, %v2364_v40  ;;  %vm2370_vm3 = vweird.f32 %v2364_v40  ;;  %v2374_v63 = vand.u32 2147483647, %v2364_v40 }
0x215d   :  { %v2377_v8 = vor.u32 1.1754944e-38, %v2376_v58  ;;  %vm2375_vm5 = vcmp.eq.f32.partialorder %v2374_v63, 8.507059e+37 }
0x219e   :  { %v2582_v28 = vpop.permute.xlu0 %2581 }
0x219f   :  { %v4898_v30 = vadd.f32 %v2582_v28, %v2574_v19 }
0x21a1   :  { %3972 = vtanh.f32 %v4898_v30  ;;  %v2719_v23 = vrot.slane %v4898_v30, 2 }
0x21a2   :  { %3974 = vrcp.f32 %v2364_v40 }
0x21a7   :  { %v3973_v56 = vpop.eup %3972 }
0x21a8   :  { %2587 = vrot.lane.b32.xlu1 %v3973_v56, %s4184_s6  ;;  %v3975_v59 = vpop.eup %3974 }
0x21a9   :  { %v2366_v60 = vmul.f32 %v3975_v59, %v2364_v40  ;;  %vm2371_vm2 = vweird.f32 %v3975_v59 }
0x21aa   :  { %vm2372_vm4 = vmor %vm2370_vm3, %vm2371_vm2  ;;  %vm3020_vm3 = vcmask 9216  }
0x21ab   :  { %v2367_v27 = vsub.f32 1.0, %v2366_v60 }
0x21ad   :  { %v2368_v61 = vmul.f32 %v3975_v59, %v2367_v27 }
0x21af   :  { %v2369_v41 = vadd.f32 %v3975_v59, %v2368_v61 }
0x21b1   :  { %v2373_v0 = vsel %vm2372_vm4, %v3975_v59, %v2369_v41 }
0x21b2   :  { %v2378_v34 = vsel %vm2375_vm5, %v2377_v8, %v2373_v0 }
0x21b3   :  { %v2404_v6 = vmul.f32 %v2402_v31, %v2378_v34 }
0x21c9   :  { %v2407_v57 = vpop.permute.xlu0 %2406 }
0x21ca   :  { %v2409_v1 = vmul.f32 %v2407_v57, %v2378_v34 }
0x21cc   :  { %2411 = vrot.lane.b32.xlu1 %v2409_v1, %s4177_s19 }
0x221a   :  { %v2588_v33 = vpop.permute.xlu1 %2587 }
0x221b   :  { %v2590_v9 = vmul.f32 %v2588_v33, %v2548_v48 }
0x221d   :  { %v2632_v42 = vrot.slane %v2590_v9, 2 }
0x221f   :  { %2633 = vrot.lane.b32.xlu2 %v2632_v42, %s4177_s19 }
0x223e   :  { %v2412_v47 = vpop.permute.xlu1 %2411 }
0x223f   :  { %v4905_v4 = vadd.f32 %v2412_v47, %v2404_v6 }
0x2241   :  { %3976 = vtanh.f32 %v4905_v4 }
0x2247   :  { %v3977_v36 = vpop.eup %3976 }
0x2248   :  { %2417 = vrot.lane.b32.xlu2 %v3977_v36, %s4184_s6 }
0x2279   :  { %v2634_v7 = vpop.permute.xlu2 %2633 }
0x227a   :  { %3631 = vmatmul.msk.f32.vlgmr.msra.gmra.mxu3 %vm219_vm9, %v2634_v7  ;;  %v2552_v7 = vrot.slane %v4905_v4, 6  ;;  %v2770_v4 = vld [vmem:[%s5391_s11 + $0x28] sm:$0xff] }
0x22a2   :  { %v2418_v3 = vpop.permute.xlu2 %2417 }
0x22a3   :  { %v4910_v20 = vmul.f32 %v2418_v3, %v2378_v34 }
0x22a5   :  { %v2453_v26 = vrot.slane %v4910_v20, 2 }
0x22a7   :  { %2454 = vrot.lane.b32.xlu0 %v2453_v26, %s4177_s19 }
0x22fd   :  { %v2654_v51 = vpop.f32.mrf.mxu3 }
0x22fe   :  { %v2657_v10 = vadd.f32 %v2654_v51, %v4728_v45 }
0x2300   :  { %3978 = vtanh.f32 %v2657_v10  ;;  %v3633_v44 = vmul.f32 -1.442695, %v2657_v10 }
0x2302   :  { %3980 = vpow2.f32 %v3633_v44  ;;  %v2768_v44 = vld [vmem:[%s5391_s11 + $0x18] sm:$0xff] }
0x2303   :  { %2866 = vmatpush.msrb.mxu1 %v2768_v44 }
0x2306   :  { %v3979_v53 = vpop.eup %3978 }
0x2307   :  { %2723 = vrot.lane.b32.xlu1 %v3979_v53, %s4184_s6  ;;  %v2771_v53 = vld [vmem:[%s5391_s11 + $0x30] sm:$0xff] }
0x2308   :  { %v3981_v5 = vpop.eup %3980 }
0x2309   :  { %v2681_v21 = vadd.f32 1.0, %v3981_v5  ;;  %v2767_v5 = vld [vmem:[%s5391_s11 + $0x10] sm:$0xff] }
0x230a   :  { %2867 = vmatpush.msrb.mxu1 %v2767_v5 }
0x230b   :  { %3982 = vrcp.f32 %v2681_v21  ;;  %v2693_v38 = vand.u32 2147483648, %v2681_v21  ;;  %vm2687_vm7 = vweird.f32 %v2681_v21  ;;  %v2691_v45 = vand.u32 2147483647, %v2681_v21 }
0x230d   :  { %v2694_v48 = vor.u32 1.1754944e-38, %v2693_v38  ;;  %vm2692_vm14 = vcmp.eq.f32.partialorder %v2691_v45, 8.507059e+37 }
0x2311   :  { %v3983_v14 = vpop.eup %3982 }
0x2312   :  { %v2683_v24 = vmul.f32 %v3983_v14, %v2681_v21  ;;  %vm2688_vm6 = vweird.f32 %v3983_v14  ;;  %v2766_v21 = vld [vmem:[%s5391_s11 + $0x8] sm:$0xff] }
0x2313   :  { %vm2689_vm8 = vmor %vm2687_vm7, %vm2688_vm6  ;;  %2868 = vmatpush.msrb.mxu1 %v2766_v21 }
0x2314   :  { %v2684_v16 = vsub.f32 1.0, %v2683_v24 }
0x2316   :  { %v2685_v52 = vmul.f32 %v3983_v14, %v2684_v16 }
0x2318   :  { %v2686_v25 = vadd.f32 %v3983_v14, %v2685_v52 }
0x2319   :  { %v2455_v35 = vpop.permute.xlu0 %2454 }
0x231a   :  { %3626 = vmatmul.msk.f32.vlgmr.msra.gmra.mxu0 %vm219_vm9, %v2455_v35  ;;  %v2690_v37 = vsel %vm2689_vm8, %v3983_v14, %v2686_v25  ;;  %v2769_v35 = vld [vmem:[%s5391_s11 + $0x20] sm:$0xff]  ;;  %v2749_v25 = vld [vmem:[#allocation4] sm:$0x3] }
0x231b   :  { %v2695_v43 = vsel %vm2692_vm14, %v2694_v48, %v2690_v37  ;;  %v2765_v14 = vld [vmem:[%s5391_s11] sm:$0xff] }
0x231c   :  { %v2721_v19 = vmul.f32 %v2719_v23, %v2695_v43  ;;  %2869 = vmatpush.msrb.mxu1 %v2765_v14 }
0x2379   :  { %v2724_v46 = vpop.permute.xlu1 %2723 }
0x237a   :  { %v2726_v54 = vmul.f32 %v2724_v46, %v2695_v43 }
0x237c   :  { %2728 = vrot.lane.b32.xlu2 %v2726_v54, %s4177_s19 }
0x2384   :  { %2301 = vrot.lane.b32.xlu2 %v4853_v32, %s4177_s19 }
0x2397   :  { %v2475_v11 = vpop.f32.mrf.mxu0 }
0x2398   :  { %v2479_v49 = vrot.slane %v2475_v11, 4 }
0x239a   :  { %v2481_v13 = vadd.f32 %v2479_v49, %v4731_v12  ;;  %v4980_v49 = vld [vmem:[%s5392_s12] ss:$0 sm:$0xff] }
0x239c   :  { %3984 = vtanh.f32 %v2481_v13  ;;  %v3628_v59 = vmul.f32 -1.442695, %v2481_v13 }
0x23a2   :  { %v3985_v15 = vpop.eup %3984 }
0x23a3   :  { %2556 = vrot.lane.b32.xlu1 %v3985_v15, %s4184_s6 }
0x23ab   :  { %2598 = vrot.lane.b32.xlu1 %v2590_v9, %s4177_s19 }
0x23b3   :  { %2004 = vrot.lane.b32.xlu1 %v4831_v39, %s4177_s19 }
0x23d6   :  { %v2729_v28 = vpop.permute.xlu2 %2728 }
0x23d7   :  { %v2731_v55 = vadd.f32 %v2729_v28, %v2721_v19 }
0x23d9   :  { %3986 = vtanh.f32 %v2731_v55 }
0x23da   :  { %3988 = vpow2.f32 %v3628_v59 }
0x23de   :  { %v2302_v32 = vpop.permute.xlu2 %2301 }
0x23df   :  { %v3987_v56 = vpop.eup %3986  ;;  %2305 = vst.msk [vmem:[#allocation5] sm:$0xc0] %vm353_vm11, %v2302_v32 }
0x23e0   :  { %2734 = vrot.lane.b32.xlu0 %v3987_v56, %s4184_s6  ;;  %v3989_v39 = vpop.eup %3988 }
0x23e1   :  { %v2514_v30 = vadd.f32 1.0, %v3989_v39 }
0x23e3   :  { %3990 = vrcp.f32 %v2514_v30  ;;  %v2526_v63 = vand.u32 2147483648, %v2514_v30  ;;  %vm2520_vm0 = vweird.f32 %v2514_v30  ;;  %v2524_v0 = vand.u32 2147483647, %v2514_v30 }
0x23e5   :  { %v2527_v34 = vor.u32 1.1754944e-38, %v2526_v63  ;;  %vm2525_vm2 = vcmp.eq.f32.partialorder %v2524_v0, 8.507059e+37 }
0x23e6   :  { %v2760_v40 = vld [vmem:[#allocation5 + $0x6] sm:$0x3] }
0x23e7   :  { %2787 = vst [vmem:[#allocation1 + $0x3] ss:$4 sm:$0xff] %v2760_v40 }
0x23e8   :  { %2448 = vrot.lane.b32.xlu0 %v4879_v17, %s4177_s19 }
0x23e9   :  { %v3991_v60 = vpop.eup %3990 }
0x23ea   :  { %v2516_v27 = vmul.f32 %v3991_v60, %v2514_v30  ;;  %vm2521_vm15 = vweird.f32 %v3991_v60  ;;  %v4989_v30 = vld [vmem:[%s5395_s15] sm:$0x3] }
0x23eb   :  { %vm2522_vm1 = vmor %vm2520_vm0, %vm2521_vm15 }
0x23ec   :  { %v2517_v61 = vsub.f32 1.0, %v2516_v27 }
0x23ee   :  { %v2518_v41 = vmul.f32 %v3991_v60, %v2517_v61 }
0x23f0   :  { %1854 = vrot.lane.b32.xlu0 %v4805_v50, %s4177_s19  ;;  %v2519_v58 = vadd.f32 %v3991_v60, %v2518_v41 }
0x23f2   :  { %v2523_v8 = vsel %vm2522_vm1, %v3991_v60, %v2519_v58  ;;  %v3286_v60 = vsel %vm3020_vm3, %v4989_v30, -inf }
0x23f3   :  { %v2528_v17 = vsel %vm2525_vm2, %v2527_v34, %v2523_v8  ;;  %vm3289_vm2 = vcmask 1041408  }
0x23f4   :  { %v2554_v3 = vmul.f32 %v2552_v7, %v2528_v17 }
0x2415   :  { %v2557_v57 = vpop.permute.xlu1 %2556 }
0x2416   :  { %v2559_v1 = vmul.f32 %v2557_v57, %v2528_v17 }
0x2418   :  { %2561 = vrot.lane.b32.xlu0 %v2559_v1, %s4177_s19  ;;  %v3744_v1 = vld [vmem:[%s5393_s13] ss:$0 sm:$0xff] }
0x241d   :  { %v2599_v50 = vpop.permute.xlu1 %2598 }
0x241e   :  { %2602 = vst.msk [vmem:[#allocation5] sm:$0xc] %vm495_vm13, %v2599_v50 }
0x2425   :  { %v2758_v33 = vld [vmem:[#allocation5 + $0x2] sm:$0x3]  ;;  %v2005_v9 = vpop.permute.xlu1 %2004 }
0x2426   :  { %2783 = vst [vmem:[#allocation1 + $0x1] ss:$4 sm:$0xff] %v2758_v33 }
0x2427   :  { %2008 = vst.msk [vmem:[#allocation4] sm:$0x30] %vm502_vm12, %v2005_v9 }
0x242e   :  { %v2751_v48 = vld [vmem:[#allocation4 + $0x4] sm:$0x3] }
0x2452   :  { %v2735_v42 = vpop.permute.xlu0 %2734 }
0x2453   :  { %v2737_v31 = vmul.f32 %v2735_v42, %v2695_v43 }
0x2455   :  { %2745 = vrot.lane.b32.xlu2 %v2737_v31, %s4177_s19 }
0x245a   :  { %v2449_v6 = vpop.permute.xlu0 %2448 }
0x245b   :  { %2452 = vst.msk [vmem:[#allocation5] sm:$0x30] %vm502_vm12, %v2449_v6 }
0x245d   :  { %2151 = vrot.lane.b32.xlu2 %v4863_v18, %s4177_s19  ;;  %v2772_v18 = vld [vmem:[%s5391_s11 + $0x38] sm:$0xff] }
0x245e   :  { %2814 = vmatpush.msrb.mxu0 %v2772_v18  ;;  %v4186_v18 = vmov 0  }
0x245f   :  { %3679 = vset.pattern.permute.xlu0 %v4186_v18  ;;  %3681 = vset.pattern.permute.xlu1 %v4186_v18 }
0x2460   :  { %2815 = vmatpush.msrb.mxu0 %v2771_v53 }
0x2462   :  { %v2759_v47 = vld [vmem:[#allocation5 + $0x4] sm:$0x3]  ;;  %v1855_v36 = vpop.permute.xlu0 %1854  ;;  %2816 = vmatpush.msrb.mxu0 %v2770_v4 }
0x2463   :  { %2785 = vst [vmem:[#allocation1 + $0x2] ss:$4 sm:$0xff] %v2759_v47 }
0x2464   :  { %1858 = vst.msk [vmem:[#allocation4] sm:$0xc] %vm495_vm13, %v1855_v36  ;;  %2817 = vmatpush.msrb.mxu0 %v2769_v35 }
0x246b   :  { %v2750_v45 = vld [vmem:[#allocation4 + $0x2] sm:$0x3] }
0x248a   :  { %v2562_v26 = vpop.permute.xlu0 %2561 }
0x248b   :  { %v4941_v51 = vadd.f32 %v2562_v26, %v2554_v3 }
0x248d   :  { %3992 = vtanh.f32 %v4941_v51 }
0x2493   :  { %v3993_v10 = vpop.eup %3992 }
0x2494   :  { %2567 = vrot.lane.b32.xlu1 %v3993_v10, %s4184_s6  ;;  %v4185_v10 = vmov 1  }
0x2495   :  { %3680 = vset.pattern.permute.xlu2 %v4185_v10 }
0x24af   :  { %v2746_v24 = vpop.permute.xlu2 %2745 }
0x24b0   :  { %2748 = vst.msk [vmem:[#allocation5] sm:$0x3] %vm346_vm10, %v2746_v24  ;;  %vm2883_vm10 = vcmask 15360  }
0x24b7   :  { %v2757_v16 = vld [vmem:[#allocation5] sm:$0x3]  ;;  %v2152_v52 = vpop.permute.xlu2 %2151 }
0x24b8   :  { %2781 = vst [vmem:[#allocation1] ss:$4 sm:$0xff] %v2757_v16 }
0x24b9   :  { %2155 = vst.msk [vmem:[#allocation4] sm:$0xc0] %vm353_vm11, %v2152_v52 }
0x24bf   :  { %v2796_v38 = vld.sshfl [vmem:[#allocation1] sm:$0xff pattern:$0x73625140] }
0x24c0   :  { %v2752_v37 = vld [vmem:[#allocation4 + $0x6] sm:$0x3]  ;;  %3634 = vmatmul.msk.f32.vlgmr.msrb.gmra.mxu0 %vm219_vm9, %v2796_v38  ;;  %2833 = vst [vmem:[#allocation1] ss:$4 sm:$0xff] %v2749_v25 }
0x24c1   :  { %2835 = vst [vmem:[#allocation1 + $0x1] ss:$4 sm:$0xff] %v2750_v45 }
0x24c2   :  { %2837 = vst [vmem:[#allocation1 + $0x2] ss:$4 sm:$0xff] %v2751_v48  ;;  %v5012_v48 = vld [vmem:[%s5382_s2 + $0x2] sm:$0x3] }
0x24c3   :  { %2839 = vst [vmem:[#allocation1 + $0x3] ss:$4 sm:$0xff] %v2752_v37  ;;  %vm3326_vm1 = vcmp.gt.f32.partialorder %v5012_v48, 0.5 }
0x24ca   :  { %v2848_v43 = vld.sshfl [vmem:[#allocation1] sm:$0xff pattern:$0x73625140] }
0x24cb   :  { %3636 = vmatmul.msk.f32.vlgmr.msrb.gmra.mxu1 %vm219_vm9, %v2848_v43 }
0x2506   :  { %v2568_v46 = vpop.permute.xlu1 %2567 }
0x2507   :  { %v4973_v54 = vmul.f32 %v2568_v46, %v2528_v17  ;;  %v3327_v46 = vsel %vm3326_vm1, 1, %v4186_v18 }
0x2509   :  { %v2603_v11 = vrot.slane %v4973_v54, 4 }
0x250b   :  { %2604 = vrot.lane.b32.xlu2 %v2603_v11, %s4177_s19 }
0x253d   :  { %v2819_v13 = vpop.f32.mrf.mxu0 }
0x2548   :  { %v2871_v15 = vpop.f32.mrf.mxu1 }
0x2549   :  { %v2872_v23 = vadd.f32 %v2871_v15, %v2819_v13 }
0x254b   :  { %v2881_v19 = vadd.f32 %v4980_v49, %v2872_v23 }
0x254d   :  { %v2884_v28 = vsel %vm2883_vm10, %v2881_v19, -inf }
0x254e   :  { %2885 = vmax.xlane.f32.xlu0 %v2884_v28 }
0x2556   :  { %3287 = vmax.xlane.f32.xlu0 %v3286_v60 }
0x2565   :  { %v2605_v55 = vpop.permute.xlu2 %2604 }
0x2566   :  { %3630 = vmatmul.msk.f32.vlgmr.msra.gmra.mxu2 %vm219_vm9, %v2605_v55 }
0x25c1   :  { %v2886_v32 = vpop.xlane.xlu0 %2885 }
0x25c2   :  { %v2890_v56 = vsub.f32 %v2881_v19, %v2886_v32 }
0x25c4   :  { %v2892_v40 = vmul.f32 1.442695, %v2890_v56 }
0x25c6   :  { %3994 = vpow2.f32 %v2892_v40 }
0x25c9   :  { %v3288_v11 = vpop.xlane.xlu0 %3287 }
0x25ca   :  { %v3290_v13 = vsel %vm3289_vm2, %v3288_v11, -inf  ;;  %vm3159_vm2 = vcmask 1024  }
0x25cb   :  { %v3291_v15 = vrot.slane %v3290_v13, 4 }
0x25cc   :  { %v3995_v59 = vpop.eup %3994 }
0x25cd   :  { %v2896_v39 = vsel %vm2883_vm10, %v3995_v59, 0.0  ;;  %v3292_v23 = vmax.f32 %v3290_v13, %v3291_v15 }
0x25ce   :  { %2897 = vadd.xlane.f32.xlu1 %v2896_v39 }
0x25cf   :  { %v3293_v19 = vrot.slane %v3292_v23, 2 }
0x25d1   :  { %v3294_v28 = vmax.f32 %v3292_v23, %v3293_v19 }
0x25d3   :  { %v3295_v55 = vrot.slane %v3294_v28, 1 }
0x25d5   :  { %v5021_v32 = vmax.f32 %v3294_v28, %v3295_v55 }
0x25d7   :  { %v3297_v56 = vsub.f32 %v4989_v30, %v5021_v32 }
0x25d9   :  { %v3298_v40 = vmul.f32 1.442695, %v3297_v56 }
0x25e9   :  { %v2625_v31 = vpop.f32.mrf.mxu2 }
0x25ea   :  { %v2629_v6 = vrot.slane %v2625_v31, 2 }
0x25ec   :  { %v2631_v47 = vadd.f32 %v2629_v6, %v4731_v12 }
0x25ee   :  { %v3632_v7 = vmul.f32 -1.442695, %v2631_v47 }
0x2641   :  { %v2898_v27 = vpop.xlane.xlu1 %2897 }
0x2642   :  { %3996 = vrcp.f32 %v2898_v27  ;;  %v2913_v63 = vand.u32 2147483648, %v2898_v27  ;;  %v2911_v8 = vand.u32 2147483647, %v2898_v27  ;;  %vm2907_vm5 = vweird.f32 %v2898_v27 }
0x2643   :  { %3998 = vtanh.f32 %v2631_v47 }
0x2644   :  { %v2914_v17 = vor.u32 1.1754944e-38, %v2913_v63  ;;  %vm2912_vm7 = vcmp.eq.f32.partialorder %v2911_v8, 8.507059e+37  ;;  %4000 = vpow2.f32 %v3632_v7 }
0x2648   :  { %v3997_v61 = vpop.eup %3996 }
0x2649   :  { %v2903_v41 = vmul.f32 %v3997_v61, %v2898_v27  ;;  %vm2908_vm4 = vweird.f32 %v3997_v61  ;;  %v3999_v36 = vpop.eup %3998 }
0x264a   :  { %vm2909_vm6 = vmor %vm2907_vm5, %vm2908_vm4  ;;  %v4001_v3 = vpop.eup %4000 }
0x264b   :  { %v2904_v58 = vsub.f32 1.0, %v2903_v41  ;;  %v2661_v26 = vadd.f32 1.0, %v4001_v3 }
0x264d   :  { %v2905_v0 = vmul.f32 %v3997_v61, %v2904_v58  ;;  %4002 = vrcp.f32 %v2661_v26  ;;  %v2673_v14 = vand.u32 2147483648, %v2661_v26  ;;  %vm2667_vm14 = vweird.f32 %v2661_v26 }
0x264e   :  { %v2671_v16 = vand.u32 2147483647, %v2661_v26 }
0x264f   :  { %v2906_v34 = vadd.f32 %v3997_v61, %v2905_v0  ;;  %v2674_v25 = vor.u32 1.1754944e-38, %v2673_v14 }
0x2650   :  { %vm2672_vm0 = vcmp.eq.f32.partialorder %v2671_v16, 8.507059e+37 }
0x2651   :  { %v2910_v57 = vsel %vm2909_vm6, %v3997_v61, %v2906_v34 }
0x2652   :  { %v2915_v50 = vsel %vm2912_vm7, %v2914_v17, %v2910_v57 }
0x2653   :  { %v4996_v33 = vmul.f32 %v3995_v59, %v2915_v50  ;;  %v4003_v53 = vpop.eup %4002 }
0x2654   :  { %v2663_v4 = vmul.f32 %v4003_v53, %v2661_v26  ;;  %vm2668_vm8 = vweird.f32 %v4003_v53 }
0x2655   :  { %v4999_v9 = vadd.f32 %v3744_v1, %v4996_v33  ;;  %vm2669_vm15 = vmor %vm2667_vm14, %vm2668_vm8  ;;  %v2934_v31 = vrot.slane %v4996_v33, 2 }
0x2656   :  { %v2664_v12 = vsub.f32 1.0, %v2663_v4 }
0x2657   :  { %v3300_v42 = vsel %vm3020_vm3, %v4999_v9, -inf }
0x2658   :  { %3301 = vmax.xlane.f32.xlu2 %v3300_v42  ;;  %v2665_v35 = vmul.f32 %v4003_v53, %v2664_v12 }
0x265a   :  { %v2666_v21 = vadd.f32 %v4003_v53, %v2665_v35 }
0x265c   :  { %v2670_v52 = vsel %vm2669_vm15, %v4003_v53, %v2666_v21 }
0x265d   :  { %v2675_v38 = vsel %vm2672_vm0, %v2674_v25, %v2670_v52  ;;  %v5055_v25 = vld [vmem:[%s5382_s2 + $0x4] sm:$0x3] }
0x2670   :  { %2703 = vrot.lane.b32.xlu2 %v3999_v36, %s4184_s6 }
0x26cb   :  { %v3302_v44 = vpop.xlane.xlu2 %3301 }
0x26cc   :  { %v3303_v5 = vsub.f32 %v4999_v9, %v3302_v44  ;;  %v3321_v57 = vadd.f32 %v3302_v44, %v5021_v32 }
0x26ce   :  { %v3304_v24 = vmul.f32 1.442695, %v3303_v5  ;;  %v2753_v5 = vld [vmem:[#allocation4 + $0x8] sm:$0x3] }
0x26d0   :  { %4004 = vpow2.f32 %v3304_v24 }
0x26d1   :  { %4006 = vpow2.f32 %v3298_v40  ;;  %v2935_v40 = vrot.slane %v4996_v33, 4 }
0x26d3   :  { %v2704_v45 = vpop.permute.xlu2 %2703 }
0x26d4   :  { %v2706_v37 = vmul.f32 %v2704_v45, %v2675_v38 }
0x26d6   :  { %v4005_v43 = vpop.eup %4004  ;;  %2708 = vrot.lane.b32.xlu1 %v2706_v37, %s4177_s19 }
0x26d7   :  { %3315 = vperm.xlu2 %3680, %v4005_v43   ;;  %3308 = vperm.xlu0 %3679, %v4005_v43   ;;  %v4007_v59 = vpop.eup %4006 }
0x26d8   :  { %v5026_v39 = vperm.slane %v4007_v59, 1  ;;  %v5028_v61 = vperm.slane %v4007_v59, 0 }
0x26de   :  { %3329 = vperm.xlu1 %3681, %v3327_v46  }
0x26df   :  { %2010 = vrot.lane.b32.xlu0 %v4791_v29, %s4177_s19  ;;  %v2699_v29 = vrot.slane %v4941_v51, 6 }
0x26e1   :  { %v2701_v60 = vmul.f32 %v2699_v29, %v2675_v38 }
0x26e7   :  { %2592 = vrot.lane.b32.xlu0 %v4973_v54, %s4177_s19 }
0x2731   :  { %v3316_v54 = vpop.permute.xlu2 %3315 }
0x2732   :  { %v3319_v63 = vmul.f32 %v5026_v39, %v3316_v54 }
0x2748   :  { %v2709_v27 = vpop.permute.xlu1 %2708 }
0x2749   :  { %v2711_v41 = vadd.f32 %v2709_v27, %v2701_v60  ;;  %v3309_v58 = vpop.permute.xlu0 %3308  ;;  %v5073_v27 = vld [vmem:[%s5382_s2 + $0x6] sm:$0x3] }
0x274a   :  { %v3312_v0 = vmul.f32 %v5028_v61, %v3309_v58 }
0x274b   :  { %4008 = vtanh.f32 %v2711_v41 }
0x274c   :  { %v3320_v8 = vadd.f32 %v3319_v63, %v3312_v0 }
0x274e   :  { %4010 = vlog2.f32 %v3320_v8 }
0x2750   :  { %v3330_v50 = vpop.permute.xlu1 %3329 }
0x2751   :  { %v4009_v34 = vpop.eup %4008  ;;  %v2011_v17 = vpop.permute.xlu0 %2010  ;;  %vm3331_vm4 = vcmp.eq.s32.totalorder %v3330_v50, 1 }
0x2752   :  { %2014 = vst.msk [vmem:[#allocation5 + $0x8] sm:$0xc] %vm495_vm13, %v2011_v17  ;;  %2714 = vrot.lane.b32.xlu2 %v4009_v34, %s4184_s6 }
0x2754   :  { %v4011_v51 = vpop.eup %4010 }
0x2755   :  { %v3323_v1 = vmul.f32 0.6931472, %v4011_v51 }
0x2757   :  { %v3324_v42 = vadd.f32 %v3323_v1, %v3321_v57 }
0x2759   :  { %v2762_v6 = vld [vmem:[#allocation5 + $0xa] sm:$0x3]  ;;  %v2593_v47 = vpop.permute.xlu0 %2592  ;;  %v3325_v36 = vadd.f32 %v3324_v42, %v2934_v31 }
0x275a   :  { %2791 = vst [vmem:[#allocation1 + $0x21] ss:$4 sm:$0xff] %v2762_v6  ;;  %1713 = vrot.lane.b32.xlu2 %v4739_v2, %s4177_s19 }
0x275b   :  { %2596 = vst.msk [vmem:[#allocation4 + $0x8] sm:$0x30] %vm502_vm12, %v2593_v47  ;;  %v3332_v7 = vsel %vm3331_vm4, %v3325_v36, %v4999_v9 }
0x275c   :  { %v3333_v3 = vsel %vm3020_vm3, %v3332_v7, -inf }
0x275d   :  { %3334 = vmax.xlane.f32.xlu1 %v3333_v3 }
0x2762   :  { %1860 = vrot.lane.b32.xlu2 %v4760_v62, %s4177_s19  ;;  %v2755_v21 = vld [vmem:[#allocation4 + $0xc] sm:$0x3] }
0x276a   :  { %2442 = vrot.lane.b32.xlu2 %v4910_v20, %s4177_s19 }
0x27ac   :  { %v2715_v26 = vpop.permute.xlu2 %2714 }
0x27ad   :  { %v2717_v53 = vmul.f32 %v2715_v26, %v2675_v38 }
0x27af   :  { %2739 = vrot.lane.b32.xlu2 %v2717_v53, %s4177_s19 }
0x27b4   :  { %v1714_v4 = vpop.permute.xlu2 %1713 }
0x27b5   :  { %1717 = vst.msk [vmem:[#allocation5 + $0x8] sm:$0xc0] %vm353_vm11, %v1714_v4 }
0x27bc   :  { %v2764_v2 = vld [vmem:[#allocation5 + $0xe] sm:$0x3]  ;;  %v1861_v12 = vpop.permute.xlu2 %1860 }
0x27bd   :  { %2795 = vst [vmem:[#allocation1 + $0x23] ss:$4 sm:$0xff] %v2764_v2  ;;  %v2936_v2 = vrot.slane %v4996_v33, 6 }
0x27be   :  { %1864 = vst.msk [vmem:[#allocation5 + $0x8] sm:$0x30] %vm502_vm12, %v1861_v12  ;;  %vm3357_vm12 = vcmp.gt.f32.partialorder %v5055_v25, 0.5 }
0x27bf   :  { %v3358_v38 = vsel %vm3357_vm12, 1, %v4186_v18 }
0x27c4   :  { %v2443_v35 = vpop.permute.xlu2 %2442 }
0x27c5   :  { %v2763_v44 = vld [vmem:[#allocation5 + $0xc] sm:$0x3]  ;;  %2446 = vst.msk [vmem:[#allocation4 + $0x8] sm:$0xc] %vm495_vm13, %v2443_v35 }
0x27c6   :  { %2793 = vst [vmem:[#allocation1 + $0x22] ss:$4 sm:$0xff] %v2763_v44 }
0x27cc   :  { %v2754_v62 = vld [vmem:[#allocation4 + $0xa] sm:$0x3] }
0x27cd   :  { %v2797_v20 = vld.sshfl [vmem:[#allocation1 + $0x20] sm:$0xff pattern:$0x73625140] }
0x27ce   :  { %3635 = vmatmul.msk.f32.gmra.mxu0 %vm219_vm9, %v2797_v20  ;;  %2841 = vst [vmem:[#allocation1 + $0x20] ss:$4 sm:$0xff] %v2753_v5 }
0x27cf   :  { %2843 = vst [vmem:[#allocation1 + $0x21] ss:$4 sm:$0xff] %v2754_v62 }
0x27d0   :  { %2845 = vst [vmem:[#allocation1 + $0x22] ss:$4 sm:$0xff] %v2755_v21  ;;  %v3335_v14 = vpop.xlane.xlu1 %3334 }
0x27d1   :  { %v3336_v24 = vsub.f32 %v3332_v7, %v3335_v14  ;;  %v3352_v28 = vadd.f32 %v3335_v14, %v5021_v32  ;;  %v5093_v14 = vld [vmem:[%s5382_s2 + $0x8] sm:$0x3] }
0x27d2   :  { %vm3419_vm5 = vcmp.gt.f32.partialorder %v5093_v14, 0.5 }
0x27d3   :  { %v3337_v16 = vmul.f32 1.442695, %v3336_v24  ;;  %v3420_v24 = vsel %vm3419_vm5, 1, %v4186_v18 }
0x27d5   :  { %4012 = vpow2.f32 %v3337_v16  ;;  %v5100_v16 = vld [vmem:[%s5382_s2 + $0xa] sm:$0x3] }
0x27d6   :  { %vm3450_vm6 = vcmp.gt.f32.partialorder %v5100_v16, 0.5 }
0x27db   :  { %v4013_v52 = vpop.eup %4012 }
0x27dc   :  { %3347 = vperm.xlu2 %3680, %v4013_v52   ;;  %3341 = vperm.xlu0 %3679, %v4013_v52   ;;  %v3451_v52 = vsel %vm3450_vm6, 1, %v4186_v18 }
0x27e4   :  { %3360 = vperm.xlu0 %3679, %v3358_v38   ;;  %3682 = vset.pattern.permute.xlu2 %v4186_v18  ;;  %v2948_v38 = vld [vmem:[%s5381_s1] sm:$0x3] }
0x27ec   :  { %3683 = vset.pattern.permute.xlu0 %v4185_v10 }
0x2809   :  { %v2740_v45 = vpop.permute.xlu2 %2739 }
0x280a   :  { %2743 = vst.msk [vmem:[#allocation4 + $0x8] sm:$0xc0] %vm353_vm11, %v2740_v45  ;;  %vm3388_vm11 = vcmp.gt.f32.partialorder %v5073_v27, 0.5  ;;  %v2950_v45 = vld [vmem:[%s5381_s1 + $0x4] sm:$0x3] }
0x280b   :  { %v3389_v41 = vsel %vm3388_vm11, 1, %v4186_v18 }
0x2811   :  { %v2756_v37 = vld [vmem:[#allocation4 + $0xe] sm:$0x3] }
0x2812   :  { %2847 = vst [vmem:[#allocation1 + $0x23] ss:$4 sm:$0xff] %v2756_v37  ;;  %v2951_v37 = vld [vmem:[%s5381_s1 + $0x6] sm:$0x3] }
0x2819   :  { %v2849_v43 = vld.sshfl [vmem:[#allocation1 + $0x20] sm:$0xff pattern:$0x73625140] }
0x281a   :  { %3637 = vmatmul.msk.f32.gmra.mxu1 %vm219_vm9, %v2849_v43  ;;  %v2954_v43 = vld [vmem:[%s5381_s1 + $0xc] sm:$0x3] }
0x2836   :  { %v3348_v46 = vpop.permute.xlu2 %3347 }
0x2837   :  { %v3350_v13 = vmul.f32 %v3348_v46, %v5026_v39 }
0x284b   :  { %v2822_v17 = vpop.f32.mrf.mxu0 }
0x284e   :  { %v3342_v11 = vpop.permute.xlu0 %3341 }
0x284f   :  { %v3344_v15 = vmul.f32 %v3342_v11, %v5028_v61 }
0x2851   :  { %v3351_v23 = vadd.f32 %v3350_v13, %v3344_v15 }
0x2853   :  { %4014 = vlog2.f32 %v3351_v23 }
0x2856   :  { %v3361_v59 = vpop.permute.xlu0 %3360 }
0x2857   :  { %vm3362_vm9 = vcmp.eq.s32.totalorder %v3361_v59, 1 }
0x2859   :  { %v4015_v19 = vpop.eup %4014 }
0x285a   :  { %v3354_v55 = vmul.f32 0.6931472, %v4015_v19 }
0x285c   :  { %v3355_v56 = vadd.f32 %v3354_v55, %v3352_v28 }
0x285e   :  { %v3356_v29 = vadd.f32 %v3355_v56, %v2935_v40 }
0x2860   :  { %v3363_v54 = vsel %vm3362_vm9, %v3356_v29, %v3332_v7 }
0x2861   :  { %v3364_v60 = vsel %vm3020_vm3, %v3363_v54, -inf }
0x2862   :  { %3365 = vmax.xlane.f32.xlu1 %v3364_v60 }
0x287b   :  { %3391 = vperm.xlu1 %3681, %v3389_v41  }
0x2897   :  { %v2874_v34 = vpop.f32.mrf.mxu1 }
0x2898   :  { %v2875_v51 = vadd.f32 %v2874_v34, %v2822_v17 }
0x289a   :  { %v2882_v57 = vadd.f32 %v4980_v49, %v2875_v51 }
0x289c   :  { %v2887_v1 = vsel %vm2883_vm10, %v2882_v57, -inf }
0x28d5   :  { %v3366_v58 = vpop.xlane.xlu1 %3365 }
0x28d6   :  { %v3367_v63 = vsub.f32 %v3363_v54, %v3366_v58  ;;  %v3383_v3 = vadd.f32 %v3366_v58, %v5021_v32 }
0x28d8   :  { %v3368_v0 = vmul.f32 1.442695, %v3367_v63 }
0x28da   :  { %4016 = vpow2.f32 %v3368_v0 }
0x28e0   :  { %v4017_v8 = vpop.eup %4016 }
0x28e1   :  { %3378 = vperm.xlu0 %3683, %v4017_v8   ;;  %3372 = vperm.xlu2 %3682, %v4017_v8  }
0x28ed   :  { %v3392_v53 = vpop.permute.xlu1 %3391 }
0x28ee   :  { %vm3393_vm13 = vcmp.eq.s32.totalorder %v3392_v53, 1 }
0x290a   :  { %2888 = vmax.xlane.f32.xlu2 %v2887_v1 }
0x293b   :  { %v3373_v50 = vpop.permute.xlu2 %3372 }
0x293c   :  { %v3375_v6 = vmul.f32 %v3373_v50, %v5028_v61 }
0x2953   :  { %v3379_v42 = vpop.permute.xlu0 %3378 }
0x2954   :  { %v3381_v47 = vmul.f32 %v3379_v42, %v5026_v39 }
0x2956   :  { %v3382_v36 = vadd.f32 %v3381_v47, %v3375_v6 }
0x2958   :  { %4018 = vlog2.f32 %v3382_v36 }
0x295e   :  { %v4019_v7 = vpop.eup %4018 }
0x295f   :  { %v3385_v26 = vmul.f32 0.6931472, %v4019_v7 }
0x2961   :  { %v3386_v4 = vadd.f32 %v3385_v26, %v3383_v3 }
0x2963   :  { %v3387_v49 = vadd.f32 %v3386_v4, %v2936_v2 }
0x2965   :  { %v5085_v12 = vsel %vm3393_vm13, %v3387_v49, %v3363_v54  ;;  %v2949_v49 = vld [vmem:[%s5381_s1 + $0x2] sm:$0x3] }
0x2966   :  { %v3395_v35 = vsel %vm3020_vm3, %v5085_v12, -inf }
0x2967   :  { %3396 = vmax.xlane.f32.xlu0 %v3395_v35 }
0x297d   :  { %v2889_v44 = vpop.xlane.xlu2 %2888 }
0x297e   :  { %v2891_v62 = vsub.f32 %v2882_v57, %v2889_v44 }
0x2980   :  { %v2894_v5 = vmul.f32 1.442695, %v2891_v62 }
0x2982   :  { %4020 = vpow2.f32 %v2894_v5 }
0x2988   :  { %v4021_v20 = vpop.eup %4020 }
0x2989   :  { %v2899_v21 = vsel %vm2883_vm10, %v4021_v20, 0.0 }
0x298a   :  { %2900 = vadd.xlane.f32.xlu1 %v2899_v21 }
0x29a3   :  { %3422 = vperm.xlu1 %3681, %v3420_v24  }
0x29ab   :  { %3453 = vperm.xlu1 %3681, %v3451_v52  }
0x29b3   :  { %2957 = vperm.xlu1 %3681, %v2948_v38  }
0x29bb   :  { %2963 = vperm.xlu1 %3681, %v2950_v45  }
0x29c3   :  { %2966 = vperm.xlu1 %3681, %v2951_v37  }
0x29cb   :  { %2975 = vperm.xlu1 %3681, %v2954_v43  }
0x29d3   :  { %3687 = vset.pattern.permute.xlu1 %v4185_v10 }
0x29da   :  { %v3397_v46 = vpop.xlane.xlu0 %3396 }
0x29db   :  { %v3398_v11 = vsub.f32 %v5085_v12, %v3397_v46  ;;  %v3414_v57 = vadd.f32 %v3397_v46, %v5021_v32 }
0x29dd   :  { %v3399_v13 = vmul.f32 1.442695, %v3398_v11 }
0x29df   :  { %4022 = vpow2.f32 %v3399_v13  ;;  %v2952_v13 = vld [vmem:[%s5381_s1 + $0x8] sm:$0x3] }
0x29e5   :  { %v4023_v15 = vpop.eup %4022 }
0x29e6   :  { %3409 = vperm.xlu0 %3683, %v4023_v15   ;;  %3403 = vperm.xlu2 %3682, %v4023_v15   ;;  %v2946_v15 = vlaneseq }
0x29ee   :  { %3684 = vset.pattern.permute.xlu0 %v4186_v18 }
0x29fd   :  { %v2901_v23 = vpop.xlane.xlu1 %2900 }
0x29fe   :  { %4024 = vrcp.f32 %v2901_v23  ;;  %v2928_v63 = vand.u32 2147483648, %v2901_v23  ;;  %vm2922_vm7 = vweird.f32 %v2901_v23  ;;  %v2926_v0 = vand.u32 2147483647, %v2901_v23 }
0x2a00   :  { %v2929_v34 = vor.u32 1.1754944e-38, %v2928_v63  ;;  %vm2927_vm14 = vcmp.eq.f32.partialorder %v2926_v0, 8.507059e+37 }
0x2a04   :  { %v4025_v19 = vpop.eup %4024 }
0x2a05   :  { %v2918_v28 = vmul.f32 %v4025_v19, %v2901_v23  ;;  %vm2923_vm10 = vweird.f32 %v4025_v19  ;;  %v5149_v23 = vand.u32 127, %v2946_v15 }
0x2a06   :  { %vm2924_vm8 = vmor %vm2922_vm7, %vm2923_vm10 }
0x2a07   :  { %v2919_v55 = vsub.f32 1.0, %v2918_v28 }
0x2a09   :  { %v2920_v59 = vmul.f32 %v4025_v19, %v2919_v55 }
0x2a0b   :  { %v2921_v58 = vadd.f32 %v4025_v19, %v2920_v59  ;;  %v3004_v59 = vld [vmem:[%s5382_s2] sm:$0x3] }
0x2a0d   :  { %v2925_v8 = vsel %vm2924_vm8, %v4025_v19, %v2921_v58 }
0x2a0e   :  { %v2930_v51 = vsel %vm2927_vm14, %v2929_v34, %v2925_v8  ;;  %v3179_v8 = vsel %vm3159_vm2, %v5073_v27, 0.0 }
0x2a0f   :  { %v5122_v50 = vmul.f32 %v4021_v20, %v2930_v51 }
0x2a11   :  { %v2937_v37 = vrot.slane %v5122_v50, 2 }
0x2a15   :  { %v3423_v42 = vpop.permute.xlu1 %3422 }
0x2a16   :  { %vm3424_vm15 = vcmp.eq.s32.totalorder %v3423_v42, 1 }
0x2a1d   :  { %v3454_v38 = vpop.permute.xlu1 %3453 }
0x2a1e   :  { %vm3455_vm0 = vcmp.eq.s32.totalorder %v3454_v38, 1 }
0x2a25   :  { %v2958_v19 = vpop.permute.xlu1 %2957 }
0x2a26   :  { %vm2980_vm1 = vcmp.eq.s32.totalorder %v5149_v23, %v2958_v19 }
0x2a27   :  { %v5153_v28 = vsel %vm2980_vm1, 1.0, %v4183_v22 }
0x2a28   :  { %v3019_v55 = vmul.f32 %v5153_v28, %v4999_v9  ;;  %v3177_v9 = vsel %vm3159_vm2, %v5055_v25, 0.0 }
0x2a2d   :  { %v2964_v42 = vpop.permute.xlu1 %2963 }
0x2a2e   :  { %vm2982_vm11 = vcmp.eq.s32.totalorder %v5149_v23, %v2964_v42 }
0x2a40   :  { %v3404_v56 = vpop.permute.xlu2 %3403 }
0x2a41   :  { %v3406_v54 = vmul.f32 %v3404_v56, %v5028_v61  ;;  %v3021_v56 = vsel %vm3020_vm3, %v3019_v55, 0.0 }
0x2a58   :  { %v3410_v29 = vpop.permute.xlu0 %3409 }
0x2a59   :  { %v3412_v60 = vmul.f32 %v3410_v29, %v5026_v39  ;;  %v3174_v29 = vsel %vm3159_vm2, %v3004_v59, 0.0 }
0x2a5b   :  { %v3413_v41 = vadd.f32 %v3412_v60, %v3406_v54  ;;  %v3175_v54 = vsel %vm3159_vm2, %v5012_v48, 0.0 }
0x2a5d   :  { %4026 = vlog2.f32 %v3413_v41  ;;  %v3176_v41 = vadd.f32 %v3175_v54, %v3174_v29 }
0x2a5f   :  { %v3178_v0 = vadd.f32 %v3177_v9, %v3176_v41 }
0x2a61   :  { %v3180_v34 = vadd.f32 %v3179_v8, %v3178_v0 }
0x2a63   :  { %v4027_v17 = vpop.eup %4026 }
0x2a64   :  { %v3416_v1 = vmul.f32 0.6931472, %v4027_v17  ;;  %v3181_v17 = vsel %vm3159_vm2, %v5093_v14, 0.0 }
0x2a65   :  { %v3182_v51 = vadd.f32 %v3181_v17, %v3180_v34 }
0x2a66   :  { %v3417_v6 = vadd.f32 %v3416_v1, %v3414_v57  ;;  %v3183_v57 = vsel %vm3159_vm2, %v5100_v16, 0.0  ;;  %v5179_v1 = vld [vmem:[%s5382_s2 + $0xc] sm:$0x3] }
0x2a67   :  { %vm3481_vm4 = vcmp.gt.f32.partialorder %v5179_v1, 0.5 }
0x2a68   :  { %v3418_v47 = vadd.f32 %v3417_v6, %v5122_v50  ;;  %v3184_v6 = vadd.f32 %v3183_v57, %v3182_v51  ;;  %v2938_v51 = vrot.slane %v5122_v50, 4 }
0x2a6a   :  { %v3425_v36 = vsel %vm3424_vm15, %v3418_v47, %v5085_v12  ;;  %v2953_v12 = vld [vmem:[%s5381_s1 + $0xa] sm:$0x3] }
0x2a6b   :  { %v3426_v7 = vsel %vm3020_vm3, %v3425_v36, -inf }
0x2a6c   :  { %3427 = vmax.xlane.f32.xlu2 %v3426_v7  ;;  %v3185_v7 = vsel %vm3159_vm2, %v5179_v1, 0.0 }
0x2adf   :  { %v3428_v3 = vpop.xlane.xlu2 %3427 }
0x2ae0   :  { %v3429_v26 = vsub.f32 %v3425_v36, %v3428_v3  ;;  %v3445_v24 = vadd.f32 %v3428_v3, %v5021_v32  ;;  %v3482_v3 = vsel %vm3481_vm4, 1, %v4186_v18 }
0x2ae2   :  { %v3430_v53 = vmul.f32 1.442695, %v3429_v26  ;;  %v5191_v26 = vld [vmem:[%s5382_s2 + $0xe] sm:$0x3] }
0x2ae3   :  { %vm3512_vm14 = vcmp.gt.f32.partialorder %v5191_v26, 0.5 }
0x2ae4   :  { %4028 = vpow2.f32 %v3430_v53  ;;  %v3186_v53 = vadd.f32 %v3185_v7, %v3184_v6 }
0x2aea   :  { %v4029_v4 = vpop.eup %4028 }
0x2aeb   :  { %3434 = vperm.xlu0 %3684, %v4029_v4  }
0x2af3   :  { %3685 = vset.pattern.permute.xlu0 %v4185_v10 }
0x2af4   :  { %3440 = vperm.xlu0 %3685, %v4029_v4   ;;  %v3187_v4 = vsel %vm3159_vm2, %v5191_v26, 0.0 }
0x2afc   :  { %3686 = vset.pattern.permute.xlu0 %v4186_v18 }
0x2afd   :  { %2960 = vperm.xlu0 %3686, %v2949_v49  }
0x2b05   :  { %2972 = vperm.xlu0 %3686, %v2953_v12   ;;  %v2967_v12 = vpop.permute.xlu1 %2966 }
0x2b06   :  { %vm2983_vm9 = vcmp.eq.s32.totalorder %v5149_v23, %v2967_v12 }
0x2b0d   :  { %v2976_v19 = vpop.permute.xlu1 %2975 }
0x2b0e   :  { %vm2986_vm7 = vcmp.eq.s32.totalorder %v5149_v23, %v2976_v19 }
0x2b0f   :  { %v5225_v59 = vsel %vm2986_vm7, 1.0, %v4183_v22 }
0x2b5d   :  { %v3435_v35 = vpop.permute.xlu0 %3434 }
0x2b5e   :  { %v3437_v62 = vmul.f32 %v3435_v35, %v5028_v61  ;;  %v3188_v35 = vadd.f32 %v3187_v4, %v3186_v53 }
0x2b60   :  { %vm3659_vm13 = vcmp.lt.s32.totalorder %v3188_v35, 0 }
0x2b66   :  { %v3441_v44 = vpop.permute.xlu0 %3440 }
0x2b67   :  { %v3443_v5 = vmul.f32 %v3441_v44, %v5026_v39 }
0x2b69   :  { %v3444_v20 = vadd.f32 %v3443_v5, %v3437_v62  ;;  %v3660_v62 = vceil.f32 %v3188_v35  ;;  %v3661_v5 = vfloor.f32 %v3188_v35 }
0x2b6b   :  { %4030 = vlog2.f32 %v3444_v20  ;;  %v5205_v20 = vsel %vm2983_vm9, 1.0, %v4183_v22 }
0x2b6f   :  { %v2961_v47 = vpop.permute.xlu0 %2960 }
0x2b70   :  { %vm2981_vm12 = vcmp.eq.s32.totalorder %v5149_v23, %v2961_v47 }
0x2b71   :  { %v4031_v21 = vpop.eup %4030  ;;  %v5198_v49 = vsel %vm2981_vm12, 1.0, %v4183_v22 }
0x2b72   :  { %v3447_v52 = vmul.f32 0.6931472, %v4031_v21  ;;  %v3689_v44 = vpack.i.bf16 %v5198_v49, %v5153_v28  ;;  %v5208_v21 = vsel %vm2982_vm11, 1.0, %v4183_v22 }
0x2b74   :  { %v3448_v45 = vadd.f32 %v3447_v52, %v3445_v24  ;;  %v3662_v24 = vsel %vm3659_vm13, %v3660_v62, %v3661_v5 }
0x2b76   :  { %v3449_v43 = vadd.f32 %v3448_v45, %v2937_v37  ;;  %v3694_v45 = vpack.i.bf16 %v5205_v20, %v5208_v21 }
0x2b77   :  { %v2973_v52 = vpop.permute.xlu0 %2972 }
0x2b78   :  { %v5141_v46 = vsel %vm3455_vm0, %v3449_v43, %v3425_v36  ;;  %v2955_v36 = vld [vmem:[%s5381_s1 + $0xe] sm:$0x3]  ;;  %v3663_v43 = vcvt.f32.s32 %v3662_v24  ;;  %vm2985_vm5 = vcmp.eq.s32.totalorder %v5149_v23, %v2973_v52 }
0x2b79   :  { %v3457_v11 = vsel %vm3020_vm3, %v5141_v46, -inf }
0x2b7a   :  { %3458 = vmax.xlane.f32.xlu2 %v3457_v11  ;;  %v5215_v11 = vsel %vm2985_vm5, 1.0, %v4183_v22  ;;  %v3646_v15 = vadd.s32 4294967295, %v3663_v43 }
0x2b7c   :  { %vm3191_vm10 = vcmp.eq.s32.totalorder %v3646_v15, 0  ;;  %vm3192_vm15 = vcmp.eq.s32.totalorder %v3646_v15, 1  ;;  %vm3193_vm0 = vcmp.eq.s32.totalorder %v3646_v15, 2  ;;  %vm3196_vm1 = vcmp.eq.s32.totalorder %v3646_v15, 5 }
0x2b7d   :  { %v3649_v53 = vsel %vm3193_vm0, 1.0, %v4183_v22  ;;  %vm3197_vm4 = vcmp.eq.s32.totalorder %v3646_v15, 6  ;;  %v3652_v12 = vsel %vm3196_vm1, 1.0, %v4183_v22  ;;  %vm3194_vm12 = vcmp.eq.s32.totalorder %v3646_v15, 3 }
0x2b7e   :  { %v3653_v35 = vsel %vm3197_vm4, 1.0, %v4183_v22  ;;  %vm3195_vm9 = vcmp.eq.s32.totalorder %v3646_v15, 4  ;;  %vm3198_vm11 = vcmp.eq.s32.totalorder %v3646_v15, 7 }
0x2b7f   :  { %v3738_v62 = vpack.i.bf16 %v3653_v35, %v3652_v12  ;;  %v3654_v5 = vsel %vm3198_vm11, 1.0, %v4183_v22 }
0x2b92   :  { %2969 = vperm.xlu2 %3682, %v2952_v13  }
0x2b9a   :  { %3709 = vset.pattern.permute.xlu2 %v4185_v10 }
0x2bbb   :  { %3022 = vadd.xlane.f32.xlu2 %v3021_v56  ;;  %v3647_v56 = vsel %vm3191_vm10, 1.0, %v4183_v22 }
0x2bbc   :  { %v3704_v29 = vpack.i.bf16 %v3647_v56, %v5225_v59 }
0x2bed   :  { %v5164_v60 = vpop.xlane.xlu2 %3458 }
0x2bee   :  { %v3460_v58 = vsub.f32 %v5141_v46, %v5164_v60  ;;  %v3476_v8 = vadd.f32 %v5164_v60, %v5021_v32  ;;  %v3513_v60 = vsel %vm3512_vm14, 1, %v4186_v18 }
0x2bf0   :  { %v3461_v63 = vmul.f32 1.442695, %v3460_v58 }
0x2bf2   :  { %4032 = vpow2.f32 %v3461_v63 }
0x2bf5   :  { %v2970_v38 = vpop.permute.xlu2 %2969 }
0x2bf6   :  { %vm2984_vm6 = vcmp.eq.s32.totalorder %v5149_v23, %v2970_v38 }
0x2bf7   :  { %v5218_v13 = vsel %vm2984_vm6, 1.0, %v4183_v22 }
0x2bf8   :  { %v4033_v48 = vpop.eup %4032  ;;  %v3699_v55 = vpack.i.bf16 %v5215_v11, %v5218_v13 }
0x2bf9   :  { %3471 = vperm.xlu1 %3687, %v4033_v48   ;;  %3465 = vperm.xlu0 %3686, %v4033_v48  }
0x2c01   :  { %2978 = vperm.xlu0 %3686, %v2955_v36   ;;  %3688 = vset.pattern.permute.xlu1 %v4186_v18 }
0x2c02   :  { %3484 = vperm.xlu1 %3688, %v3482_v3  }
0x2c09   :  { %3690 = vperm.xlu0 %3686, %v3689_v44  }
0x2c11   :  { %3695 = vperm.xlu0 %3686, %v3694_v45  }
0x2c19   :  { %3700 = vperm.xlu0 %3686, %v3699_v55  }
0x2c21   :  { %3705 = vperm.xlu0 %3686, %v3704_v29  }
0x2c2e   :  { %v5260_v19 = vpop.xlane.xlu2 %3022 }
0x2c6b   :  { %v3466_v54 = vpop.permute.xlu0 %3465  ;;  %v3472_v41 = vpop.permute.xlu1 %3471 }
0x2c6c   :  { %v3468_v58 = vmul.f32 %v3466_v54, %v5028_v61  ;;  %v3474_v9 = vmul.f32 %v3472_v41, %v5026_v39 }
0x2c6e   :  { %v3475_v63 = vadd.f32 %v3474_v9, %v3468_v58  ;;  %v5269_v58 = vperm.slane %v4989_v30, 0 }
0x2c70   :  { %4034 = vlog2.f32 %v3475_v63 }
0x2c73   :  { %v5254_v52 = vpop.permute.xlu0 %2978 }
0x2c74   :  { %v3485_v17 = vpop.permute.xlu1 %3484  ;;  %vm2987_vm5 = vcmp.eq.s32.totalorder %v5149_v23, %v5254_v52 }
0x2c75   :  { %vm3486_vm8 = vcmp.eq.s32.totalorder %v3485_v17, 1  ;;  %v3645_v52 = vsel %vm2987_vm5, 1.0, %v4183_v22 }
0x2c76   :  { %v4035_v0 = vpop.eup %4034 }
0x2c77   :  { %v3478_v34 = vmul.f32 0.6931472, %v4035_v0  ;;  %v5272_v0 = vperm.slane %v4989_v30, 1 }
0x2c79   :  { %v3479_v48 = vadd.f32 %v3478_v34, %v3476_v8 }
0x2c7b   :  { %v3480_v57 = vadd.f32 %v3479_v48, %v2938_v51  ;;  %v3691_v38 = vpop.permute.xlu0 %3690 }
0x2c7c   :  { %v3693_v9 = vunpack.i.h.bf16 %v3691_v38  ;;  %v3692_v63 = vunpack.i.l.bf16 %v3691_v38  ;;  %v5294_v38 = vld [vmem:[%s5394_s14] ss:$0 sm:$0xff] }
0x2c7d   :  { %v5236_v42 = vsel %vm3486_vm8, %v3480_v57, %v5141_v46  ;;  %v3648_v46 = vsel %vm3192_vm15, 1.0, %v4183_v22 }
0x2c7e   :  { %v3488_v6 = vsel %vm3020_vm3, %v5236_v42, -inf  ;;  %v3727_v4 = vpack.i.bf16 %v3649_v53, %v3648_v46  ;;  %v3061_v57 = vmul.f32 %v3693_v9, %v5269_v58  ;;  %v2939_v46 = vrot.slane %v5122_v50, 6 }
0x2c7f   :  { %3489 = vmax.xlane.f32.xlu1 %v3488_v6  ;;  %v3060_v6 = vmul.f32 %v3692_v63, %v5269_v58 }
0x2c98   :  { %3515 = vperm.xlu1 %3688, %v3513_v60  }
0x2cf2   :  { %v3490_v47 = vpop.xlane.xlu1 %3489 }
0x2cf3   :  { %v3491_v36 = vsub.f32 %v5236_v42, %v3490_v47  ;;  %v3507_v60 = vadd.f32 %v3490_v47, %v5021_v32 }
0x2cf5   :  { %v3492_v7 = vmul.f32 1.442695, %v3491_v36 }
0x2cf7   :  { %4036 = vpow2.f32 %v3492_v7 }
0x2cfd   :  { %v4037_v3 = vpop.eup %4036 }
0x2cfe   :  { %3502 = vperm.xlu2 %3709, %v4037_v3   ;;  %3496 = vperm.xlu0 %3686, %v4037_v3  }
0x2d06   :  { %3722 = vperm.xlu2 %3709, %v3699_v55   ;;  %3710 = vset.pattern.permute.xlu0 %v4185_v10  ;;  %v3650_v10 = vsel %vm3194_vm12, 1.0, %v4183_v22 }
0x2d07   :  { %3712 = vperm.xlu0 %3710, %v3689_v44   ;;  %v3651_v44 = vsel %vm3195_vm9, 1.0, %v4183_v22 }
0x2d08   :  { %v3733_v24 = vpack.i.bf16 %v3651_v44, %v3650_v10 }
0x2d0a   :  { %v3516_v10 = vpop.permute.xlu1 %3515 }
0x2d0b   :  { %vm3517_vm13 = vcmp.eq.s32.totalorder %v3516_v10, 1 }
0x2d0e   :  { %3726 = vset.pattern.permute.xlu2 %v4186_v18 }
0x2d0f   :  { %3728 = vperm.xlu2 %3726, %v3727_v4   ;;  %3717 = vperm.xlu0 %3710, %v3694_v45   ;;  %v5256_v45 = vpop.permute.xlu0 %3695 }
0x2d17   :  { %3739 = vperm.xlu2 %3726, %v3738_v62   ;;  %3099 = vperm.xlu0 %3710, %v5225_v59   ;;  %v5258_v43 = vpop.permute.xlu0 %3700  ;;  %v3697_v62 = vunpack.i.l.bf16 %v5256_v45 }
0x2d18   :  { %v3703_v17 = vunpack.i.h.bf16 %v5258_v43 }
0x2d1a   :  { %v3065_v53 = vmul.f32 %v3703_v17, %v5269_v58  ;;  %v3698_v17 = vunpack.i.h.bf16 %v5256_v45 }
0x2d1c   :  { %v3063_v45 = vmul.f32 %v3698_v17, %v5269_v58 }
0x2d1f   :  { %3252 = vperm.xlu2 %3726, %v3654_v5   ;;  %3732 = vset.pattern.permute.xlu0 %v4186_v18  ;;  %v5262_v15 = vpop.permute.xlu0 %3705 }
0x2d20   :  { %3734 = vperm.xlu0 %3732, %v3733_v24  }
0x2d58   :  { %v3503_v55 = vpop.permute.xlu2 %3502 }
0x2d59   :  { %v3505_v29 = vmul.f32 %v3503_v55, %v5026_v39 }
0x2d60   :  { %v5266_v18 = vpop.permute.xlu2 %3722 }
0x2d61   :  { %v3725_v8 = vunpack.i.h.bf16 %v5266_v18 }
0x2d63   :  { %v3108_v36 = vmul.f32 %v3725_v8, %v5272_v0 }
0x2d65   :  { %v3115_v44 = vadd.f32 %v3108_v36, %v3065_v53 }
0x2d69   :  { %v3729_v9 = vpop.permute.xlu2 %3728 }
0x2d6a   :  { %v3731_v33 = vunpack.i.h.bf16 %v3729_v9 }
0x2d70   :  { %v3497_v56 = vpop.permute.xlu0 %3496 }
0x2d71   :  { %v3499_v54 = vmul.f32 %v3497_v56, %v5028_v61  ;;  %v3740_v10 = vpop.permute.xlu2 %3739 }
0x2d73   :  { %v3506_v41 = vadd.f32 %v3505_v29, %v3499_v54  ;;  %v3062_v54 = vmul.f32 %v3697_v62, %v5269_v58 }
0x2d75   :  { %4038 = vlog2.f32 %v3506_v41 }
0x2d79   :  { %v3713_v34 = vpop.permute.xlu0 %3712 }
0x2d7a   :  { %v3715_v39 = vunpack.i.h.bf16 %v3713_v34  ;;  %v3714_v48 = vunpack.i.l.bf16 %v3713_v34  ;;  %v3122_v34 = vadd.f32 %v3115_v44, %v2938_v51 }
0x2d7b   :  { %v4039_v61 = vpop.eup %4038 }
0x2d7c   :  { %v3509_v7 = vmul.f32 0.6931472, %v4039_v61  ;;  %v3104_v30 = vmul.f32 %v3715_v39, %v5272_v0  ;;  %v3103_v3 = vmul.f32 %v3714_v48, %v5272_v0  ;;  %v3730_v61 = vunpack.i.l.bf16 %v3729_v9 }
0x2d7e   :  { %v3510_v4 = vadd.f32 %v3509_v7, %v3507_v60  ;;  %v3111_v12 = vadd.f32 %v3104_v30, %v3061_v57  ;;  %v3110_v35 = vadd.f32 %v3103_v3, %v3060_v6  ;;  %v3129_v6 = vmul.f32 %v5225_v59, %v3122_v34 }
0x2d7f   :  { %v3708_v60 = vunpack.i.h.bf16 %v5262_v15  ;;  %v3724_v7 = vunpack.i.l.bf16 %v5266_v18  ;;  %v3256_v3 = vmul.f32 %v3730_v61, %v5198_v49 }
0x2d80   :  { %v3511_v32 = vadd.f32 %v3510_v4, %v2939_v46  ;;  %v3118_v47 = vadd.f32 %v3111_v12, %v2935_v40  ;;  %v3117_v5 = vadd.f32 %v3110_v35, %v2934_v31  ;;  %v3702_v4 = vunpack.i.l.bf16 %v5258_v43 }
0x2d81   :  { %v3718_v24 = vpop.permute.xlu0 %3717  ;;  %v3146_v12 = vsel %vm3020_vm3, %v3129_v6, 0.0  ;;  %v3255_v35 = vmul.f32 %v3708_v60, %v5153_v28  ;;  %v3107_v62 = vmul.f32 %v3724_v7, %v5272_v0  ;;  %v3264_v18 = vsel %vm3020_vm3, %v3256_v3, 0.0 }
0x2d82   :  { %v3719_v55 = vunpack.i.l.bf16 %v3718_v24  ;;  %v3125_v56 = vmul.f32 %v5208_v21, %v3118_v47  ;;  %v3124_v29 = vmul.f32 %v5198_v49, %v3117_v5  ;;  %v3720_v41 = vunpack.i.h.bf16 %v3718_v24 }
0x2d83   :  { %v3518_v40 = vsel %vm3517_vm13, %v3511_v32, %v5236_v42  ;;  %v3064_v49 = vmul.f32 %v3702_v4, %v5269_v58  ;;  %v3263_v43 = vsel %vm3020_vm3, %v3255_v35, 0.0  ;;  %v3257_v32 = vmul.f32 %v3731_v33, %v5208_v21 }
0x2d84   :  { %v3105_v31 = vmul.f32 %v3719_v55, %v5272_v0  ;;  %v3134_v63 = vsel %vm3020_vm3, %v3125_v56, 0.0  ;;  %v3131_v8 = vsel %vm3020_vm3, %v3124_v29, 0.0  ;;  %v5307_v39 = vadd.f32 %v5294_v38, %v3518_v40 }
0x2d85   :  { %3135 = vadd.xlane.f32.xlu2 %v3134_v63  ;;  %3132 = vadd.xlane.f32.xlu0 %v3131_v8  ;;  %v3106_v42 = vmul.f32 %v3720_v41, %v5272_v0  ;;  %v3114_v47 = vadd.f32 %v3107_v62, %v3064_v49  ;;  %v3265_v28 = vadd.f32 %v3264_v18, %v3263_v43  ;;  %v3741_v24 = vunpack.i.l.bf16 %v3740_v10  ;;  %v4044_v18 = vld [vmem:[%s5382_s2 + $0x2] sm:$0x3]  ;;  %s4187_s2 = smov [#allocation14]  }
0x2d86   :  { %v3112_v48 = vadd.f32 %v3105_v31, %v3062_v54  ;;  %v3520_v57 = vsel %vm3020_vm3, %v5307_v39, -inf  ;;  %v3707_v54 = vunpack.i.l.bf16 %v5262_v15  ;;  %v3266_v41 = vsel %vm3020_vm3, %v3257_v32, 0.0  ;;  %s3548_s26 = sshll.u32 %s4187_s2, 4  ;;  %s3549_s26 = int_to_ptr.vmem [resolvable:$true] %s3548_s26 }
0x2d87   :  { %3521 = vmax.xlane.f32.xlu1 %v3520_v57  ;;  %v3113_v53 = vadd.f32 %v3106_v42, %v3063_v45  ;;  %v3742_v40 = vunpack.i.h.bf16 %v3740_v10  ;;  %v3267_v21 = vadd.f32 %v3266_v41, %v3265_v28  ;;  %v3121_v63 = vadd.f32 %v3114_v47, %v2937_v37 }
0x2d88   :  { %v3119_v51 = vadd.f32 %v3112_v48, %v2936_v2  ;;  %v3260_v8 = vmul.f32 %v3741_v24, %v5215_v11  ;;  %v3253_v48 = vpop.permute.xlu2 %3252 }
0x2d89   :  { %v3100_v36 = vpop.permute.xlu0 %3099  ;;  %v3120_v44 = vadd.f32 %v3113_v53, %v5122_v50  ;;  %v3262_v57 = vmul.f32 %v3645_v52, %v3253_v48  ;;  %v3128_v6 = vmul.f32 %v5215_v11, %v3121_v63 }
0x2d8a   :  { %v3126_v30 = vmul.f32 %v5205_v20, %v3119_v51  ;;  %v3109_v34 = vmul.f32 %v5272_v0, %v3100_v36  ;;  %v3272_v42 = vsel %vm3020_vm3, %v3260_v8, 0.0 }
0x2d8b   :  { %v3127_v29 = vmul.f32 %v5218_v13, %v3120_v44  ;;  %v3276_v36 = vsel %vm3020_vm3, %v3262_v57, 0.0 }
0x2d8c   :  { %v3137_v2 = vsel %vm3020_vm3, %v3126_v30, 0.0 }
0x2d8d   :  { %3147 = vadd.xlane.f32.xlu0 %v3146_v12  ;;  %v3140_v17 = vsel %vm3020_vm3, %v3127_v29, 0.0 }
0x2d8f   :  { %3138 = vadd.xlane.f32.xlu1 %v3137_v2 }
0x2d92   :  { %v3735_v5 = vpop.permute.xlu0 %3734 }
0x2d93   :  { %v3737_v55 = vunpack.i.h.bf16 %v3735_v5  ;;  %v3736_v56 = vunpack.i.l.bf16 %v3735_v5 }
0x2d95   :  { %v3259_v9 = vmul.f32 %v3737_v55, %v5218_v13  ;;  %v3258_v31 = vmul.f32 %v3736_v56, %v5205_v20  ;;  %v3066_v20 = vmul.f32 %v3707_v54, %v5269_v58  ;;  %v3261_v13 = vmul.f32 %v3742_v40, %v5225_v59 }
0x2d96   :  { %v3143_v58 = vsel %vm3020_vm3, %v3128_v6, 0.0 }
0x2d97   :  { %v3268_v15 = vsel %vm3020_vm3, %v3258_v31, 0.0  ;;  %3141 = vadd.xlane.f32.xlu1 %v3140_v17  ;;  %v3270_v23 = vsel %vm3020_vm3, %v3259_v9, 0.0  ;;  %v3116_v0 = vadd.f32 %v3109_v34, %v3066_v20  ;;  %v3274_v45 = vsel %vm3020_vm3, %v3261_v13, 0.0 }
0x2d98   :  { %v3269_v61 = vadd.f32 %v3268_v15, %v3267_v21 }
0x2d99   :  { %v3123_v59 = vadd.f32 %v3116_v0, %v2939_v46 }
0x2d9a   :  { %v3271_v37 = vadd.f32 %v3270_v23, %v3269_v61 }
0x2d9b   :  { %v3130_v30 = vmul.f32 %v3645_v52, %v3123_v59 }
0x2d9c   :  { %v3273_v51 = vadd.f32 %v3272_v42, %v3271_v37 }
0x2d9d   :  { %v3149_v11 = vsel %vm3020_vm3, %v3130_v30, 0.0 }
0x2d9e   :  { %v3275_v60 = vadd.f32 %v3274_v45, %v3273_v51 }
0x2d9f   :  { %3144 = vadd.xlane.f32.xlu1 %v3143_v58 }
0x2da0   :  { %v3277_v22 = vadd.f32 %v3276_v36, %v3275_v60 }
0x2da2   :  { %v3281_v7 = vmul.f32 %v5294_v38, %v3277_v22 }
0x2da4   :  { %v3282_v3 = vsel %vm3020_vm3, %v3281_v7, 0.0 }
0x2da5   :  { %3283 = vadd.xlane.f32.xlu0 %v3282_v3 }
0x2da7   :  { %3150 = vadd.xlane.f32.xlu1 %v3149_v11 }
0x2df8   :  { %v3136_v2 = vpop.xlane.xlu2 %3135  ;;  %v3133_v38 = vpop.xlane.xlu0 %3132 }
0x2df9   :  { %v3153_v10 = vmul.f32 %v3136_v2, %v5055_v25  ;;  %v3152_v44 = vmul.f32 %v4044_v18, %v3133_v38 }
0x2dfa   :  { %v3522_v53 = vpop.xlane.xlu1 %3521 }
0x2dfb   :  { %v3523_v4 = vsub.f32 %v5307_v39, %v3522_v53  ;;  %v3161_v49 = vsel %vm3159_vm2, %v3153_v10, 0.0  ;;  %v3160_v43 = vsel %vm3159_vm2, %v3152_v44, 0.0 }
0x2dfc   :  { %v3162_v5 = vadd.f32 %v3161_v49, %v3160_v43 }
0x2dfd   :  { %v3524_v12 = vmul.f32 1.442695, %v3523_v4 }
0x2dff   :  { %4040 = vpow2.f32 %v3524_v12 }
0x2e00   :  { %v3148_v24 = vpop.xlane.xlu0 %3147 }
0x2e02   :  { %v3139_v35 = vpop.xlane.xlu1 %3138 }
0x2e03   :  { %v3154_v39 = vmul.f32 %v3139_v35, %v5073_v27  ;;  %v3157_v27 = vmul.f32 %v3148_v24, %v5179_v1 }
0x2e05   :  { %v4041_v50 = vpop.eup %4040  ;;  %v3163_v47 = vsel %vm3159_vm2, %v3154_v39, 0.0 }
0x2e06   :  { %v3526_v46 = vsel %vm3020_vm3, %v4041_v50, 0.0  ;;  %v3164_v55 = vadd.f32 %v3163_v47, %v3162_v5  ;;  %vm3541_vm3 = vcmask 0  }
0x2e07   :  { %3527 = vadd.xlane.f32.xlu2 %v3526_v46 }
0x2e0a   :  { %v3142_v33 = vpop.xlane.xlu1 %3141 }
0x2e0b   :  { %v3155_v32 = vmul.f32 %v3142_v33, %v5093_v14  ;;  %v3169_v14 = vsel %vm3159_vm2, %v3157_v27, 0.0 }
0x2e0d   :  { %v3165_v25 = vsel %vm3159_vm2, %v3155_v32, 0.0 }
0x2e0e   :  { %v3166_v54 = vadd.f32 %v3165_v25, %v3164_v55 }
0x2e12   :  { %v3145_v62 = vpop.xlane.xlu1 %3144 }
0x2e13   :  { %v3156_v28 = vmul.f32 %v3145_v62, %v5100_v16 }
0x2e15   :  { %v3167_v29 = vsel %vm3159_vm2, %v3156_v28, 0.0 }
0x2e16   :  { %v3168_v40 = vadd.f32 %v3167_v29, %v3166_v54 }
0x2e18   :  { %v3170_v31 = vadd.f32 %v3169_v14, %v3168_v40  ;;  %v3284_v15 = vpop.xlane.xlu0 %3283 }
0x2e1a   :  { %v3151_v56 = vpop.xlane.xlu1 %3150 }
0x2e1b   :  { %v3158_v41 = vmul.f32 %v3151_v56, %v5191_v26 }
0x2e1d   :  { %v3171_v9 = vsel %vm3159_vm2, %v3158_v41, 0.0 }
0x2e1e   :  { %v3172_v21 = vadd.f32 %v3171_v9, %v3170_v31 }
0x2e20   :  { %v3173_v63 = vadd.f32 %v3172_v21, %v5260_v19 }
0x2e22   :  { %v3285_v17 = vadd.f32 %v3284_v15, %v3173_v63 }
0x2e7a   :  { %v3528_v16 = vpop.xlane.xlu2 %3527 }
0x2e7b   :  { %4042 = vlog2.f32 %v3528_v16 }
0x2e81   :  { %v4043_v8 = vpop.eup %4042 }
0x2e82   :  { %v3530_v34 = vmul.f32 0.6931472, %v4043_v8 }
0x2e84   :  { %v3531_v48 = vadd.f32 %v3530_v34, %v3522_v53 }
0x2e86   :  { %v3532_v61 = vsub.f32 %v3285_v17, %v3531_v48 }
0x2e88   :  { %v3533_v1 = vsel %vm3159_vm2, %v3532_v61, 0.0 }
0x2e89   :  { %v3534_v26 = vrot.slane %v3533_v1, 4 }
0x2e8b   :  { %v3535_v20 = vadd.f32 %v3534_v26, %v3533_v1 }
0x2e8d   :  { %v3536_v13 = vrot.slane %v3535_v20, 2 }
0x2e8f   :  { %v3537_v23 = vadd.f32 %v3536_v13, %v3535_v20 }
0x2e91   :  { %v3538_v52 = vrot.slane %v3537_v23, 1 }
0x2e93   :  { %v3539_v19 = vadd.f32 %v3538_v52, %v3537_v23 }
0x2e95   :  { %v3540_v37 = vsub.f32 0.0, %v3539_v19 }
0x2e97   :  { %3542 = vst.msk [vmem:[#allocation14] sm:$0x1] %vm3541_vm3, %v3540_v37 }
0x2e98   :  { %3553 = dma.vmem_to_hbm [thread:$0]  %s3549_s26, 16, %s3551_s23, [#allocation8]  }
0x2e99   :  { %4171 = dma.done.wait [#allocation8], 16  }
0x2e9a   :  { %4172 = vsyncadd [#allocation8], 4294967280 }
0x2e9b   :  { %3558 = vsyncpa [#allocation7], 1 }
0x2e9c   :  { %3559 = vsyncpa [#allocation10], 1 }
0x2e9d   :  { %3560 = vsyncpa [#allocation13], 1 }
0x2e9e   :  { %3561 = vsyncpa [#allocation8], 1 }

</bundles_post_ra>
